<compile_context>
chip_gen: v7x
topology: tpu7x:2x2x1
jax: 0.10.0
libtpu: 0.0.40
codegen_flags: <defaults>
</compile_context>

<pallas_src>
import jax
import jax.numpy as jnp
from jax.experimental import pallas as pl
from jax.experimental.pallas import tpu as pltpu


def _round_up(x, m):
    return (x + m - 1) // m * m


def _pick_row_tile(H, W, target_m=512):
    """Largest divisor R of H with R*W <= target_m (M of the im2col matmul)."""
    best = 1
    for r in range(1, H + 1):
        if H % r == 0 and r * W <= target_m:
            best = r
    return best


def _make_basic_block_kernel(H, W, Wp, Cin, Cout, R):
    n_tiles = H // R

    def im2col(ref, row_start, rows_n, C):
        """(rows_n*W, 9*C) im2col LHS for a 3x3 / stride-1 / SAME conv.

        `ref` is a (H+2, Wp, C) VMEM ref whose valid data lives in columns
        [0, W) (columns [W, Wp) are zero) and whose rows bracketing the image
        supply the vertical zero padding.  All slices start at offset 0 or 1;
        the kx=-1 tap is built with an explicit zero column (no offset-(-1)).
        """
        dt = ref.dtype
        zero_col = jnp.zeros((rows_n, 1, C), dt)
        taps = []
        for ky in range(3):
            rows = ref[row_start + ky: row_start + ky + rows_n]           # (rows_n, Wp, C)
            left = jnp.concatenate([zero_col, rows[:, :W - 1, :]], axis=1)  # x[., w-1]
            center = rows[:, :W, :]                                         # x[., w]
            right = rows[:, 1:W + 1, :]                                     # x[., w+1] (col W is 0)
            taps += [left, center, right]
        lhs = jnp.concatenate(taps, axis=-1)                              # (rows_n, W, 9*C)
        return lhs.reshape(rows_n * W, 9 * C)

    def kernel(xp_ref, w1_ref, w2_ref, o_ref, mid_ref):
        # xp_ref : (H+2, Wp, Cin)   padded input image (batch dim squeezed)
        # w1_ref : (9*Cin, Cout)    conv1 weights, (ky, kx, cin)-major im2col layout
        # w2_ref : (9*Cout, Cout)   conv2 weights
        # o_ref  : (H, W, Cout)     output image
        # mid_ref: (H+2, Wp, Cout)  conv1 output with the same padding, VMEM scratch
        dt = mid_ref.dtype

        # Zero only the halo of the intermediate (top row, bottom row, right pad
        # columns); the interior is fully overwritten by conv1 below.
        mid_ref[0] = jnp.zeros((Wp, Cout), dt)
        mid_ref[H + 1] = jnp.zeros((Wp, Cout), dt)
        mid_ref[:, W:, :] = jnp.zeros((H + 2, Wp - W, Cout), dt)

        w1 = w1_ref[...]
        w2 = w2_ref[...]

        # ---- conv1 (3x3, s=1, SAME) + ReLU -> mid (stored at column offset 0) ----
        for t in range(n_tiles):
            lhs = im2col(xp_ref, t * R, R, Cin)
            y = jnp.dot(lhs, w1, preferred_element_type=jnp.float32)
            y = jnp.maximum(y, 0.0).astype(dt)
            mid_ref[1 + t * R: 1 + t * R + R, :W, :] = y.reshape(R, W, Cout)

        # ---- conv2 (3x3, s=1, SAME) + identity residual + ReLU -> out ----
        for t in range(n_tiles):
            lhs = im2col(mid_ref, t * R, R, Cout)
            y = jnp.dot(lhs, w2, preferred_element_type=jnp.float32)
            res = xp_ref[1 + t * R: 1 + t * R + R, :W, :].astype(jnp.float32)
            y = y.reshape(R, W, Cout) + res
            o_ref[t * R: t * R + R, :, :] = jnp.maximum(y, 0.0).astype(o_ref.dtype)

    return kernel


def quant_basic_block_forward(x_nchw, w1_oihw, w2_oihw, *, row_tile=None):
    """QuantBasicBlock.forward (quant disabled, downsample=None, stride=1).

    x_nchw : (B, C, H, W) float32 (PyTorch layout)
    w*_oihw: (Cout, Cin, 3, 3) float32 (PyTorch conv layout, bias-free)
    """
    B, C, H, W = x_nchw.shape
    Cout, Cin, kh, kw = w1_oihw.shape
    assert (kh, kw) == (3, 3) and Cin == C
    assert Cout == C, "identity-shortcut path requires Cin == Cout (downsample is None)"

    Wp = _round_up(W + 1, 8)                      # >=1 zero column on the RIGHT only
    R = row_tile if row_tile is not None else _pick_row_tile(H, W)
    assert H % R == 0

    # Layout glue (in a full model this lives at module init / activations stay NHWC).
    x_nhwc = jnp.transpose(x_nchw, (0, 2, 3, 1))
    xp = jnp.pad(x_nhwc, ((0, 0), (1, 1), (0, Wp - W), (0, 0)))
    w1 = jnp.transpose(w1_oihw, (2, 3, 1, 0)).reshape(9 * C, Cout)     # (ky,kx,cin)-major
    w2 = jnp.transpose(w2_oihw, (2, 3, 1, 0)).reshape(9 * Cout, Cout)

    kernel = _make_basic_block_kernel(H, W, Wp, C, Cout, R)

    bpf = jnp.dtype(jnp.float32).itemsize
    block_bytes = ((H + 2) * Wp * C + H * W * Cout
                   + 9 * C * Cout + 9 * Cout * Cout) * bpf
    mid_bytes = (H + 2) * Wp * Cout * bpf
    vmem_limit = min(max(32 * 1024 * 1024, 2 * block_bytes + mid_bytes + (8 << 20)),
                     64 * 1024 * 1024)

    out_nhwc = pl.pallas_call(
        kernel,
        out_shape=jax.ShapeDtypeStruct((B, H, W, Cout), x_nhwc.dtype),
        grid=(B,),
        in_specs=[
            pl.BlockSpec((None, H + 2, Wp, C), lambda b: (b, 0, 0, 0)),   # per-image slab
            pl.BlockSpec((9 * C, Cout), lambda b: (0, 0)),                 # conv1 weights
            pl.BlockSpec((9 * Cout, Cout), lambda b: (0, 0)),              # conv2 weights
        ],
        out_specs=pl.BlockSpec((None, H, W, Cout), lambda b: (b, 0, 0, 0)),
        scratch_shapes=[pltpu.VMEM((H + 2, Wp, Cout), jnp.float32)],
        compiler_params=pltpu.CompilerParams(
            dimension_semantics=("parallel",),
            vmem_limit_bytes=int(vmem_limit),
        ),
    )(xp, w1, w2)

    return jnp.transpose(out_nhwc, (0, 3, 1, 2))  # back to NCHW


def _reference_forward(x, w1, w2):
    """Pure-JAX reference in NCHW (mirrors the PyTorch forward)."""
    dn = ("NCHW", "OIHW", "NCHW")
    out = jax.lax.conv_general_dilated(x, w1, (1, 1), "SAME", dimension_numbers=dn)
    out = jnp.maximum(out, 0.0)
    out = jax.lax.conv_general_dilated(out, w2, (1, 1), "SAME", dimension_numbers=dn)
    return jnp.maximum(out + x, 0.0)


if __name__ == "__main__":
    key = jax.random.PRNGKey(0)
    k1, k2, k3 = jax.random.split(key, 3)

    B, C, H, W = 2, 4, 16, 16
    x = jax.random.normal(k1, (B, C, H, W), dtype=jnp.float32)
    # Deterministic synthetic conv weights (ResNet BasicBlock convs have no bias).
    w1 = 0.2 * jax.random.normal(k2, (C, C, 3, 3), dtype=jnp.float32)
    w2 = 0.2 * jax.random.normal(k3, (C, C, 3, 3), dtype=jnp.float32)

    out = jax.block_until_ready(quant_basic_block_forward(x, w1, w2))
    ref = _reference_forward(x, w1, w2)

    assert out.shape == (B, C, H, W)
    max_err = float(jnp.max(jnp.abs(out - ref)))
    assert jnp.allclose(out, ref, atol=1e-4, rtol=1e-4), f"max_err={max_err}"

    print("KERNEL_OK")
</pallas_src>

<mosaic_0001>
module attributes {stable_mosaic.version = 11 : i64} {
  func.func @kernel(%arg0: i32, %arg1: memref<1x18x24x4xf32, #tpu.memory_space<vmem>>, %arg2: memref<36x4xf32, #tpu.memory_space<vmem>>, %arg3: memref<36x4xf32, #tpu.memory_space<vmem>>, %arg4: memref<1x16x16x4xf32, #tpu.memory_space<vmem>>, %arg5: memref<18x24x4xf32, #tpu.memory_space<vmem>>) attributes {dimension_semantics = [#tpu.dimension_semantics<parallel>], iteration_bounds = array<i64: 2>, scalar_prefetch = 0 : i64, scratch_operands = 1 : i64, tpu.core_type = #tpu.core_type<tc>, window_params = [{transform_indices = @transform_0, window_bounds = array<i64: 1, 18, 24, 4>}, {pipeline_mode = #tpu.pipeline_mode<synchronous>, transform_indices = @transform_1, window_bounds = array<i64: 36, 4>}, {pipeline_mode = #tpu.pipeline_mode<synchronous>, transform_indices = @transform_2, window_bounds = array<i64: 36, 4>}, {transform_indices = @transform_3, window_bounds = array<i64: 1, 16, 16, 4>}]} {
    %cst = arith.constant 0.000000e+00 : f32
    %0 = vector.broadcast %cst : f32 to vector<24x4xf32>
    %c0 = arith.constant 0 : index
    %c0_0 = arith.constant 0 : index
    %c0_1 = arith.constant 0 : index
    %1 = vector.load %arg5[%c0, %c0_0, %c0_1] : memref<18x24x4xf32, #tpu.memory_space<vmem>>, vector<1x24x4xf32>
    %2 = vector.shape_cast %1 : vector<1x24x4xf32> to vector<24x4xf32>
    %3 = vector.shape_cast %0 : vector<24x4xf32> to vector<1x24x4xf32>
    tpu.vector_store %arg5[%c0, %c0_0, %c0_1], %3 {strides = array<i32>} : memref<18x24x4xf32, #tpu.memory_space<vmem>>, vector<1x24x4xf32>,
    %cst_2 = arith.constant 0.000000e+00 : f32
    %4 = vector.broadcast %cst_2 : f32 to vector<24x4xf32>
    %c17 = arith.constant 17 : index
    %c0_3 = arith.constant 0 : index
    %c0_4 = arith.constant 0 : index
    %5 = vector.load %arg5[%c17, %c0_3, %c0_4] : memref<18x24x4xf32, #tpu.memory_space<vmem>>, vector<1x24x4xf32>
    %6 = vector.shape_cast %5 : vector<1x24x4xf32> to vector<24x4xf32>
    %7 = vector.shape_cast %4 : vector<24x4xf32> to vector<1x24x4xf32>
    tpu.vector_store %arg5[%c17, %c0_3, %c0_4], %7 {strides = array<i32>} : memref<18x24x4xf32, #tpu.memory_space<vmem>>, vector<1x24x4xf32>,
    %cst_5 = arith.constant 0.000000e+00 : f32
    %8 = vector.broadcast %cst_5 : f32 to vector<18x8x4xf32>
    %c0_6 = arith.constant 0 : index
    %c16 = arith.constant 16 : index
    %c0_7 = arith.constant 0 : index
    %9 = vector.load %arg5[%c0_6, %c16, %c0_7] : memref<18x24x4xf32, #tpu.memory_space<vmem>>, vector<18x8x4xf32>
    tpu.vector_store %arg5[%c0_6, %c16, %c0_7], %8 {strides = array<i32>} : memref<18x24x4xf32, #tpu.memory_space<vmem>>, vector<18x8x4xf32>,
    %c0_8 = arith.constant 0 : index
    %c0_9 = arith.constant 0 : index
    %10 = vector.load %arg2[%c0_8, %c0_9] : memref<36x4xf32, #tpu.memory_space<vmem>>, vector<36x4xf32>
    %c0_10 = arith.constant 0 : index
    %c0_11 = arith.constant 0 : index
    %11 = vector.load %arg3[%c0_10, %c0_11] : memref<36x4xf32, #tpu.memory_space<vmem>>, vector<36x4xf32>
    %cst_12 = arith.constant 0.000000e+00 : f32
    %12 = vector.broadcast %cst_12 : f32 to vector<16x1x4xf32>
    %c0_13 = arith.constant 0 : index
    %c0_14 = arith.constant 0 : index
    %c0_15 = arith.constant 0 : index
    %c0_16 = arith.constant 0 : index
    %13 = vector.load %arg1[%c0_13, %c0_14, %c0_15, %c0_16] : memref<1x18x24x4xf32, #tpu.memory_space<vmem>>, vector<1x16x24x4xf32>
    %14 = vector.shape_cast %13 : vector<1x16x24x4xf32> to vector<16x24x4xf32>
    %15 = vector.extract_strided_slice %14 {offsets = [0, 0, 0], sizes = [16, 15, 4], strides = [1, 1, 1]} : vector<16x24x4xf32> to vector<16x15x4xf32>
    %16 = tpu.concatenate %12, %15 in 1 : vector<16x1x4xf32>, vector<16x15x4xf32> -> vector<16x16x4xf32>
    %17 = vector.extract_strided_slice %14 {offsets = [0, 0, 0], sizes = [16, 16, 4], strides = [1, 1, 1]} : vector<16x24x4xf32> to vector<16x16x4xf32>
    %18 = vector.extract_strided_slice %14 {offsets = [0, 1, 0], sizes = [16, 16, 4], strides = [1, 1, 1]} : vector<16x24x4xf32> to vector<16x16x4xf32>
    %c0_17 = arith.constant 0 : index
    %c1 = arith.constant 1 : index
    %c0_18 = arith.constant 0 : index
    %c0_19 = arith.constant 0 : index
    %19 = vector.load %arg1[%c0_17, %c1, %c0_18, %c0_19] : memref<1x18x24x4xf32, #tpu.memory_space<vmem>>, vector<1x16x24x4xf32>
    %20 = vector.shape_cast %19 : vector<1x16x24x4xf32> to vector<16x24x4xf32>
    %21 = vector.extract_strided_slice %20 {offsets = [0, 0, 0], sizes = [16, 15, 4], strides = [1, 1, 1]} : vector<16x24x4xf32> to vector<16x15x4xf32>
    %22 = tpu.concatenate %12, %21 in 1 : vector<16x1x4xf32>, vector<16x15x4xf32> -> vector<16x16x4xf32>
    %23 = vector.extract_strided_slice %20 {offsets = [0, 0, 0], sizes = [16, 16, 4], strides = [1, 1, 1]} : vector<16x24x4xf32> to vector<16x16x4xf32>
    %24 = vector.extract_strided_slice %20 {offsets = [0, 1, 0], sizes = [16, 16, 4], strides = [1, 1, 1]} : vector<16x24x4xf32> to vector<16x16x4xf32>
    %c0_20 = arith.constant 0 : index
    %c2 = arith.constant 2 : index
    %c0_21 = arith.constant 0 : index
    %c0_22 = arith.constant 0 : index
    %25 = vector.load %arg1[%c0_20, %c2, %c0_21, %c0_22] : memref<1x18x24x4xf32, #tpu.memory_space<vmem>>, vector<1x16x24x4xf32>
    %26 = vector.shape_cast %25 : vector<1x16x24x4xf32> to vector<16x24x4xf32>
    %27 = vector.extract_strided_slice %26 {offsets = [0, 0, 0], sizes = [16, 15, 4], strides = [1, 1, 1]} : vector<16x24x4xf32> to vector<16x15x4xf32>
    %28 = tpu.concatenate %12, %27 in 1 : vector<16x1x4xf32>, vector<16x15x4xf32> -> vector<16x16x4xf32>
    %29 = vector.extract_strided_slice %26 {offsets = [0, 0, 0], sizes = [16, 16, 4], strides = [1, 1, 1]} : vector<16x24x4xf32> to vector<16x16x4xf32>
    %30 = vector.extract_strided_slice %26 {offsets = [0, 1, 0], sizes = [16, 16, 4], strides = [1, 1, 1]} : vector<16x24x4xf32> to vector<16x16x4xf32>
    %31 = tpu.concatenate %16, %17, %18, %22, %23, %24, %28, %29, %30 in 2 : vector<16x16x4xf32>, vector<16x16x4xf32>, vector<16x16x4xf32>, vector<16x16x4xf32>, vector<16x16x4xf32>, vector<16x16x4xf32>, vector<16x16x4xf32>, vector<16x16x4xf32>, vector<16x16x4xf32> -> vector<16x16x36xf32>
    %32 = vector.shape_cast %31 : vector<16x16x36xf32> to vector<256x36xf32>
    %cst_23 = arith.constant dense<0.000000e+00> : vector<256x4xf32>
    %33 = tpu.matmul %32, %10, %cst_23 {dimension_numbers = #tpu.dot_dimension_numbers<[1], [0], [0], [1], [0, 0, 1, 1], [], []>} : vector<256x36xf32>, vector<36x4xf32>, vector<256x4xf32> -> vector<256x4xf32>
    %cst_24 = arith.constant 0.000000e+00 : f32
    %34 = vector.broadcast %cst_24 : f32 to vector<256x4xf32>
    %35 = arith.maximumf %33, %34 : vector<256x4xf32>
    %36 = vector.shape_cast %35 : vector<256x4xf32> to vector<16x16x4xf32>
    %c1_25 = arith.constant 1 : index
    %c0_26 = arith.constant 0 : index
    %c0_27 = arith.constant 0 : index
    %37 = vector.load %arg5[%c1_25, %c0_26, %c0_27] : memref<18x24x4xf32, #tpu.memory_space<vmem>>, vector<16x16x4xf32>
    tpu.vector_store %arg5[%c1_25, %c0_26, %c0_27], %36 {strides = array<i32>} : memref<18x24x4xf32, #tpu.memory_space<vmem>>, vector<16x16x4xf32>,
    %cst_28 = arith.constant 0.000000e+00 : f32
    %38 = vector.broadcast %cst_28 : f32 to vector<16x1x4xf32>
    %c0_29 = arith.constant 0 : index
    %c0_30 = arith.constant 0 : index
    %c0_31 = arith.constant 0 : index
    %39 = vector.load %arg5[%c0_29, %c0_30, %c0_31] : memref<18x24x4xf32, #tpu.memory_space<vmem>>, vector<16x24x4xf32>
    %40 = vector.extract_strided_slice %39 {offsets = [0, 0, 0], sizes = [16, 15, 4], strides = [1, 1, 1]} : vector<16x24x4xf32> to vector<16x15x4xf32>
    %41 = tpu.concatenate %38, %40 in 1 : vector<16x1x4xf32>, vector<16x15x4xf32> -> vector<16x16x4xf32>
    %42 = vector.extract_strided_slice %39 {offsets = [0, 0, 0], sizes = [16, 16, 4], strides = [1, 1, 1]} : vector<16x24x4xf32> to vector<16x16x4xf32>
    %43 = vector.extract_strided_slice %39 {offsets = [0, 1, 0], sizes = [16, 16, 4], strides = [1, 1, 1]} : vector<16x24x4xf32> to vector<16x16x4xf32>
    %c1_32 = arith.constant 1 : index
    %c0_33 = arith.constant 0 : index
    %c0_34 = arith.constant 0 : index
    %44 = vector.load %arg5[%c1_32, %c0_33, %c0_34] : memref<18x24x4xf32, #tpu.memory_space<vmem>>, vector<16x24x4xf32>
    %45 = vector.extract_strided_slice %44 {offsets = [0, 0, 0], sizes = [16, 15, 4], strides = [1, 1, 1]} : vector<16x24x4xf32> to vector<16x15x4xf32>
    %46 = tpu.concatenate %38, %45 in 1 : vector<16x1x4xf32>, vector<16x15x4xf32> -> vector<16x16x4xf32>
    %47 = vector.extract_strided_slice %44 {offsets = [0, 0, 0], sizes = [16, 16, 4], strides = [1, 1, 1]} : vector<16x24x4xf32> to vector<16x16x4xf32>
    %48 = vector.extract_strided_slice %44 {offsets = [0, 1, 0], sizes = [16, 16, 4], strides = [1, 1, 1]} : vector<16x24x4xf32> to vector<16x16x4xf32>
    %c2_35 = arith.constant 2 : index
    %c0_36 = arith.constant 0 : index
    %c0_37 = arith.constant 0 : index
    %49 = vector.load %arg5[%c2_35, %c0_36, %c0_37] : memref<18x24x4xf32, #tpu.memory_space<vmem>>, vector<16x24x4xf32>
    %50 = vector.extract_strided_slice %49 {offsets = [0, 0, 0], sizes = [16, 15, 4], strides = [1, 1, 1]} : vector<16x24x4xf32> to vector<16x15x4xf32>
    %51 = tpu.concatenate %38, %50 in 1 : vector<16x1x4xf32>, vector<16x15x4xf32> -> vector<16x16x4xf32>
    %52 = vector.extract_strided_slice %49 {offsets = [0, 0, 0], sizes = [16, 16, 4], strides = [1, 1, 1]} : vector<16x24x4xf32> to vector<16x16x4xf32>
    %53 = vector.extract_strided_slice %49 {offsets = [0, 1, 0], sizes = [16, 16, 4], strides = [1, 1, 1]} : vector<16x24x4xf32> to vector<16x16x4xf32>
    %54 = tpu.concatenate %41, %42, %43, %46, %47, %48, %51, %52, %53 in 2 : vector<16x16x4xf32>, vector<16x16x4xf32>, vector<16x16x4xf32>, vector<16x16x4xf32>, vector<16x16x4xf32>, vector<16x16x4xf32>, vector<16x16x4xf32>, vector<16x16x4xf32>, vector<16x16x4xf32> -> vector<16x16x36xf32>
    %55 = vector.shape_cast %54 : vector<16x16x36xf32> to vector<256x36xf32>
    %cst_38 = arith.constant dense<0.000000e+00> : vector<256x4xf32>
    %56 = tpu.matmul %55, %11, %cst_38 {dimension_numbers = #tpu.dot_dimension_numbers<[1], [0], [0], [1], [0, 0, 1, 1], [], []>} : vector<256x36xf32>, vector<36x4xf32>, vector<256x4xf32> -> vector<256x4xf32>
    %c0_39 = arith.constant 0 : index
    %c1_40 = arith.constant 1 : index
    %c0_41 = arith.constant 0 : index
    %c0_42 = arith.constant 0 : index
    %57 = vector.load %arg1[%c0_39, %c1_40, %c0_41, %c0_42] : memref<1x18x24x4xf32, #tpu.memory_space<vmem>>, vector<1x16x16x4xf32>
    %58 = vector.shape_cast %57 : vector<1x16x16x4xf32> to vector<16x16x4xf32>
    %59 = vector.shape_cast %56 : vector<256x4xf32> to vector<16x16x4xf32>
    %60 = arith.addf %59, %58 : vector<16x16x4xf32>
    %cst_43 = arith.constant 0.000000e+00 : f32
    %61 = vector.broadcast %cst_43 : f32 to vector<16x16x4xf32>
    %62 = arith.maximumf %60, %61 : vector<16x16x4xf32>
    %c0_44 = arith.constant 0 : index
    %c0_45 = arith.constant 0 : index
    %c0_46 = arith.constant 0 : index
    %c0_47 = arith.constant 0 : index
    %63 = vector.load %arg4[%c0_44, %c0_45, %c0_46, %c0_47] : memref<1x16x16x4xf32, #tpu.memory_space<vmem>>, vector<1x16x16x4xf32>
    %64 = vector.shape_cast %63 : vector<1x16x16x4xf32> to vector<16x16x4xf32>
    %65 = vector.shape_cast %62 : vector<16x16x4xf32> to vector<1x16x16x4xf32>
    tpu.vector_store %arg4[%c0_44, %c0_45, %c0_46, %c0_47], %65 {strides = array<i32>} : memref<1x16x16x4xf32, #tpu.memory_space<vmem>>, vector<1x16x16x4xf32>,
    return
  }
  func.func @transform_0(%arg0: i32) -> (i32, i32, i32, i32) {
    %c0_i32 = arith.constant 0 : i32
    %c0_i32_0 = arith.constant 0 : i32
    %c0_i32_1 = arith.constant 0 : i32
    %c0_i32_2 = arith.constant 0 : i32
    return %arg0, %c0_i32, %c0_i32_0, %c0_i32_1 : i32, i32, i32, i32
  }
  func.func @transform_1(%arg0: i32) -> (i32, i32) {
    %c0_i32 = arith.constant 0 : i32
    %c0_i32_0 = arith.constant 0 : i32
    %c0_i32_1 = arith.constant 0 : i32
    return %c0_i32, %c0_i32_0 : i32, i32
  }
  func.func @transform_2(%arg0: i32) -> (i32, i32) {
    %c0_i32 = arith.constant 0 : i32
    %c0_i32_0 = arith.constant 0 : i32
    %c0_i32_1 = arith.constant 0 : i32
    return %c0_i32, %c0_i32_0 : i32, i32
  }
  func.func @transform_3(%arg0: i32) -> (i32, i32, i32, i32) {
    %c0_i32 = arith.constant 0 : i32
    %c0_i32_0 = arith.constant 0 : i32
    %c0_i32_1 = arith.constant 0 : i32
    %c0_i32_2 = arith.constant 0 : i32
    return %arg0, %c0_i32, %c0_i32_0, %c0_i32_1 : i32, i32, i32, i32
  }
}

</mosaic_0001>

<bundles_post_ra>
// kernel: tpu_custom_call.1
= control target key start
LH: loop header
LB: loop body
LE: loop exit
PB: predicated region body
PF: predicated region fallthrough
CT: control target
= control target key end

     0   :  { %s5274_s12 = smov 0   ;;  %s8815_s0 = inlined_call_operand.vmem [shape: f32[2,18,24,4], index: 0, kind: input, shape index: {}]   ;;  %s8816_s1 = inlined_call_operand.vmem [shape: f32[36,4], index: 1, kind: input, shape index: {}]   ;;  %s8817_s2 = inlined_call_operand.vmem [shape: f32[36,4], index: 2, kind: input, shape index: {}]   ;;  %s8818_s3 = inlined_call_operand.vmem [shape: f32[2,16,16,4], index: 3, kind: output, shape index: {}]  }
   0x1 LB: > { %s4797_s13 = sadd.s32 4294967295, %s5243_s12   ;;  %p4801_p0 = scmp.ge.s32.totalorder %s5243_s12, 1  ;;  %s5243_s12 = sphi %s5274_s12, %s13_s12  }
   0x2   : > { %p137_p1 = scmp.lt.s32.totalorder %s5243_s12, 3 }
   0x4   : > { %p138_p2 = pnand %p4801_p0, %p137_p1 }
   0x6   : > { %141 = sbr.rel (%p138_p2) target bundleno = 1643 (0x66b), region = 32 }
   0xd   : > { %p161_p3 = scmp.lt.s32.totalorder %s4797_s13, 1  ;;  %s5245_s18 = smov 4   ;;  %vm287_vm0 = vcmask 1040384   ;;  %vm818_vm1 = vcmask 1046528   ;;  %vm2155_vm2 = vcmask 1043456   ;;  %vm171_vm3 = vcmask 31744  }
   0xe   : > { %s5246_s19 = smov 8   ;;  %s5247_s20 = smov 12   ;;  %vm1827_vm4 = vcmask 64512   ;;  %vm1860_vm5 = vcmask 97280   ;;  %vm1893_vm6 = vcmask 130048   ;;  %vm1926_vm7 = vcmask 162816  }
   0xf   : > { %s9433_s13 = smov (!%p161_p3, %s4797_s13), 1  ;;  %s5248_s21 = smov 16   ;;  %vm1959_vm8 = vcmask 195584   ;;  %vm1992_vm9 = vcmask 228352   ;;  %vm2025_vm10 = vcmask 261120   ;;  %vm2058_vm11 = vcmask 293888  }
  0x10   : > { %s5208_s14 = smul.u32 432, %s9433_s13  ;;  %s5249_s22 = smov 20  }
  0x11   : > { %s5250_s23 = smov 24   ;;  %s5251_s7 = smov 28  }
  0x12   : > { %s5288_s17 = scalar_lea.vmem %s8815_s0, %s5208_s14  ;;  %s5252_s8 = smov 32  }
  0x13   : > { %v5291_v0 = vld [vmem:[%s5288_s17 + $0x18] sm:$0xff]  ;;  %v5294_v1 = vld [vmem:[%s5288_s17] sm:$0xff]  ;;  %v5304_v3 = vld [vmem:[%s5288_s17 + $0x8] sm:$0xff] }
  0x14   : > { %8890 = vst [vmem:[#allocation3_spill] sm:$0xff] %v5294_v1  ;;  %710 = vrot.lane.b32.xlu1 %v5291_v0, %s5245_s18  ;;  %706 = vrot.lane.b32.xlu0 %v5294_v1, %s5245_s18  ;;  %v5301_v2 = vld [vmem:[%s5288_s17 + $0x20] sm:$0xff]  ;;  %v5311_v4 = vld [vmem:[%s5288_s17 + $0x38] sm:$0xff]  ;;  %v289_v14 = vrot.slane %v5304_v3, 7  ;;  %v8819_v15 = vrot.slane %v5294_v1, 7  ;;  %v819_v34 = vrot.slane %v5294_v1, 1 }
  0x15   : > { %v5314_v5 = vld [vmem:[%s5288_s17 + $0x30] sm:$0xff]  ;;  %v5324_v7 = vld [vmem:[%s5288_s17 + $0x48] sm:$0xff]  ;;  %v5334_v9 = vld [vmem:[%s5288_s17 + $0x60] sm:$0xff]  ;;  %v820_v35 = vrot.slane %v5304_v3, 1  ;;  %v824_v40 = vrot.slane %v5291_v0, 1  ;;  %v825_v41 = vrot.slane %v5301_v2, 1 }
  0x16   : > { %v5321_v6 = vld [vmem:[%s5288_s17 + $0x50] sm:$0xff]  ;;  %v5331_v8 = vld [vmem:[%s5288_s17 + $0x68] sm:$0xff]  ;;  %v5341_v10 = vld [vmem:[%s5288_s17 + $0x80] sm:$0xff]  ;;  %v5371_v18 = vsel %vm287_vm0, %v8819_v15, %v289_v14  ;;  %v830_v46 = vrot.slane %v5311_v4, 1  ;;  %v829_v47 = vrot.slane %v5314_v5, 1  ;;  %v834_v53 = vrot.slane %v5324_v7, 1 }
  0x17   : > { %v5344_v11 = vld [vmem:[%s5288_s17 + $0x78] sm:$0xff]  ;;  %v5354_v13 = vld [vmem:[%s5288_s17 + $0x90] sm:$0xff]  ;;  %v5366_v17 = vld [vmem:[%s5288_s17 + $0xa8] sm:$0xff]  ;;  %8891 = vst [vmem:[#allocation4_spill] sm:$0xff] %v5371_v18  ;;  %v821_v43 = vsel %vm818_vm1, %v819_v34, %v820_v35  ;;  %v5474_v49 = vsel %vm818_vm1, %v824_v40, %v825_v41  ;;  %v835_v52 = vrot.slane %v5321_v6, 1  ;;  %v840_v58 = vrot.slane %v5331_v8, 1 }
  0x18   : > { %712 = vrot.lane.b32.xlu1 %v5301_v2, %s5245_s18  ;;  %708 = vrot.lane.b32.xlu0 %v5304_v3, %s5245_s18  ;;  %v5351_v12 = vld [vmem:[%s5288_s17 + $0x98] sm:$0xff]  ;;  %v5363_v16 = vld [vmem:[%s5288_s17 + $0xb0] sm:$0xff]  ;;  %v5487_v55 = vsel %vm818_vm1, %v829_v47, %v830_v46  ;;  %v839_v59 = vrot.slane %v5334_v9, 1  ;;  %v845_v3 = vrot.slane %v5341_v10, 1  ;;  %v844_v14 = vrot.slane %v5344_v11, 1 }
  0x19   : > { %v5378_v19 = vld [vmem:[%s5288_s17 + $0xc8] sm:$0xff]  ;;  %v5381_v20 = vld [vmem:[%s5288_s17 + $0xc0] sm:$0xff]  ;;  %v5391_v22 = vld [vmem:[%s5288_s17 + $0xd8] sm:$0xff]  ;;  %v5500_v61 = vsel %vm818_vm1, %v834_v53, %v835_v52  ;;  %v849_v40 = vrot.slane %v5354_v13, 1 }
  0x1a   : > { %v5388_v21 = vld [vmem:[%s5288_s17 + $0xe0] sm:$0xff]  ;;  %v5398_v23 = vld [vmem:[%s5288_s17 + $0xf8] sm:$0xff]  ;;  %v5401_v24 = vld [vmem:[%s5288_s17 + $0xf0] sm:$0xff]  ;;  %v5513_v34 = vsel %vm818_vm1, %v839_v59, %v840_v58  ;;  %v860_v53 = vrot.slane %v5378_v19, 1 }
  0x1b   : > { %v5408_v25 = vld [vmem:[%s5288_s17 + $0x110] sm:$0xff]  ;;  %v5411_v26 = vld [vmem:[%s5288_s17 + $0x108] sm:$0xff]  ;;  %v5421_v28 = vld [vmem:[%s5288_s17 + $0x120] sm:$0xff] }
  0x1c   : > { %716 = vrot.lane.b32.xlu1 %v5311_v4, %s5245_s18  ;;  %714 = vrot.lane.b32.xlu0 %v5314_v5, %s5245_s18  ;;  %v5418_v27 = vld [vmem:[%s5288_s17 + $0x128] sm:$0xff]  ;;  %v5428_v29 = vld [vmem:[%s5288_s17 + $0x140] sm:$0xff] }
  0x1d   : > { %v5431_v30 = vld [vmem:[%s5288_s17 + $0x138] sm:$0xff]  ;;  %v5441_v32 = vld [vmem:[%s5288_s17 + $0x150] sm:$0xff]  ;;  %v5454_v37 = vld [vmem:[%s5288_s17 + $0x168] sm:$0xff] }
  0x1e   : > { %v5438_v31 = vld [vmem:[%s5288_s17 + $0x158] sm:$0xff]  ;;  %v209_v33 = vld [vmem:[%s5288_s17 + $0x10] sm:$0xff]  ;;  %v212_v39 = vld [vmem:[%s5288_s17 + $0x28] sm:$0xff]  ;;  %v884_v15 = vrot.slane %v5431_v30, 1  ;;  %v889_v1 = vrot.slane %v5441_v32, 1 }
  0x1f   : > { %v5451_v36 = vld [vmem:[%s5288_s17 + $0x170] sm:$0xff]  ;;  %v822_v38 = vrot.slane %v209_v33, 1  ;;  %v827_v44 = vrot.slane %v212_v39, 1  ;;  %v215_v45 = vld [vmem:[%s5288_s17 + $0x40] sm:$0xff]  ;;  %v218_v51 = vld [vmem:[%s5288_s17 + $0x58] sm:$0xff]  ;;  %v850_v39 = vrot.slane %v5351_v12, 1 }
  0x20   : > { %720 = vrot.lane.b32.xlu1 %v5321_v6, %s5245_s18  ;;  %718 = vrot.lane.b32.xlu0 %v5324_v7, %s5245_s18  ;;  %v832_v50 = vrot.slane %v215_v45, 1  ;;  %v837_v56 = vrot.slane %v218_v51, 1  ;;  %v221_v57 = vld [vmem:[%s5288_s17 + $0x70] sm:$0xff]  ;;  %v224_v63 = vld [vmem:[%s5288_s17 + $0x88] sm:$0xff]  ;;  %v855_v45 = vrot.slane %v5363_v16, 1 }
  0x21   : > { %v823_v42 = vsel %vm818_vm1, %v820_v35, %v822_v38  ;;  %v5471_v48 = vsel %vm818_vm1, %v825_v41, %v827_v44  ;;  %v842_v62 = vrot.slane %v221_v57, 1  ;;  %v847_v35 = vrot.slane %v224_v63, 1  ;;  %v227_v38 = vld [vmem:[%s5288_s17 + $0xa0] sm:$0xff]  ;;  %v230_v44 = vld [vmem:[%s5288_s17 + $0xb8] sm:$0xff] }
  0x22   : > { %v5484_v54 = vsel %vm818_vm1, %v830_v46, %v832_v50  ;;  %v5497_v60 = vsel %vm818_vm1, %v835_v52, %v837_v56  ;;  %v854_v46 = vrot.slane %v5366_v17, 1  ;;  %v5539_v50 = vsel %vm818_vm1, %v849_v40, %v850_v39  ;;  %v233_v52 = vld [vmem:[%s5288_s17 + $0xd0] sm:$0xff] }
  0x23   : > { %v5510_v33 = vsel %vm818_vm1, %v840_v58, %v842_v62  ;;  %v5523_v41 = vsel %vm818_vm1, %v845_v3, %v847_v35  ;;  %v857_v51 = vrot.slane %v230_v44, 1  ;;  %v859_v56 = vrot.slane %v5381_v20, 1  ;;  %v236_v62 = vld [vmem:[%s5288_s17 + $0xe8] sm:$0xff] }
  0x24   : > { %724 = vrot.lane.b32.xlu1 %v5331_v8, %s5245_s18  ;;  %722 = vrot.lane.b32.xlu0 %v5334_v9, %s5245_s18  ;;  %v5552_v58 = vsel %vm818_vm1, %v854_v46, %v855_v45  ;;  %v862_v59 = vrot.slane %v233_v52, 1  ;;  %v865_v63 = vrot.slane %v5388_v21, 1  ;;  %v870_v40 = vrot.slane %v5398_v23, 1 }
  0x25   : > { %v5549_v57 = vsel %vm818_vm1, %v855_v45, %v857_v51  ;;  %v5565_v35 = vsel %vm818_vm1, %v859_v56, %v860_v53  ;;  %v242_v51 = vld [vmem:[%s5288_s17 + $0x118] sm:$0xff]  ;;  %v875_v52 = vrot.slane %v5408_v25, 1 }
  0x28   : > { %728 = vrot.lane.b32.xlu1 %v5341_v10, %s5245_s18  ;;  %726 = vrot.lane.b32.xlu0 %v5344_v11, %s5245_s18 }
  0x2c   : > { %732 = vrot.lane.b32.xlu1 %v5351_v12, %s5245_s18  ;;  %730 = vrot.lane.b32.xlu0 %v5354_v13, %s5245_s18 }
  0x30   : > { %736 = vrot.lane.b32.xlu1 %v5363_v16, %s5245_s18  ;;  %734 = vrot.lane.b32.xlu0 %v5366_v17, %s5245_s18 }
  0x34   : > { %740 = vrot.lane.b32.xlu1 %v5378_v19, %s5245_s18  ;;  %738 = vrot.lane.b32.xlu0 %v5381_v20, %s5245_s18 }
  0x38   : > { %744 = vrot.lane.b32.xlu1 %v5388_v21, %s5245_s18  ;;  %742 = vrot.lane.b32.xlu0 %v5391_v22, %s5245_s18 }
  0x3c   : > { %748 = vrot.lane.b32.xlu1 %v5398_v23, %s5245_s18  ;;  %746 = vrot.lane.b32.xlu0 %v5401_v24, %s5245_s18 }
  0x40   : > { %752 = vrot.lane.b32.xlu1 %v5408_v25, %s5245_s18  ;;  %750 = vrot.lane.b32.xlu0 %v5411_v26, %s5245_s18 }
  0x44   : > { %756 = vrot.lane.b32.xlu1 %v5418_v27, %s5245_s18  ;;  %754 = vrot.lane.b32.xlu0 %v5421_v28, %s5245_s18 }
  0x48   : > { %760 = vrot.lane.b32.xlu1 %v5428_v29, %s5245_s18  ;;  %758 = vrot.lane.b32.xlu0 %v5431_v30, %s5245_s18 }
  0x4c   : > { %764 = vrot.lane.b32.xlu1 %v5438_v31, %s5245_s18  ;;  %762 = vrot.lane.b32.xlu0 %v5441_v32, %s5245_s18 }
  0x50   : > { %768 = vrot.lane.b32.xlu1 %v5451_v36, %s5245_s18  ;;  %766 = vrot.lane.b32.xlu0 %v5454_v37, %s5245_s18 }
  0x54   : > { %901 = vrot.lane.b32.xlu1 %v823_v42, %s5246_s19  ;;  %899 = vrot.lane.b32.xlu0 %v821_v43, %s5246_s19  ;;  %v5526_v42 = vsel %vm818_vm1, %v844_v14, %v845_v3  ;;  %v852_v43 = vrot.slane %v227_v38, 1  ;;  %v864_v3 = vrot.slane %v5391_v22, 1  ;;  %v5562_v14 = vsel %vm818_vm1, %v860_v53, %v862_v59 }
  0x55   : > { %v867_v38 = vrot.slane %v236_v62, 1  ;;  %v874_v53 = vrot.slane %v5411_v26, 1  ;;  %v877_v62 = vrot.slane %v242_v51, 1  ;;  %v885_v51 = vrot.slane %v5428_v29, 1 }
  0x56   : > { %v5536_v47 = vsel %vm818_vm1, %v850_v39, %v852_v43  ;;  %v239_v39 = vld [vmem:[%s5288_s17 + $0x100] sm:$0xff]  ;;  %v869_v43 = vrot.slane %v5401_v24, 1  ;;  %v5578_v45 = vsel %vm818_vm1, %v864_v3, %v865_v63  ;;  %v880_v3 = vrot.slane %v5418_v27, 1 }
  0x57   : > { %v5575_v44 = vsel %vm818_vm1, %v865_v63, %v867_v38  ;;  %v872_v46 = vrot.slane %v239_v39, 1  ;;  %v245_v63 = vld [vmem:[%s5288_s17 + $0x130] sm:$0xff]  ;;  %v879_v38 = vrot.slane %v5421_v28, 1  ;;  %v5601_v39 = vsel %vm818_vm1, %v875_v52, %v877_v62 }
  0x58   : > { %905 = vrot.lane.b32.xlu1 %v5471_v48, %s5246_s19  ;;  %903 = vrot.lane.b32.xlu0 %v5474_v49, %s5246_s19  ;;  %v5591_v59 = vsel %vm818_vm1, %v869_v43, %v870_v40  ;;  %8893 = vst [vmem:[#allocation6_spill] sm:$0xff] %v5601_v39  ;;  %v248_v43 = vld [vmem:[%s5288_s17 + $0x148] sm:$0xff] }
  0x59   : > { %v5588_v56 = vsel %vm818_vm1, %v870_v40, %v872_v46  ;;  %8892 = vst [vmem:[#allocation5_spill] sm:$0xff] %v5591_v59  ;;  %v5604_v46 = vsel %vm818_vm1, %v874_v53, %v875_v52  ;;  %v882_v40 = vrot.slane %v245_v63, 1  ;;  %v5617_v62 = vsel %vm818_vm1, %v879_v38, %v880_v3  ;;  %v251_v53 = vld [vmem:[%s5288_s17 + $0x160] sm:$0xff] }
  0x5a   : > { %8894 = vst [vmem:[#allocation7_spill] sm:$0xff] %v5604_v46  ;;  %8895 = vst [vmem:[#allocation8_spill] sm:$0xff] %v5617_v62  ;;  %v887_v52 = vrot.slane %v248_v43, 1  ;;  %v890_v63 = vrot.slane %v5438_v31, 1 }
  0x5b   : > { %v5614_v18 = vsel %vm818_vm1, %v880_v3, %v882_v40  ;;  %v5630_v40 = vsel %vm818_vm1, %v884_v15, %v885_v51  ;;  %v892_v3 = vrot.slane %v251_v53, 1 }
  0x5c   : > { %909 = vrot.lane.b32.xlu1 %v5484_v54, %s5246_s19  ;;  %907 = vrot.lane.b32.xlu0 %v5487_v55, %s5246_s19  ;;  %8896 = vst [vmem:[#allocation9_spill] sm:$0xff] %v5630_v40  ;;  %v5647_v15 = vsel %vm818_vm1, %v889_v1, %v890_v63 }
  0x5d   : > { %8899 = vst [vmem:[#allocation12_spill] sm:$0xff] %v5647_v15 }
  0x60   : > { %913 = vrot.lane.b32.xlu1 %v5497_v60, %s5246_s19  ;;  %911 = vrot.lane.b32.xlu0 %v5500_v61, %s5246_s19 }
  0x64   : > { %917 = vrot.lane.b32.xlu1 %v5510_v33, %s5246_s19  ;;  %915 = vrot.lane.b32.xlu0 %v5513_v34, %s5246_s19 }
  0x68   : > { %921 = vrot.lane.b32.xlu1 %v5523_v41, %s5246_s19  ;;  %919 = vrot.lane.b32.xlu0 %v5526_v42, %s5246_s19 }
  0x6c   : > { %925 = vrot.lane.b32.xlu1 %v5536_v47, %s5246_s19  ;;  %923 = vrot.lane.b32.xlu0 %v5539_v50, %s5246_s19 }
  0x70   : > { %929 = vrot.lane.b32.xlu1 %v5549_v57, %s5246_s19  ;;  %927 = vrot.lane.b32.xlu0 %v5552_v58, %s5246_s19 }
  0x74   : > { %933 = vrot.lane.b32.xlu1 %v5562_v14, %s5246_s19  ;;  %931 = vrot.lane.b32.xlu0 %v5565_v35, %s5246_s19 }
  0x78   : > { %937 = vrot.lane.b32.xlu1 %v5575_v44, %s5246_s19  ;;  %935 = vrot.lane.b32.xlu0 %v5578_v45, %s5246_s19 }
  0x7c   : > { %941 = vrot.lane.b32.xlu1 %v5588_v56, %s5246_s19  ;;  %939 = vrot.lane.b32.xlu0 %v5591_v59, %s5246_s19  ;;  %v895_v59 = vrot.slane %v5451_v36, 1 }
  0x80   : > { %945 = vrot.lane.b32.xlu1 %v5601_v39, %s5246_s19  ;;  %943 = vrot.lane.b32.xlu0 %v5604_v46, %s5246_s19  ;;  %v5627_v46 = vsel %vm818_vm1, %v885_v51, %v887_v52  ;;  %v254_v39 = vld [vmem:[%s5288_s17 + $0x178] sm:$0xff]  ;;  %v894_v52 = vrot.slane %v5454_v37, 1 }
  0x81   : > { %v897_v51 = vrot.slane %v254_v39, 1  ;;  %v291_v39 = vrot.slane %v5291_v0, 7 }
  0x84   : > { %949 = vrot.lane.b32.xlu1 %v5614_v18, %s5246_s19  ;;  %947 = vrot.lane.b32.xlu0 %v5617_v62, %s5246_s19  ;;  %v5644_v62 = vsel %vm818_vm1, %v890_v63, %v892_v3  ;;  %v5661_v3 = vsel %vm818_vm1, %v894_v52, %v895_v59  ;;  %v292_v63 = vrot.slane %v5301_v2, 7  ;;  %v294_v52 = vrot.slane %v5314_v5, 7 }
  0x85   : > { %8903 = vst [vmem:[#allocation16_spill] sm:$0xff] %v5661_v3 }
  0x86   : > { %v5632_v38 = vpop.permute.xlu1 %710  ;;  %v5634_v43 = vpop.permute.xlu0 %706 }
  0x87   : > { %8897 = vst [vmem:[#allocation10_spill] sm:$0xff] %v5632_v38  ;;  %8898 = vst [vmem:[#allocation11_spill] sm:$0xff] %v5634_v43  ;;  %v5658_v43 = vsel %vm818_vm1, %v895_v59, %v897_v51  ;;  %v295_v59 = vrot.slane %v5311_v4, 7 }
  0x88   : > { %953 = vrot.lane.b32.xlu1 %v5627_v46, %s5246_s19  ;;  %951 = vrot.lane.b32.xlu0 %v5630_v40, %s5246_s19  ;;  %8902 = vst [vmem:[#allocation15_spill] sm:$0xff] %v5658_v43 }
  0x8a   : > { %v5649_v53 = vpop.permute.xlu1 %712  ;;  %v5651_v38 = vpop.permute.xlu0 %708 }
  0x8b   : > { %8900 = vst [vmem:[#allocation13_spill] sm:$0xff] %v5649_v53  ;;  %8901 = vst [vmem:[#allocation14_spill] sm:$0xff] %v5651_v38  ;;  %v298_v38 = vrot.slane %v5321_v6, 7 }
  0x8c   : > { %957 = vrot.lane.b32.xlu1 %v5644_v62, %s5246_s19  ;;  %955 = vrot.lane.b32.xlu0 %v5647_v15, %s5246_s19 }
  0x8e   : > { %v5663_v40 = vpop.permute.xlu1 %716  ;;  %v5665_v1 = vpop.permute.xlu0 %714 }
  0x8f   : > { %8904 = vst [vmem:[#allocation17_spill] sm:$0xff] %v5663_v40  ;;  %8905 = vst [vmem:[#allocation18_spill] sm:$0xff] %v5665_v1  ;;  %v5680_v1 = vsel %vm287_vm0, 0.0, %v291_v39  ;;  %v5683_v40 = vsel %vm287_vm0, %v291_v39, %v292_v63  ;;  %v5699_v39 = vsel %vm287_vm0, 0.0, %v294_v52 }
  0x90   : > { %961 = vrot.lane.b32.xlu1 %v5658_v43, %s5246_s19  ;;  %959 = vrot.lane.b32.xlu0 %v5661_v3, %s5246_s19  ;;  %8908 = vst [vmem:[#allocation21_spill] sm:$0xff] %v5680_v1  ;;  %8909 = vst [vmem:[#allocation22_spill] sm:$0xff] %v5683_v40  ;;  %v297_v3 = vrot.slane %v5324_v7, 7  ;;  %v5696_v43 = vsel %vm287_vm0, %v294_v52, %v295_v59 }
  0x91   : > { %8912 = vst [vmem:[#allocation25_spill] sm:$0xff] %v5696_v43  ;;  %8913 = vst [vmem:[#allocation26_spill] sm:$0xff] %v5699_v39 }
  0x92   : > { %v5673_v53 = vpop.permute.xlu1 %720  ;;  %v5675_v51 = vpop.permute.xlu0 %718  ;;  %v5712_v59 = vsel %vm287_vm0, %v297_v3, %v298_v38  ;;  %v5715_v52 = vsel %vm287_vm0, 0.0, %v297_v3 }
  0x93   : > { %8906 = vst [vmem:[#allocation19_spill] sm:$0xff] %v5673_v53  ;;  %8907 = vst [vmem:[#allocation20_spill] sm:$0xff] %v5675_v51 }
  0x94   : > { %1013 = vrot.lane.b32.xlu1 %v5683_v40, %s5247_s20  ;;  %1011 = vrot.lane.b32.xlu0 %v5680_v1, %s5247_s20  ;;  %v300_v40 = vrot.slane %v5334_v9, 7  ;;  %8916 = vst [vmem:[#allocation29_spill] sm:$0xff] %v5712_v59  ;;  %8917 = vst [vmem:[#allocation30_spill] sm:$0xff] %v5715_v52  ;;  %v333_v1 = vrot.slane %v5454_v37, 7 }
  0x96   : > { %v5689_v53 = vpop.permute.xlu1 %724  ;;  %v5691_v51 = vpop.permute.xlu0 %722  ;;  %v5731_v3 = vsel %vm287_vm0, 0.0, %v300_v40 }
  0x97   : > { %8910 = vst [vmem:[#allocation23_spill] sm:$0xff] %v5689_v53  ;;  %8911 = vst [vmem:[#allocation24_spill] sm:$0xff] %v5691_v51  ;;  %v301_v51 = vrot.slane %v5331_v8, 7 }
  0x98   : > { %1017 = vrot.lane.b32.xlu1 %v5696_v43, %s5247_s20  ;;  %1015 = vrot.lane.b32.xlu0 %v5699_v39, %s5247_s20  ;;  %v303_v43 = vrot.slane %v5344_v11, 7  ;;  %8921 = vst [vmem:[#allocation34_spill] sm:$0xff] %v5731_v3 }
  0x99   : > { %v5728_v38 = vsel %vm287_vm0, %v300_v40, %v301_v51 }
  0x9a   : > { %v5705_v63 = vpop.permute.xlu1 %728  ;;  %v5707_v53 = vpop.permute.xlu0 %726  ;;  %8920 = vst [vmem:[#allocation33_spill] sm:$0xff] %v5728_v38  ;;  %v5747_v40 = vsel %vm287_vm0, 0.0, %v303_v43 }
  0x9b   : > { %8914 = vst [vmem:[#allocation27_spill] sm:$0xff] %v5705_v63  ;;  %8915 = vst [vmem:[#allocation28_spill] sm:$0xff] %v5707_v53  ;;  %v304_v53 = vrot.slane %v5341_v10, 7 }
  0x9c   : > { %1021 = vrot.lane.b32.xlu1 %v5712_v59, %s5247_s20  ;;  %1019 = vrot.lane.b32.xlu0 %v5715_v52, %s5247_s20  ;;  %v306_v59 = vrot.slane %v5354_v13, 7  ;;  %8925 = vst [vmem:[#allocation38_spill] sm:$0xff] %v5747_v40 }
  0x9d   : > { %v5744_v51 = vsel %vm287_vm0, %v303_v43, %v304_v53 }
  0x9e   : > { %v5721_v39 = vpop.permute.xlu1 %732  ;;  %v5723_v63 = vpop.permute.xlu0 %730  ;;  %8924 = vst [vmem:[#allocation37_spill] sm:$0xff] %v5744_v51  ;;  %v5763_v43 = vsel %vm287_vm0, 0.0, %v306_v59 }
  0x9f   : > { %8918 = vst [vmem:[#allocation31_spill] sm:$0xff] %v5721_v39  ;;  %8919 = vst [vmem:[#allocation32_spill] sm:$0xff] %v5723_v63  ;;  %v307_v63 = vrot.slane %v5351_v12, 7 }
  0xa0   : > { %1025 = vrot.lane.b32.xlu1 %v5728_v38, %s5247_s20  ;;  %1023 = vrot.lane.b32.xlu0 %v5731_v3, %s5247_s20  ;;  %v309_v38 = vrot.slane %v5366_v17, 7  ;;  %8929 = vst [vmem:[#allocation42_spill] sm:$0xff] %v5763_v43 }
  0xa1   : > { %v5760_v53 = vsel %vm287_vm0, %v306_v59, %v307_v63 }
  0xa2   : > { %v5737_v52 = vpop.permute.xlu1 %736  ;;  %v5739_v39 = vpop.permute.xlu0 %734  ;;  %8928 = vst [vmem:[#allocation41_spill] sm:$0xff] %v5760_v53  ;;  %v5779_v59 = vsel %vm287_vm0, 0.0, %v309_v38 }
  0xa3   : > { %8922 = vst [vmem:[#allocation35_spill] sm:$0xff] %v5737_v52  ;;  %8923 = vst [vmem:[#allocation36_spill] sm:$0xff] %v5739_v39  ;;  %v310_v39 = vrot.slane %v5363_v16, 7 }
  0xa4   : > { %1029 = vrot.lane.b32.xlu1 %v5744_v51, %s5247_s20  ;;  %1027 = vrot.lane.b32.xlu0 %v5747_v40, %s5247_s20  ;;  %v312_v51 = vrot.slane %v5381_v20, 7  ;;  %8933 = vst [vmem:[#allocation46_spill] sm:$0xff] %v5779_v59 }
  0xa5   : > { %v5776_v63 = vsel %vm287_vm0, %v309_v38, %v310_v39 }
  0xa6   : > { %v5753_v3 = vpop.permute.xlu1 %740  ;;  %v5755_v52 = vpop.permute.xlu0 %738  ;;  %8932 = vst [vmem:[#allocation45_spill] sm:$0xff] %v5776_v63  ;;  %v5795_v38 = vsel %vm287_vm0, 0.0, %v312_v51 }
  0xa7   : > { %8926 = vst [vmem:[#allocation39_spill] sm:$0xff] %v5753_v3  ;;  %8927 = vst [vmem:[#allocation40_spill] sm:$0xff] %v5755_v52  ;;  %v313_v52 = vrot.slane %v5378_v19, 7 }
  0xa8   : > { %1033 = vrot.lane.b32.xlu1 %v5760_v53, %s5247_s20  ;;  %1031 = vrot.lane.b32.xlu0 %v5763_v43, %s5247_s20  ;;  %v315_v53 = vrot.slane %v5391_v22, 7  ;;  %8937 = vst [vmem:[#allocation50_spill] sm:$0xff] %v5795_v38 }
  0xa9   : > { %v5792_v39 = vsel %vm287_vm0, %v312_v51, %v313_v52 }
  0xaa   : > { %v5769_v40 = vpop.permute.xlu1 %744  ;;  %v5771_v3 = vpop.permute.xlu0 %742  ;;  %8936 = vst [vmem:[#allocation49_spill] sm:$0xff] %v5792_v39  ;;  %v5811_v51 = vsel %vm287_vm0, 0.0, %v315_v53 }
  0xab   : > { %8930 = vst [vmem:[#allocation43_spill] sm:$0xff] %v5769_v40  ;;  %8931 = vst [vmem:[#allocation44_spill] sm:$0xff] %v5771_v3  ;;  %v316_v3 = vrot.slane %v5388_v21, 7 }
  0xac   : > { %1037 = vrot.lane.b32.xlu1 %v5776_v63, %s5247_s20  ;;  %1035 = vrot.lane.b32.xlu0 %v5779_v59, %s5247_s20  ;;  %v318_v63 = vrot.slane %v5401_v24, 7  ;;  %8941 = vst [vmem:[#allocation54_spill] sm:$0xff] %v5811_v51 }
  0xad   : > { %v5808_v52 = vsel %vm287_vm0, %v315_v53, %v316_v3 }
  0xae   : > { %v5785_v43 = vpop.permute.xlu1 %748  ;;  %v5787_v40 = vpop.permute.xlu0 %746  ;;  %8940 = vst [vmem:[#allocation53_spill] sm:$0xff] %v5808_v52  ;;  %v5827_v53 = vsel %vm287_vm0, 0.0, %v318_v63 }
  0xaf   : > { %8934 = vst [vmem:[#allocation47_spill] sm:$0xff] %v5785_v43  ;;  %8935 = vst [vmem:[#allocation48_spill] sm:$0xff] %v5787_v40  ;;  %v319_v40 = vrot.slane %v5398_v23, 7 }
  0xb0   : > { %1041 = vrot.lane.b32.xlu1 %v5792_v39, %s5247_s20  ;;  %1039 = vrot.lane.b32.xlu0 %v5795_v38, %s5247_s20  ;;  %v321_v39 = vrot.slane %v5411_v26, 7  ;;  %8945 = vst [vmem:[#allocation58_spill] sm:$0xff] %v5827_v53 }
  0xb1   : > { %v5824_v3 = vsel %vm287_vm0, %v318_v63, %v319_v40 }
  0xb2   : > { %v5801_v59 = vpop.permute.xlu1 %752  ;;  %v5803_v43 = vpop.permute.xlu0 %750  ;;  %8944 = vst [vmem:[#allocation57_spill] sm:$0xff] %v5824_v3  ;;  %v5843_v63 = vsel %vm287_vm0, 0.0, %v321_v39 }
  0xb3   : > { %8938 = vst [vmem:[#allocation51_spill] sm:$0xff] %v5801_v59  ;;  %8939 = vst [vmem:[#allocation52_spill] sm:$0xff] %v5803_v43  ;;  %v322_v43 = vrot.slane %v5408_v25, 7 }
  0xb4   : > { %1045 = vrot.lane.b32.xlu1 %v5808_v52, %s5247_s20  ;;  %1043 = vrot.lane.b32.xlu0 %v5811_v51, %s5247_s20  ;;  %v324_v52 = vrot.slane %v5421_v28, 7  ;;  %8949 = vst [vmem:[#allocation62_spill] sm:$0xff] %v5843_v63 }
  0xb5   : > { %v5840_v40 = vsel %vm287_vm0, %v321_v39, %v322_v43 }
  0xb6   : > { %v5817_v38 = vpop.permute.xlu1 %756  ;;  %v5819_v59 = vpop.permute.xlu0 %754  ;;  %8948 = vst [vmem:[#allocation61_spill] sm:$0xff] %v5840_v40  ;;  %v5859_v39 = vsel %vm287_vm0, 0.0, %v324_v52 }
  0xb7   : > { %8942 = vst [vmem:[#allocation55_spill] sm:$0xff] %v5817_v38  ;;  %8943 = vst [vmem:[#allocation56_spill] sm:$0xff] %v5819_v59  ;;  %v325_v59 = vrot.slane %v5418_v27, 7 }
  0xb8   : > { %1049 = vrot.lane.b32.xlu1 %v5824_v3, %s5247_s20  ;;  %1047 = vrot.lane.b32.xlu0 %v5827_v53, %s5247_s20  ;;  %v327_v3 = vrot.slane %v5431_v30, 7  ;;  %8953 = vst [vmem:[#allocation66_spill] sm:$0xff] %v5859_v39 }
  0xb9   : > { %v5856_v43 = vsel %vm287_vm0, %v324_v52, %v325_v59 }
  0xba   : > { %v5833_v51 = vpop.permute.xlu1 %760  ;;  %v5835_v38 = vpop.permute.xlu0 %758  ;;  %8952 = vst [vmem:[#allocation65_spill] sm:$0xff] %v5856_v43  ;;  %v5875_v52 = vsel %vm287_vm0, 0.0, %v327_v3 }
  0xbb   : > { %8946 = vst [vmem:[#allocation59_spill] sm:$0xff] %v5833_v51  ;;  %8947 = vst [vmem:[#allocation60_spill] sm:$0xff] %v5835_v38  ;;  %v328_v38 = vrot.slane %v5428_v29, 7 }
  0xbc   : > { %1053 = vrot.lane.b32.xlu1 %v5840_v40, %s5247_s20  ;;  %1051 = vrot.lane.b32.xlu0 %v5843_v63, %s5247_s20  ;;  %v331_v63 = vrot.slane %v5438_v31, 7  ;;  %v330_v40 = vrot.slane %v5441_v32, 7  ;;  %8957 = vst [vmem:[#allocation70_spill] sm:$0xff] %v5875_v52 }
  0xbd   : > { %v5872_v59 = vsel %vm287_vm0, %v327_v3, %v328_v38  ;;  %v334_v38 = vrot.slane %v5451_v36, 7 }
  0xbe   : > { %v5849_v53 = vpop.permute.xlu1 %764  ;;  %v5851_v51 = vpop.permute.xlu0 %762  ;;  %8956 = vst [vmem:[#allocation69_spill] sm:$0xff] %v5872_v59  ;;  %v5894_v3 = vsel %vm287_vm0, %v330_v40, %v331_v63 }
  0xbf   : > { %8950 = vst [vmem:[#allocation63_spill] sm:$0xff] %v5849_v53  ;;  %8951 = vst [vmem:[#allocation64_spill] sm:$0xff] %v5851_v51  ;;  %v5910_v63 = vsel %vm287_vm0, %v333_v1, %v334_v38 }
  0xc0   : > { %1057 = vrot.lane.b32.xlu1 %v5856_v43, %s5247_s20  ;;  %1055 = vrot.lane.b32.xlu0 %v5859_v39, %s5247_s20  ;;  %v5889_v43 = vld [vmem:[%s5288_s17 + $0x188] sm:$0xff]  ;;  %8960 = vst [vmem:[#allocation73_spill] sm:$0xff] %v5894_v3  ;;  %8964 = vst [vmem:[#allocation77_spill] sm:$0xff] %v5910_v63 }
  0xc2   : > { %v5865_v53 = vpop.permute.xlu1 %768  ;;  %v5867_v51 = vpop.permute.xlu0 %766 }
  0xc3   : > { %8954 = vst [vmem:[#allocation67_spill] sm:$0xff] %v5865_v53  ;;  %8955 = vst [vmem:[#allocation68_spill] sm:$0xff] %v5867_v51  ;;  %v5886_v51 = vld [vmem:[%s5288_s17 + $0x180] sm:$0xff] }
  0xc4   : > { %1061 = vrot.lane.b32.xlu1 %v5872_v59, %s5247_s20  ;;  %1059 = vrot.lane.b32.xlu0 %v5875_v52, %s5247_s20  ;;  %v5897_v59 = vsel %vm287_vm0, 0.0, %v330_v40  ;;  %v510_v52 = vrot.slane %v5886_v51, 7  ;;  %v5913_v40 = vsel %vm287_vm0, 0.0, %v333_v1 }
  0xc5   : > { %8961 = vst [vmem:[#allocation74_spill] sm:$0xff] %v5897_v59  ;;  %8965 = vst [vmem:[#allocation78_spill] sm:$0xff] %v5913_v40 }
  0xc6   : > { %v5881_v39 = vpop.permute.xlu1 %901  ;;  %v5883_v53 = vpop.permute.xlu0 %899 }
  0xc7   : > { %8958 = vst [vmem:[#allocation71_spill] sm:$0xff] %v5881_v39  ;;  %8959 = vst [vmem:[#allocation72_spill] sm:$0xff] %v5883_v53  ;;  %v511_v53 = vrot.slane %v5889_v43, 7 }
  0xc8   : > { %1065 = vrot.lane.b32.xlu1 %v5894_v3, %s5247_s20  ;;  %1063 = vrot.lane.b32.xlu0 %v5897_v59, %s5247_s20  ;;  %v5923_v3 = vsel %vm287_vm0, 0.0, %v510_v52 }
  0xc9   : > { %v5920_v59 = vsel %vm287_vm0, %v510_v52, %v511_v53 }
  0xca   : > { %v5905_v39 = vpop.permute.xlu1 %905  ;;  %v5907_v15 = vpop.permute.xlu0 %903 }
  0xcb   : > { %8962 = vst [vmem:[#allocation75_spill] sm:$0xff] %v5905_v39  ;;  %8963 = vst [vmem:[#allocation76_spill] sm:$0xff] %v5907_v15 }
  0xcc   : > { %1069 = vrot.lane.b32.xlu1 %v5910_v63, %s5247_s20  ;;  %1067 = vrot.lane.b32.xlu0 %v5913_v40, %s5247_s20 }
  0xce   : > { %v5925_v39 = vpop.permute.xlu1 %909  ;;  %v5927_v15 = vpop.permute.xlu0 %907 }
  0xd0   : > { %1073 = vrot.lane.b32.xlu1 %v5920_v59, %s5247_s20  ;;  %1071 = vrot.lane.b32.xlu0 %v5923_v3, %s5247_s20 }
  0xd2   : > { %v5933_v1 = vpop.permute.xlu1 %913  ;;  %v5935_v38 = vpop.permute.xlu0 %911 }
  0xd4   : > { %1109 = vrot.lane.b32.xlu1 %v5301_v2, %s5248_s21  ;;  %1107 = vrot.lane.b32.xlu0 %v5291_v0, %s5248_s21 }
  0xd6   : > { %v5941_v53 = vpop.permute.xlu1 %917  ;;  %v5943_v52 = vpop.permute.xlu0 %915 }
  0xd7   : > { %8966 = vst [vmem:[#allocation79_spill] sm:$0xff] %v5941_v53  ;;  %8967 = vst [vmem:[#allocation80_spill] sm:$0xff] %v5943_v52  ;;  %v6424_v53 = vld [vmem:[%s5288_s17 + $0x1a0] sm:$0xff] }
  0xd8   : > { %1113 = vrot.lane.b32.xlu1 %v5311_v4, %s5248_s21  ;;  %1111 = vrot.lane.b32.xlu0 %v5314_v5, %s5248_s21 }
  0xda   : > { %v5949_v40 = vpop.permute.xlu1 %921  ;;  %v5951_v63 = vpop.permute.xlu0 %919 }
  0xdb   : > { %8968 = vst [vmem:[#allocation81_spill] sm:$0xff] %v5949_v40  ;;  %8969 = vst [vmem:[#allocation82_spill] sm:$0xff] %v5951_v63  ;;  %v6365_v63 = vld [vmem:[%s5288_s17 + $0x138] sm:$0xff]  ;;  %v6368_v40 = vld [vmem:[%s5288_s17 + $0x140] sm:$0xff] }
  0xdc   : > { %1117 = vrot.lane.b32.xlu1 %v5321_v6, %s5248_s21  ;;  %1115 = vrot.lane.b32.xlu0 %v5324_v7, %s5248_s21 }
  0xde   : > { %v5957_v0 = vpop.permute.xlu1 %925  ;;  %v5959_v2 = vpop.permute.xlu0 %923 }
  0xdf   : > { %8970 = vst [vmem:[#allocation83_spill] sm:$0xff] %v5957_v0  ;;  %8971 = vst [vmem:[#allocation84_spill] sm:$0xff] %v5959_v2  ;;  %v6317_v2 = vld [vmem:[%s5288_s17 + $0xf0] sm:$0xff]  ;;  %v6320_v0 = vld [vmem:[%s5288_s17 + $0xf8] sm:$0xff] }
  0xe0   : > { %1121 = vrot.lane.b32.xlu1 %v5331_v8, %s5248_s21  ;;  %1119 = vrot.lane.b32.xlu0 %v5334_v9, %s5248_s21 }
  0xe2   : > { %v5965_v4 = vpop.permute.xlu1 %929  ;;  %v5967_v5 = vpop.permute.xlu0 %927 }
  0xe3   : > { %8972 = vst [vmem:[#allocation85_spill] sm:$0xff] %v5965_v4  ;;  %8973 = vst [vmem:[#allocation86_spill] sm:$0xff] %v5967_v5 }
  0xe4   : > { %1125 = vrot.lane.b32.xlu1 %v5341_v10, %s5248_s21  ;;  %1123 = vrot.lane.b32.xlu0 %v5344_v11, %s5248_s21 }
  0xe6   : > { %v5973_v6 = vpop.permute.xlu1 %933  ;;  %v5975_v7 = vpop.permute.xlu0 %931 }
  0xe7   : > { %8974 = vst [vmem:[#allocation87_spill] sm:$0xff] %v5973_v6  ;;  %8975 = vst [vmem:[#allocation88_spill] sm:$0xff] %v5975_v7 }
  0xe8   : > { %1129 = vrot.lane.b32.xlu1 %v5351_v12, %s5248_s21  ;;  %1127 = vrot.lane.b32.xlu0 %v5354_v13, %s5248_s21 }
  0xea   : > { %v5981_v8 = vpop.permute.xlu1 %937  ;;  %v5983_v9 = vpop.permute.xlu0 %935 }
  0xeb   : > { %8976 = vst [vmem:[#allocation89_spill] sm:$0xff] %v5981_v8  ;;  %8977 = vst [vmem:[#allocation90_spill] sm:$0xff] %v5983_v9 }
  0xec   : > { %1133 = vrot.lane.b32.xlu1 %v5363_v16, %s5248_s21  ;;  %1131 = vrot.lane.b32.xlu0 %v5366_v17, %s5248_s21 }
  0xee   : > { %v5989_v10 = vpop.permute.xlu1 %941  ;;  %v5991_v11 = vpop.permute.xlu0 %939 }
  0xef   : > { %8978 = vst [vmem:[#allocation91_spill] sm:$0xff] %v5989_v10  ;;  %8979 = vst [vmem:[#allocation92_spill] sm:$0xff] %v5991_v11 }
  0xf0   : > { %1137 = vrot.lane.b32.xlu1 %v5378_v19, %s5248_s21  ;;  %1135 = vrot.lane.b32.xlu0 %v5381_v20, %s5248_s21 }
  0xf2   : > { %v5997_v12 = vpop.permute.xlu1 %945  ;;  %v5999_v13 = vpop.permute.xlu0 %943 }
  0xf3   : > { %8980 = vst [vmem:[#allocation93_spill] sm:$0xff] %v5997_v12  ;;  %8981 = vst [vmem:[#allocation94_spill] sm:$0xff] %v5999_v13  ;;  %v6221_v13 = vld [vmem:[%s5288_s17 + $0x60] sm:$0xff]  ;;  %v6224_v12 = vld [vmem:[%s5288_s17 + $0x68] sm:$0xff] }
  0xf4   : > { %1141 = vrot.lane.b32.xlu1 %v5388_v21, %s5248_s21  ;;  %1139 = vrot.lane.b32.xlu0 %v5391_v22, %s5248_s21 }
  0xf6   : > { %v6005_v16 = vpop.permute.xlu1 %949  ;;  %v6007_v17 = vpop.permute.xlu0 %947 }
  0xf7   : > { %8982 = vst [vmem:[#allocation95_spill] sm:$0xff] %v6005_v16  ;;  %8983 = vst [vmem:[#allocation96_spill] sm:$0xff] %v6007_v17  ;;  %v6206_v16 = vld [vmem:[%s5288_s17 + $0x50] sm:$0xff] }
  0xf8   : > { %1145 = vrot.lane.b32.xlu1 %v5398_v23, %s5248_s21  ;;  %1143 = vrot.lane.b32.xlu0 %v5401_v24, %s5248_s21 }
  0xfa   : > { %v6013_v19 = vpop.permute.xlu1 %953  ;;  %v6015_v20 = vpop.permute.xlu0 %951 }
  0xfb   : > { %8984 = vst [vmem:[#allocation97_spill] sm:$0xff] %v6013_v19  ;;  %8985 = vst [vmem:[#allocation98_spill] sm:$0xff] %v6015_v20  ;;  %v6184_v19 = vld [vmem:[%s5288_s17 + $0x38] sm:$0xff] }
  0xfc   : > { %1149 = vrot.lane.b32.xlu1 %v5408_v25, %s5248_s21  ;;  %1147 = vrot.lane.b32.xlu0 %v5411_v26, %s5248_s21 }
  0xfe   : > { %v6021_v21 = vpop.permute.xlu1 %957  ;;  %v6023_v22 = vpop.permute.xlu0 %955 }
  0xff   : > { %8986 = vst [vmem:[#allocation99_spill] sm:$0xff] %v6021_v21  ;;  %8987 = vst [vmem:[#allocation100_spill] sm:$0xff] %v6023_v22 }
 0x100   : > { %1153 = vrot.lane.b32.xlu1 %v5418_v27, %s5248_s21  ;;  %1151 = vrot.lane.b32.xlu0 %v5421_v28, %s5248_s21 }
 0x102   : > { %v6029_v23 = vpop.permute.xlu1 %961  ;;  %v6031_v24 = vpop.permute.xlu0 %959 }
 0x103   : > { %8988 = vst [vmem:[#allocation101_spill] sm:$0xff] %v6029_v23  ;;  %8989 = vst [vmem:[#allocation102_spill] sm:$0xff] %v6031_v24 }
 0x104   : > { %1157 = vrot.lane.b32.xlu1 %v5428_v29, %s5248_s21  ;;  %1155 = vrot.lane.b32.xlu0 %v5431_v30, %s5248_s21 }
 0x106   : > { %v6037_v25 = vpop.permute.xlu1 %1013  ;;  %v6039_v26 = vpop.permute.xlu0 %1011 }
 0x108   : > { %1161 = vrot.lane.b32.xlu1 %v5438_v31, %s5248_s21  ;;  %1159 = vrot.lane.b32.xlu0 %v5441_v32, %s5248_s21 }
 0x10a   : > { %v6045_v27 = vpop.permute.xlu1 %1017  ;;  %v6047_v28 = vpop.permute.xlu0 %1015 }
 0x10c   : > { %1165 = vrot.lane.b32.xlu1 %v5451_v36, %s5248_s21  ;;  %1163 = vrot.lane.b32.xlu0 %v5454_v37, %s5248_s21 }
 0x10e   : > { %v6053_v29 = vpop.permute.xlu1 %1021  ;;  %v6055_v30 = vpop.permute.xlu0 %1019 }
 0x110   : > { %1169 = vrot.lane.b32.xlu1 %v5889_v43, %s5248_s21  ;;  %1167 = vrot.lane.b32.xlu0 %v5886_v51, %s5248_s21 }
 0x112   : > { %v6061_v31 = vpop.permute.xlu1 %1025  ;;  %v6063_v32 = vpop.permute.xlu0 %1023 }
 0x113   : > { %8990 = vst [vmem:[#allocation103_spill] sm:$0xff] %v6061_v31  ;;  %8991 = vst [vmem:[#allocation104_spill] sm:$0xff] %v6063_v32 }
 0x114   : > { %1301 = vrot.lane.b32.xlu1 %v5471_v48, %s5249_s22  ;;  %1299 = vrot.lane.b32.xlu0 %v5474_v49, %s5249_s22 }
 0x116   : > { %v6069_v36 = vpop.permute.xlu1 %1029  ;;  %v6071_v37 = vpop.permute.xlu0 %1027 }
 0x117   : > { %8992 = vst [vmem:[#allocation105_spill] sm:$0xff] %v6069_v36  ;;  %8993 = vst [vmem:[#allocation106_spill] sm:$0xff] %v6071_v37  ;;  %v6400_v36 = vld [vmem:[%s5288_s17 + $0x170] sm:$0xff] }
 0x118   : > { %1305 = vrot.lane.b32.xlu1 %v5484_v54, %s5249_s22  ;;  %1303 = vrot.lane.b32.xlu0 %v5487_v55, %s5249_s22 }
 0x11a   : > { %v6077_v24 = vpop.permute.xlu1 %1033  ;;  %v6079_v23 = vpop.permute.xlu0 %1031 }
 0x11b   : > { %8994 = vst [vmem:[#allocation107_spill] sm:$0xff] %v6077_v24  ;;  %8995 = vst [vmem:[#allocation108_spill] sm:$0xff] %v6079_v23  ;;  %v6349_v23 = vld [vmem:[%s5288_s17 + $0x120] sm:$0xff]  ;;  %v6352_v24 = vld [vmem:[%s5288_s17 + $0x128] sm:$0xff] }
 0x11c   : > { %1309 = vrot.lane.b32.xlu1 %v5497_v60, %s5249_s22  ;;  %1307 = vrot.lane.b32.xlu0 %v5500_v61, %s5249_s22 }
 0x11e   : > { %v6085_v48 = vpop.permute.xlu1 %1037  ;;  %v6087_v49 = vpop.permute.xlu0 %1035 }
 0x11f   : > { %8996 = vst [vmem:[#allocation109_spill] sm:$0xff] %v6085_v48  ;;  %8997 = vst [vmem:[#allocation110_spill] sm:$0xff] %v6087_v49  ;;  %v6301_v49 = vld [vmem:[%s5288_s17 + $0xd8] sm:$0xff]  ;;  %v6304_v48 = vld [vmem:[%s5288_s17 + $0xe0] sm:$0xff] }
 0x120   : > { %1313 = vrot.lane.b32.xlu1 %v5510_v33, %s5249_s22  ;;  %1311 = vrot.lane.b32.xlu0 %v5513_v34, %s5249_s22 }
 0x122   : > { %v6093_v54 = vpop.permute.xlu1 %1041  ;;  %v6095_v55 = vpop.permute.xlu0 %1039 }
 0x123   : > { %8998 = vst [vmem:[#allocation111_spill] sm:$0xff] %v6093_v54  ;;  %8999 = vst [vmem:[#allocation112_spill] sm:$0xff] %v6095_v55  ;;  %v6269_v55 = vld [vmem:[%s5288_s17 + $0xa8] sm:$0xff]  ;;  %v6272_v54 = vld [vmem:[%s5288_s17 + $0xb0] sm:$0xff] }
 0x124   : > { %1317 = vrot.lane.b32.xlu1 %v5523_v41, %s5249_s22  ;;  %1315 = vrot.lane.b32.xlu0 %v5526_v42, %s5249_s22 }
 0x126   : > { %v6101_v60 = vpop.permute.xlu1 %1045  ;;  %v6103_v61 = vpop.permute.xlu0 %1043 }
 0x127   : > { %9000 = vst [vmem:[#allocation113_spill] sm:$0xff] %v6101_v60  ;;  %9001 = vst [vmem:[#allocation114_spill] sm:$0xff] %v6103_v61  ;;  %v6253_v61 = vld [vmem:[%s5288_s17 + $0x90] sm:$0xff]  ;;  %v6256_v60 = vld [vmem:[%s5288_s17 + $0x98] sm:$0xff] }
 0x128   : > { %1321 = vrot.lane.b32.xlu1 %v5536_v47, %s5249_s22  ;;  %1319 = vrot.lane.b32.xlu0 %v5539_v50, %s5249_s22 }
 0x12a   : > { %v6109_v33 = vpop.permute.xlu1 %1049  ;;  %v6111_v34 = vpop.permute.xlu0 %1047 }
 0x12b   : > { %9002 = vst [vmem:[#allocation115_spill] sm:$0xff] %v6109_v33  ;;  %9003 = vst [vmem:[#allocation116_spill] sm:$0xff] %v6111_v34  ;;  %v6237_v34 = vld [vmem:[%s5288_s17 + $0x78] sm:$0xff]  ;;  %v6240_v33 = vld [vmem:[%s5288_s17 + $0x80] sm:$0xff] }
 0x12c   : > { %1325 = vrot.lane.b32.xlu1 %v5549_v57, %s5249_s22  ;;  %1323 = vrot.lane.b32.xlu0 %v5552_v58, %s5249_s22 }
 0x12e   : > { %v6117_v41 = vpop.permute.xlu1 %1053  ;;  %v6119_v42 = vpop.permute.xlu0 %1051 }
 0x12f   : > { %9004 = vst [vmem:[#allocation117_spill] sm:$0xff] %v6117_v41  ;;  %9005 = vst [vmem:[#allocation118_spill] sm:$0xff] %v6119_v42  ;;  %v632_v42 = vrot.slane %v6221_v13, 7  ;;  %v633_v41 = vrot.slane %v6224_v12, 7 }
 0x130   : > { %1329 = vrot.lane.b32.xlu1 %v5562_v14, %s5249_s22  ;;  %1327 = vrot.lane.b32.xlu0 %v5565_v35, %s5249_s22  ;;  %v9010_v14 = vld [vmem:[#allocation5_spill] sm:$0xff] }
 0x132   : > { %v6125_v47 = vpop.permute.xlu1 %1057  ;;  %v6127_v50 = vpop.permute.xlu0 %1055 }
 0x133   : > { %9006 = vst [vmem:[#allocation119_spill] sm:$0xff] %v6125_v47  ;;  %9007 = vst [vmem:[#allocation120_spill] sm:$0xff] %v6127_v50 }
 0x134   : > { %1333 = vrot.lane.b32.xlu1 %v5575_v44, %s5249_s22  ;;  %1331 = vrot.lane.b32.xlu0 %v5578_v45, %s5249_s22  ;;  %v9013_v44 = vld [vmem:[#allocation6_spill] sm:$0xff]  ;;  %v9014_v45 = vld [vmem:[#allocation7_spill] sm:$0xff] }
 0x136   : > { %v6133_v57 = vpop.permute.xlu1 %1061  ;;  %v6135_v58 = vpop.permute.xlu0 %1059 }
 0x137   : > { %9008 = vst [vmem:[#allocation121_spill] sm:$0xff] %v6133_v57  ;;  %9009 = vst [vmem:[#allocation122_spill] sm:$0xff] %v6135_v58  ;;  %v627_v58 = vrot.slane %v6184_v19, 7 }
 0x138   : > { %1337 = vrot.lane.b32.xlu1 %v5588_v56, %s5249_s22  ;;  %1335 = vrot.lane.b32.xlu0 %v9010_v14, %s5249_s22  ;;  %v9017_v56 = vld [vmem:[#allocation8_spill] sm:$0xff] }
 0x13a   : > { %v6141_v35 = vpop.permute.xlu1 %1065  ;;  %v6143_v22 = vpop.permute.xlu0 %1063 }
 0x13b   : > { %9011 = vst [vmem:[#allocation5_spill] sm:$0xff] %v6141_v35  ;;  %9012 = vst [vmem:[#allocation123_spill] sm:$0xff] %v6143_v22  ;;  %v6181_v35 = vld [vmem:[%s5288_s17 + $0x30] sm:$0xff] }
 0x13c   : > { %1341 = vrot.lane.b32.xlu1 %v9013_v44, %s5249_s22  ;;  %1339 = vrot.lane.b32.xlu0 %v9014_v45, %s5249_s22  ;;  %v9020_v44 = vld [vmem:[#allocation9_spill] sm:$0xff] }
 0x13e   : > { %v6149_v21 = vpop.permute.xlu1 %1069  ;;  %v6151_v20 = vpop.permute.xlu0 %1067 }
 0x13f   : > { %9015 = vst [vmem:[#allocation6_spill] sm:$0xff] %v6149_v21  ;;  %9016 = vst [vmem:[#allocation7_spill] sm:$0xff] %v6151_v20 }
 0x140   : > { %1345 = vrot.lane.b32.xlu1 %v5614_v18, %s5249_s22  ;;  %1343 = vrot.lane.b32.xlu0 %v9017_v56, %s5249_s22  ;;  %v4852_v18 = vld [vmem:[%s5288_s17 + $0x190] sm:$0xff]  ;;  %v9021_v56 = vld [vmem:[#allocation12_spill] sm:$0xff] }
 0x142   : > { %v6157_v14 = vpop.permute.xlu1 %1073  ;;  %v6159_v22 = vpop.permute.xlu0 %1071 }
 0x143   : > { %9018 = vst [vmem:[#allocation8_spill] sm:$0xff] %v6157_v14  ;;  %9019 = vst [vmem:[#allocation124_spill] sm:$0xff] %v6159_v22  ;;  %v1295_v22 = vrot.slane %v5889_v43, 1  ;;  %v1297_v14 = vrot.slane %v4852_v18, 1  ;;  %v626_v18 = vrot.slane %v6181_v35, 7 }
 0x144   : > { %1349 = vrot.lane.b32.xlu1 %v5627_v46, %s5249_s22  ;;  %1347 = vrot.lane.b32.xlu0 %v9020_v44, %s5249_s22  ;;  %v1294_v46 = vrot.slane %v5886_v51, 1 }
 0x145   : > { %v6191_v43 = vsel %vm818_vm1, %v1295_v22, %v1297_v14  ;;  %v690_v14 = vsel %vm287_vm0, 0.0, %v626_v18 }
 0x146   : > { %v6165_v45 = vpop.permute.xlu1 %1109  ;;  %v6167_v20 = vpop.permute.xlu0 %1107  ;;  %v6194_v51 = vsel %vm818_vm1, %v1294_v46, %v1295_v22  ;;  %v628_v22 = vsel %vm287_vm0, %v626_v18, %v627_v58 }
 0x148   : > { %1353 = vrot.lane.b32.xlu1 %v5644_v62, %s5249_s22  ;;  %1351 = vrot.lane.b32.xlu0 %v9021_v56, %s5249_s22  ;;  %v9022_v62 = vld [vmem:[#allocation15_spill] sm:$0xff]  ;;  %v9023_v56 = vld [vmem:[#allocation16_spill] sm:$0xff] }
 0x14a   : > { %v6176_v21 = vpop.permute.xlu1 %1113  ;;  %v6178_v44 = vpop.permute.xlu0 %1111 }
 0x14c   : > { %1357 = vrot.lane.b32.xlu1 %v9022_v62, %s5249_s22  ;;  %1355 = vrot.lane.b32.xlu0 %v9023_v56, %s5249_s22  ;;  %v6203_v62 = vld [vmem:[%s5288_s17 + $0x48] sm:$0xff]  ;;  %v630_v56 = vrot.slane %v6206_v16, 7 }
 0x14d   : > { %v629_v46 = vrot.slane %v6203_v62, 7 }
 0x14e   : > { %v6198_v57 = vpop.permute.xlu1 %1117  ;;  %v6200_v17 = vpop.permute.xlu0 %1115 }
 0x14f   : > { %v631_v58 = vsel %vm287_vm0, %v629_v46, %v630_v56  ;;  %v691_v18 = vsel %vm287_vm0, 0.0, %v629_v46  ;;  %v635_v46 = vrot.slane %v6237_v34, 7  ;;  %v636_v56 = vrot.slane %v6240_v33, 7 }
 0x150   : > { %1361 = vrot.lane.b32.xlu1 %v6191_v43, %s5249_s22  ;;  %1359 = vrot.lane.b32.xlu0 %v6194_v51, %s5249_s22 }
 0x152   : > { %v6216_v50 = vpop.permute.xlu1 %1121  ;;  %v6218_v47 = vpop.permute.xlu0 %1119 }
 0x153   : > { %9024 = vst [vmem:[#allocation9_spill] sm:$0xff] %v6216_v50  ;;  %9025 = vst [vmem:[#allocation12_spill] sm:$0xff] %v6218_v47 }
 0x154   : > { %1413 = vrot.lane.b32.xlu1 %v628_v22, %s5250_s23  ;;  %1411 = vrot.lane.b32.xlu0 %v690_v14, %s5250_s23  ;;  %v634_v22 = vsel %vm287_vm0, %v632_v42, %v633_v41  ;;  %v692_v14 = vsel %vm287_vm0, 0.0, %v632_v42  ;;  %v637_v41 = vsel %vm287_vm0, %v635_v46, %v636_v56  ;;  %v693_v42 = vsel %vm287_vm0, 0.0, %v635_v46 }
 0x155   : > { %v641_v46 = vrot.slane %v6269_v55, 7  ;;  %v642_v56 = vrot.slane %v6272_v54, 7 }
 0x156   : > { %v6232_v11 = vpop.permute.xlu1 %1125  ;;  %v6234_v10 = vpop.permute.xlu0 %1123 }
 0x157   : > { %9026 = vst [vmem:[#allocation15_spill] sm:$0xff] %v6232_v11  ;;  %9027 = vst [vmem:[#allocation16_spill] sm:$0xff] %v6234_v10  ;;  %v6381_v10 = vld [vmem:[%s5288_s17 + $0x150] sm:$0xff]  ;;  %v6384_v11 = vld [vmem:[%s5288_s17 + $0x158] sm:$0xff] }
 0x158   : > { %1417 = vrot.lane.b32.xlu1 %v631_v58, %s5250_s23  ;;  %1415 = vrot.lane.b32.xlu0 %v691_v18, %s5250_s23  ;;  %v638_v58 = vrot.slane %v6253_v61, 7  ;;  %v639_v18 = vrot.slane %v6256_v60, 7 }
 0x15a   : > { %v6248_v9 = vpop.permute.xlu1 %1129  ;;  %v6250_v8 = vpop.permute.xlu0 %1127 }
 0x15b   : > { %9028 = vst [vmem:[#allocation125_spill] sm:$0xff] %v6248_v9  ;;  %9029 = vst [vmem:[#allocation126_spill] sm:$0xff] %v6250_v8  ;;  %v6333_v8 = vld [vmem:[%s5288_s17 + $0x108] sm:$0xff]  ;;  %v6336_v9 = vld [vmem:[%s5288_s17 + $0x110] sm:$0xff] }
 0x15c   : > { %1421 = vrot.lane.b32.xlu1 %v634_v22, %s5250_s23  ;;  %1419 = vrot.lane.b32.xlu0 %v692_v14, %s5250_s23  ;;  %v640_v22 = vsel %vm287_vm0, %v638_v58, %v639_v18  ;;  %v694_v14 = vsel %vm287_vm0, 0.0, %v638_v58 }
 0x15e   : > { %v6264_v7 = vpop.permute.xlu1 %1133  ;;  %v6266_v6 = vpop.permute.xlu0 %1131 }
 0x15f   : > { %9030 = vst [vmem:[#allocation127_spill] sm:$0xff] %v6264_v7  ;;  %9031 = vst [vmem:[#allocation128_spill] sm:$0xff] %v6266_v6  ;;  %v6285_v6 = vld [vmem:[%s5288_s17 + $0xc0] sm:$0xff]  ;;  %v6288_v7 = vld [vmem:[%s5288_s17 + $0xc8] sm:$0xff] }
 0x160   : > { %1425 = vrot.lane.b32.xlu1 %v637_v41, %s5250_s23  ;;  %1423 = vrot.lane.b32.xlu0 %v693_v42, %s5250_s23  ;;  %v643_v41 = vsel %vm287_vm0, %v641_v46, %v642_v56  ;;  %v695_v42 = vsel %vm287_vm0, 0.0, %v641_v46  ;;  %v644_v58 = vrot.slane %v6285_v6, 7  ;;  %v645_v18 = vrot.slane %v6288_v7, 7 }
 0x161   : > { %v647_v46 = vrot.slane %v6301_v49, 7  ;;  %v648_v56 = vrot.slane %v6304_v48, 7 }
 0x162   : > { %v6280_v5 = vpop.permute.xlu1 %1137  ;;  %v6282_v4 = vpop.permute.xlu0 %1135 }
 0x163   : > { %9032 = vst [vmem:[#allocation129_spill] sm:$0xff] %v6280_v5  ;;  %9033 = vst [vmem:[#allocation130_spill] sm:$0xff] %v6282_v4 }
 0x164   : > { %1429 = vrot.lane.b32.xlu1 %v640_v22, %s5250_s23  ;;  %1427 = vrot.lane.b32.xlu0 %v694_v14, %s5250_s23  ;;  %v646_v22 = vsel %vm287_vm0, %v644_v58, %v645_v18  ;;  %v696_v14 = vsel %vm287_vm0, 0.0, %v644_v58  ;;  %v650_v58 = vrot.slane %v6317_v2, 7  ;;  %v651_v18 = vrot.slane %v6320_v0, 7 }
 0x166   : > { %v6296_v5 = vpop.permute.xlu1 %1141  ;;  %v6298_v4 = vpop.permute.xlu0 %1139 }
 0x167   : > { %9034 = vst [vmem:[#allocation131_spill] sm:$0xff] %v6296_v5  ;;  %9035 = vst [vmem:[#allocation132_spill] sm:$0xff] %v6298_v4 }
 0x168   : > { %1433 = vrot.lane.b32.xlu1 %v643_v41, %s5250_s23  ;;  %1431 = vrot.lane.b32.xlu0 %v695_v42, %s5250_s23  ;;  %v649_v41 = vsel %vm287_vm0, %v647_v46, %v648_v56  ;;  %v697_v42 = vsel %vm287_vm0, 0.0, %v647_v46  ;;  %v653_v46 = vrot.slane %v6333_v8, 7  ;;  %v654_v56 = vrot.slane %v6336_v9, 7 }
 0x16a   : > { %v6312_v5 = vpop.permute.xlu1 %1145  ;;  %v6314_v4 = vpop.permute.xlu0 %1143 }
 0x16b   : > { %9036 = vst [vmem:[#allocation133_spill] sm:$0xff] %v6312_v5  ;;  %9037 = vst [vmem:[#allocation134_spill] sm:$0xff] %v6314_v4 }
 0x16c   : > { %1437 = vrot.lane.b32.xlu1 %v646_v22, %s5250_s23  ;;  %1435 = vrot.lane.b32.xlu0 %v696_v14, %s5250_s23  ;;  %v652_v22 = vsel %vm287_vm0, %v650_v58, %v651_v18  ;;  %v698_v14 = vsel %vm287_vm0, 0.0, %v650_v58  ;;  %v656_v58 = vrot.slane %v6349_v23, 7  ;;  %v657_v18 = vrot.slane %v6352_v24, 7 }
 0x16e   : > { %v6328_v5 = vpop.permute.xlu1 %1149  ;;  %v6330_v4 = vpop.permute.xlu0 %1147 }
 0x16f   : > { %9038 = vst [vmem:[#allocation135_spill] sm:$0xff] %v6328_v5  ;;  %9039 = vst [vmem:[#allocation136_spill] sm:$0xff] %v6330_v4 }
 0x170   : > { %1441 = vrot.lane.b32.xlu1 %v649_v41, %s5250_s23  ;;  %1439 = vrot.lane.b32.xlu0 %v697_v42, %s5250_s23  ;;  %v655_v41 = vsel %vm287_vm0, %v653_v46, %v654_v56  ;;  %v699_v42 = vsel %vm287_vm0, 0.0, %v653_v46  ;;  %v659_v46 = vrot.slane %v6365_v63, 7  ;;  %v660_v56 = vrot.slane %v6368_v40, 7 }
 0x172   : > { %v6344_v5 = vpop.permute.xlu1 %1153  ;;  %v6346_v4 = vpop.permute.xlu0 %1151 }
 0x173   : > { %9040 = vst [vmem:[#allocation137_spill] sm:$0xff] %v6344_v5  ;;  %9041 = vst [vmem:[#allocation138_spill] sm:$0xff] %v6346_v4 }
 0x174   : > { %1445 = vrot.lane.b32.xlu1 %v652_v22, %s5250_s23  ;;  %1443 = vrot.lane.b32.xlu0 %v698_v14, %s5250_s23  ;;  %v658_v22 = vsel %vm287_vm0, %v656_v58, %v657_v18  ;;  %v700_v14 = vsel %vm287_vm0, 0.0, %v656_v58  ;;  %v662_v58 = vrot.slane %v6381_v10, 7  ;;  %v663_v18 = vrot.slane %v6384_v11, 7 }
 0x176   : > { %v6360_v5 = vpop.permute.xlu1 %1157  ;;  %v6362_v4 = vpop.permute.xlu0 %1155 }
 0x177   : > { %9042 = vst [vmem:[#allocation139_spill] sm:$0xff] %v6360_v5  ;;  %9043 = vst [vmem:[#allocation140_spill] sm:$0xff] %v6362_v4 }
 0x178   : > { %1449 = vrot.lane.b32.xlu1 %v655_v41, %s5250_s23  ;;  %1447 = vrot.lane.b32.xlu0 %v699_v42, %s5250_s23  ;;  %v661_v41 = vsel %vm287_vm0, %v659_v46, %v660_v56  ;;  %v701_v42 = vsel %vm287_vm0, 0.0, %v659_v46  ;;  %v666_v56 = vrot.slane %v6400_v36, 7 }
 0x17a   : > { %v6376_v5 = vpop.permute.xlu1 %1161  ;;  %v6378_v4 = vpop.permute.xlu0 %1159 }
 0x17b   : > { %9044 = vst [vmem:[#allocation141_spill] sm:$0xff] %v6376_v5  ;;  %9045 = vst [vmem:[#allocation142_spill] sm:$0xff] %v6378_v4  ;;  %v6397_v4 = vld [vmem:[%s5288_s17 + $0x168] sm:$0xff] }
 0x17c   : > { %1453 = vrot.lane.b32.xlu1 %v658_v22, %s5250_s23  ;;  %1451 = vrot.lane.b32.xlu0 %v700_v14, %s5250_s23  ;;  %v664_v22 = vsel %vm287_vm0, %v662_v58, %v663_v18  ;;  %v702_v14 = vsel %vm287_vm0, 0.0, %v662_v58  ;;  %v665_v46 = vrot.slane %v6397_v4, 7  ;;  %v6421_v58 = vld [vmem:[%s5288_s17 + $0x198] sm:$0xff] }
 0x17e   : > { %v6392_v37 = vpop.permute.xlu1 %1165  ;;  %v6394_v5 = vpop.permute.xlu0 %1163 }
 0x17f   : > { %9046 = vst [vmem:[#allocation143_spill] sm:$0xff] %v6392_v37  ;;  %9047 = vst [vmem:[#allocation144_spill] sm:$0xff] %v6394_v5 }
 0x180   : > { %1457 = vrot.lane.b32.xlu1 %v661_v41, %s5250_s23  ;;  %1455 = vrot.lane.b32.xlu0 %v701_v42, %s5250_s23  ;;  %v667_v41 = vsel %vm287_vm0, %v665_v46, %v666_v56  ;;  %v703_v42 = vsel %vm287_vm0, 0.0, %v665_v46  ;;  %v671_v46 = vrot.slane %v6421_v58, 7  ;;  %v672_v56 = vrot.slane %v6424_v53, 7 }
 0x182   : > { %v6408_v37 = vpop.permute.xlu1 %1169  ;;  %v6410_v5 = vpop.permute.xlu0 %1167 }
 0x183   : > { %9048 = vst [vmem:[#allocation145_spill] sm:$0xff] %v6408_v37  ;;  %9049 = vst [vmem:[#allocation146_spill] sm:$0xff] %v6410_v5 }
 0x184   : > { %1461 = vrot.lane.b32.xlu1 %v664_v22, %s5250_s23  ;;  %1459 = vrot.lane.b32.xlu0 %v702_v14, %s5250_s23  ;;  %v197_v22 = vld [vmem:[%s8816_s1] sm:$0xff]  ;;  %v198_v14 = vld [vmem:[%s8816_s1 + $0x8] sm:$0xff] }
 0x185   : > { %v5192_v5 = vpack.c.bf16 %v198_v14, %v197_v22  ;;  %v673_v22 = vsel %vm287_vm0, %v671_v46, %v672_v56  ;;  %v705_v14 = vsel %vm287_vm0, 0.0, %v671_v46  ;;  %v4855_v56 = vld [vmem:[%s5288_s17 + $0x40] sm:$0xff] }
 0x186   : > { %v6416_v52 = vpop.permute.xlu1 %1301  ;;  %v6418_v18 = vpop.permute.xlu0 %1299 }
 0x187   : > { %5193 = vmatprep.subr.bf16.mxu0 %v5192_v5 }
 0x188   : > { %1465 = vrot.lane.b32.xlu1 %v667_v41, %s5250_s23  ;;  %1463 = vrot.lane.b32.xlu0 %v703_v42, %s5250_s23  ;;  %v199_v41 = vld [vmem:[%s8816_s1 + $0x10] sm:$0xff]  ;;  %v200_v42 = vld [vmem:[%s8816_s1 + $0x18] sm:$0xff] }
 0x189   : > { %5195 = vmatpush3.bf16.msra.mxu0 %v5192_v5  ;;  %v5196_v50 = vpack.c.bf16 %v200_v42, %v199_v41  ;;  %v201_v5 = vld [vmem:[%s8816_s1 + $0x20] sm:$0xf]  ;;  %v1620_v41 = vrot.slane %v6184_v19, 1  ;;  %v1622_v42 = vrot.slane %v4855_v56, 1 }
 0x18a   : > { %v6436_v37 = vpop.permute.xlu1 %1305  ;;  %v6438_v47 = vpop.permute.xlu0 %1303 }
 0x18b   : > { %5197 = vmatprep.subr.bf16.mxu0 %v5196_v50 }
 0x18c   : > { %1469 = vrot.lane.b32.xlu1 %v5920_v59, %s5250_s23  ;;  %1467 = vrot.lane.b32.xlu0 %v5923_v3, %s5250_s23 }
 0x18d   : > { %5199 = vmatpush3.bf16.msra.mxu0 %v5196_v50 }
 0x18e   : > { %v6452_v32 = vpop.permute.xlu1 %1309  ;;  %v6454_v59 = vpop.permute.xlu0 %1307  ;;  %5084 = vmatprep.subr.msk.mxu0 %vm2155_vm2, %v201_v5 }
 0x190   : > { %1473 = vrot.lane.b32.xlu1 %v673_v22, %s5250_s23  ;;  %1471 = vrot.lane.b32.xlu0 %v705_v14, %s5250_s23  ;;  %v1619_v22 = vrot.slane %v6181_v35, 1  ;;  %v4858_v14 = vld [vmem:[%s5288_s17 + $0x58] sm:$0xff] }
 0x191   : > { %5085 = vmatpush3.msk.msra.mxu0 %vm2155_vm2, %v201_v5 }
 0x192   : > { %v6458_v3 = vpop.permute.xlu1 %1313  ;;  %v6460_v31 = vpop.permute.xlu0 %1311 }
 0x193   : > { %9050 = vst [vmem:[#allocation147_spill] sm:$0xff] %v6458_v3  ;;  %9051 = vst [vmem:[#allocation148_spill] sm:$0xff] %v6460_v31  ;;  %v1623_v3 = vsel %vm818_vm1, %v1620_v41, %v1622_v42  ;;  %v1630_v42 = vrot.slane %v6224_v12, 1 }
 0x194   : > { %1509 = vrot.lane.b32.xlu1 %v6184_v19, %s5251_s7  ;;  %1507 = vrot.lane.b32.xlu0 %v6181_v35, %s5251_s7  ;;  %v1621_v19 = vsel %vm818_vm1, %v1619_v22, %v1620_v41  ;;  %v1624_v35 = vrot.slane %v6203_v62, 1 }
 0x196   : > { %v6471_v50 = vpop.permute.xlu1 %1317  ;;  %v6473_v46 = vpop.permute.xlu0 %1315 }
 0x197   : > { %9052 = vst [vmem:[#allocation149_spill] sm:$0xff] %v6471_v50  ;;  %9053 = vst [vmem:[#allocation150_spill] sm:$0xff] %v6473_v46  ;;  %v1625_v46 = vrot.slane %v6206_v16, 1  ;;  %v1627_v50 = vrot.slane %v4858_v14, 1 }
 0x198   : > { %1513 = vrot.lane.b32.xlu1 %v6206_v16, %s5251_s7  ;;  %1511 = vrot.lane.b32.xlu0 %v6203_v62, %s5251_s7  ;;  %v1629_v62 = vrot.slane %v6221_v13, 1 }
 0x199   : > { %v1628_v16 = vsel %vm818_vm1, %v1625_v46, %v1627_v50  ;;  %v1626_v14 = vsel %vm818_vm1, %v1624_v35, %v1625_v46  ;;  %v1634_v35 = vrot.slane %v6237_v34, 1 }
 0x19a   : > { %v6483_v31 = vpop.permute.xlu1 %1321  ;;  %v6485_v5 = vpop.permute.xlu0 %1319 }
 0x19b   : > { %9054 = vst [vmem:[#allocation151_spill] sm:$0xff] %v6483_v31  ;;  %9055 = vst [vmem:[#allocation152_spill] sm:$0xff] %v6485_v5  ;;  %v4861_v5 = vld [vmem:[%s5288_s17 + $0x70] sm:$0xff] }
 0x19c   : > { %1517 = vrot.lane.b32.xlu1 %v6224_v12, %s5251_s7  ;;  %1515 = vrot.lane.b32.xlu0 %v6221_v13, %s5251_s7  ;;  %v1632_v41 = vrot.slane %v4861_v5, 1  ;;  %v4864_v12 = vld [vmem:[%s5288_s17 + $0x88] sm:$0xff]  ;;  %v1635_v13 = vrot.slane %v6240_v33, 1 }
 0x19d   : > { %v1637_v5 = vrot.slane %v4864_v12, 1  ;;  %v1640_v12 = vrot.slane %v6256_v60, 1 }
 0x19e   : > { %v6495_v56 = vpop.permute.xlu1 %1325  ;;  %v6497_v31 = vpop.permute.xlu0 %1323 }
 0x19f   : > { %9056 = vst [vmem:[#allocation153_spill] sm:$0xff] %v6495_v56 }
 0x1a0   : > { %1701 = vrot.lane.b32.xlu1 %v1623_v3, %s5252_s8  ;;  %1699 = vrot.lane.b32.xlu0 %v1621_v19, %s5252_s8  ;;  %v1633_v3 = vsel %vm818_vm1, %v1630_v42, %v1632_v41  ;;  %v1631_v19 = vsel %vm818_vm1, %v1629_v62, %v1630_v42  ;;  %v1638_v42 = vsel %vm818_vm1, %v1635_v13, %v1637_v5 }
 0x1a1   : > { %v1636_v41 = vsel %vm818_vm1, %v1634_v35, %v1635_v13 }
 0x1a2   : > { %v6506_v22 = vpop.permute.xlu1 %1329  ;;  %v6508_v56 = vpop.permute.xlu0 %1327 }
 0x1a4   : > { %1705 = vrot.lane.b32.xlu1 %v1628_v16, %s5252_s8  ;;  %1703 = vrot.lane.b32.xlu0 %v1626_v14, %s5252_s8 }
 0x1a6   : > { %v6514_v50 = vpop.permute.xlu1 %1333  ;;  %v6516_v46 = vpop.permute.xlu0 %1331 }
 0x1a7   : > { %9057 = vst [vmem:[#allocation154_spill] sm:$0xff] %v6516_v46  ;;  %v1674_v46 = vrot.slane %v6365_v63, 1 }
 0x1a8   : > { %1709 = vrot.lane.b32.xlu1 %v1633_v3, %s5252_s8  ;;  %1707 = vrot.lane.b32.xlu0 %v1631_v19, %s5252_s8  ;;  %v4867_v19 = vld [vmem:[%s5288_s17 + $0xa0] sm:$0xff] }
 0x1aa   : > { %v6523_v16 = vpop.permute.xlu1 %1337  ;;  %v6525_v14 = vpop.permute.xlu0 %1335 }
 0x1ab   : > { %9058 = vst [vmem:[#allocation155_spill] sm:$0xff] %v6523_v16  ;;  %9059 = vst [vmem:[#allocation156_spill] sm:$0xff] %v6525_v14  ;;  %v1639_v14 = vrot.slane %v6253_v61, 1  ;;  %v1675_v16 = vrot.slane %v6368_v40, 1 }
 0x1ac   : > { %1521 = vrot.lane.b32.xlu1 %v6240_v33, %s5251_s7  ;;  %1519 = vrot.lane.b32.xlu0 %v6237_v34, %s5251_s7  ;;  %v1642_v33 = vrot.slane %v4867_v19, 1  ;;  %v4870_v19 = vld [vmem:[%s5288_s17 + $0xb8] sm:$0xff] }
 0x1ad   : > { %v1641_v35 = vsel %vm818_vm1, %v1639_v14, %v1640_v12 }
 0x1ae   : > { %v6533_v62 = vpop.permute.xlu1 %1341  ;;  %v6535_v3 = vpop.permute.xlu0 %1339  ;;  %v1643_v13 = vsel %vm818_vm1, %v1640_v12, %v1642_v33 }
 0x1af   : > { %9060 = vst [vmem:[#allocation157_spill] sm:$0xff] %v6533_v62  ;;  %9061 = vst [vmem:[#allocation158_spill] sm:$0xff] %v6535_v3  ;;  %v1670_v3 = vrot.slane %v6352_v24, 1  ;;  %v1669_v62 = vrot.slane %v6349_v23, 1 }
 0x1b0   : > { %1713 = vrot.lane.b32.xlu1 %v1638_v42, %s5252_s8  ;;  %1711 = vrot.lane.b32.xlu0 %v1636_v41, %s5252_s8 }
 0x1b2   : > { %v6542_v34 = vpop.permute.xlu1 %1345  ;;  %v6544_v5 = vpop.permute.xlu0 %1343 }
 0x1b3   : > { %9062 = vst [vmem:[#allocation159_spill] sm:$0xff] %v6542_v34  ;;  %9063 = vst [vmem:[#allocation160_spill] sm:$0xff] %v6544_v5  ;;  %v1645_v5 = vrot.slane %v6272_v54, 1  ;;  %v1644_v34 = vrot.slane %v6269_v55, 1 }
 0x1b4   : > { %1525 = vrot.lane.b32.xlu1 %v6256_v60, %s5251_s7  ;;  %1523 = vrot.lane.b32.xlu0 %v6253_v61, %s5251_s7  ;;  %v1647_v60 = vrot.slane %v4870_v19, 1  ;;  %v4873_v19 = vld [vmem:[%s5288_s17 + $0xd0] sm:$0xff] }
 0x1b5   : > { %v1646_v12 = vsel %vm818_vm1, %v1644_v34, %v1645_v5 }
 0x1b6   : > { %v6552_v42 = vpop.permute.xlu1 %1349  ;;  %v6554_v41 = vpop.permute.xlu0 %1347  ;;  %v1648_v14 = vsel %vm818_vm1, %v1645_v5, %v1647_v60 }
 0x1b7   : > { %9064 = vst [vmem:[#allocation161_spill] sm:$0xff] %v6552_v42  ;;  %9065 = vst [vmem:[#allocation162_spill] sm:$0xff] %v6554_v41  ;;  %v1665_v41 = vrot.slane %v6336_v9, 1  ;;  %v1664_v42 = vrot.slane %v6333_v8, 1 }
 0x1b8   : > { %1717 = vrot.lane.b32.xlu1 %v1643_v13, %s5252_s8  ;;  %1715 = vrot.lane.b32.xlu0 %v1641_v35, %s5252_s8 }
 0x1ba   : > { %v6561_v61 = vpop.permute.xlu1 %1353  ;;  %v6563_v33 = vpop.permute.xlu0 %1351 }
 0x1bb   : > { %9066 = vst [vmem:[#allocation163_spill] sm:$0xff] %v6561_v61  ;;  %9067 = vst [vmem:[#allocation164_spill] sm:$0xff] %v6563_v33  ;;  %v1650_v33 = vrot.slane %v6288_v7, 1  ;;  %v1649_v61 = vrot.slane %v6285_v6, 1 }
 0x1bc   : > { %1529 = vrot.lane.b32.xlu1 %v6272_v54, %s5251_s7  ;;  %1527 = vrot.lane.b32.xlu0 %v6269_v55, %s5251_s7  ;;  %v1652_v54 = vrot.slane %v4873_v19, 1  ;;  %v4876_v19 = vld [vmem:[%s5288_s17 + $0xe8] sm:$0xff] }
 0x1bd   : > { %v1651_v5 = vsel %vm818_vm1, %v1649_v61, %v1650_v33 }
 0x1be   : > { %v6571_v13 = vpop.permute.xlu1 %1357  ;;  %v6573_v35 = vpop.permute.xlu0 %1355  ;;  %v1653_v34 = vsel %vm818_vm1, %v1650_v33, %v1652_v54 }
 0x1bf   : > { %9068 = vst [vmem:[#allocation165_spill] sm:$0xff] %v6571_v13  ;;  %9069 = vst [vmem:[#allocation166_spill] sm:$0xff] %v6573_v35  ;;  %v1660_v35 = vrot.slane %v6320_v0, 1  ;;  %v1659_v13 = vrot.slane %v6317_v2, 1 }
 0x1c0   : > { %1721 = vrot.lane.b32.xlu1 %v1648_v14, %s5252_s8  ;;  %1719 = vrot.lane.b32.xlu0 %v1646_v12, %s5252_s8 }
 0x1c2   : > { %v6580_v55 = vpop.permute.xlu1 %1361  ;;  %v6582_v60 = vpop.permute.xlu0 %1359 }
 0x1c3   : > { %9070 = vst [vmem:[#allocation167_spill] sm:$0xff] %v6580_v55  ;;  %9071 = vst [vmem:[#allocation168_spill] sm:$0xff] %v6582_v60  ;;  %v1655_v60 = vrot.slane %v6304_v48, 1  ;;  %v1654_v55 = vrot.slane %v6301_v49, 1 }
 0x1c4   : > { %1533 = vrot.lane.b32.xlu1 %v6288_v7, %s5251_s7  ;;  %1531 = vrot.lane.b32.xlu0 %v6285_v6, %s5251_s7  ;;  %v1657_v7 = vrot.slane %v4876_v19, 1  ;;  %v4879_v19 = vld [vmem:[%s5288_s17 + $0x100] sm:$0xff] }
 0x1c5   : > { %v1656_v33 = vsel %vm818_vm1, %v1654_v55, %v1655_v60 }
 0x1c6   : > { %v6590_v14 = vpop.permute.xlu1 %1413  ;;  %v6592_v12 = vpop.permute.xlu0 %1411  ;;  %v1658_v61 = vsel %vm818_vm1, %v1655_v60, %v1657_v7  ;;  %v1661_v60 = vsel %vm818_vm1, %v1659_v13, %v1660_v35 }
 0x1c8   : > { %1725 = vrot.lane.b32.xlu1 %v1653_v34, %s5252_s8  ;;  %1723 = vrot.lane.b32.xlu0 %v1651_v5, %s5252_s8 }
 0x1ca   : > { %v6599_v6 = vpop.permute.xlu1 %1417  ;;  %v6601_v54 = vpop.permute.xlu0 %1415 }
 0x1cc   : > { %1537 = vrot.lane.b32.xlu1 %v6304_v48, %s5251_s7  ;;  %1535 = vrot.lane.b32.xlu0 %v6301_v49, %s5251_s7  ;;  %v1662_v48 = vrot.slane %v4879_v19, 1  ;;  %v4882_v19 = vld [vmem:[%s5288_s17 + $0x118] sm:$0xff] }
 0x1ce   : > { %v6609_v34 = vpop.permute.xlu1 %1421  ;;  %v6611_v5 = vpop.permute.xlu0 %1419  ;;  %v1663_v55 = vsel %vm818_vm1, %v1660_v35, %v1662_v48  ;;  %v1666_v35 = vsel %vm818_vm1, %v1664_v42, %v1665_v41 }
 0x1d0   : > { %1729 = vrot.lane.b32.xlu1 %v1658_v61, %s5252_s8  ;;  %1727 = vrot.lane.b32.xlu0 %v1656_v33, %s5252_s8 }
 0x1d2   : > { %v6618_v49 = vpop.permute.xlu1 %1425  ;;  %v6620_v7 = vpop.permute.xlu0 %1423 }
 0x1d4   : > { %1541 = vrot.lane.b32.xlu1 %v6320_v0, %s5251_s7  ;;  %1539 = vrot.lane.b32.xlu0 %v6317_v2, %s5251_s7  ;;  %v1667_v0 = vrot.slane %v4882_v19, 1  ;;  %v4885_v19 = vld [vmem:[%s5288_s17 + $0x130] sm:$0xff] }
 0x1d6   : > { %v6628_v61 = vpop.permute.xlu1 %1429  ;;  %v6630_v33 = vpop.permute.xlu0 %1427  ;;  %v1668_v13 = vsel %vm818_vm1, %v1665_v41, %v1667_v0  ;;  %v1671_v41 = vsel %vm818_vm1, %v1669_v62, %v1670_v3 }
 0x1d8   : > { %1733 = vrot.lane.b32.xlu1 %v1663_v55, %s5252_s8  ;;  %1731 = vrot.lane.b32.xlu0 %v1661_v60, %s5252_s8 }
 0x1da   : > { %v6637_v2 = vpop.permute.xlu1 %1433  ;;  %v6639_v48 = vpop.permute.xlu0 %1431 }
 0x1dc   : > { %1545 = vrot.lane.b32.xlu1 %v6336_v9, %s5251_s7  ;;  %1543 = vrot.lane.b32.xlu0 %v6333_v8, %s5251_s7  ;;  %v1672_v9 = vrot.slane %v4885_v19, 1  ;;  %v4888_v19 = vld [vmem:[%s5288_s17 + $0x148] sm:$0xff] }
 0x1de   : > { %v6647_v55 = vpop.permute.xlu1 %1437  ;;  %v6649_v60 = vpop.permute.xlu0 %1435  ;;  %v1673_v42 = vsel %vm818_vm1, %v1670_v3, %v1672_v9  ;;  %v1676_v3 = vsel %vm818_vm1, %v1674_v46, %v1675_v16 }
 0x1e0   : > { %1737 = vrot.lane.b32.xlu1 %v1668_v13, %s5252_s8  ;;  %1735 = vrot.lane.b32.xlu0 %v1666_v35, %s5252_s8 }
 0x1e2   : > { %v6656_v8 = vpop.permute.xlu1 %1441  ;;  %v6658_v0 = vpop.permute.xlu0 %1439 }
 0x1e4   : > { %1549 = vrot.lane.b32.xlu1 %v6352_v24, %s5251_s7  ;;  %1547 = vrot.lane.b32.xlu0 %v6349_v23, %s5251_s7  ;;  %v1677_v24 = vrot.slane %v4888_v19, 1  ;;  %v4891_v19 = vld [vmem:[%s5288_s17 + $0x160] sm:$0xff] }
 0x1e6   : > { %v6666_v13 = vpop.permute.xlu1 %1445  ;;  %v6668_v35 = vpop.permute.xlu0 %1443  ;;  %v1678_v62 = vsel %vm818_vm1, %v1675_v16, %v1677_v24 }
 0x1e7   : > { %9072 = vst [vmem:[#allocation169_spill] sm:$0xff] %v6668_v35  ;;  %v9096_v35 = vld [vmem:[#allocation13_spill] sm:$0xff] }
 0x1e8   : > { %1741 = vrot.lane.b32.xlu1 %v1673_v42, %s5252_s8  ;;  %1739 = vrot.lane.b32.xlu0 %v1671_v41, %s5252_s8 }
 0x1ea   : > { %v6675_v23 = vpop.permute.xlu1 %1449  ;;  %v6677_v9 = vpop.permute.xlu0 %1447 }
 0x1eb   : > { %9073 = vst [vmem:[#allocation170_spill] sm:$0xff] %v6675_v23  ;;  %9074 = vst [vmem:[#allocation171_spill] sm:$0xff] %v6677_v9  ;;  %v1680_v9 = vrot.slane %v6384_v11, 1  ;;  %v1679_v23 = vrot.slane %v6381_v10, 1 }
 0x1ec   : > { %1553 = vrot.lane.b32.xlu1 %v6368_v40, %s5251_s7  ;;  %1551 = vrot.lane.b32.xlu0 %v6365_v63, %s5251_s7  ;;  %v1682_v40 = vrot.slane %v4891_v19, 1  ;;  %v4894_v19 = vld [vmem:[%s5288_s17 + $0x178] sm:$0xff] }
 0x1ed   : > { %v1681_v16 = vsel %vm818_vm1, %v1679_v23, %v1680_v9 }
 0x1ee   : > { %v6685_v42 = vpop.permute.xlu1 %1453  ;;  %v6687_v41 = vpop.permute.xlu0 %1451  ;;  %v1683_v46 = vsel %vm818_vm1, %v1680_v9, %v1682_v40 }
 0x1ef   : > { %9075 = vst [vmem:[#allocation172_spill] sm:$0xff] %v6685_v42  ;;  %9076 = vst [vmem:[#allocation173_spill] sm:$0xff] %v6687_v41  ;;  %v9094_v42 = vld [vmem:[#allocation10_spill] sm:$0xff] }
 0x1f0   : > { %1745 = vrot.lane.b32.xlu1 %v1678_v62, %s5252_s8  ;;  %1743 = vrot.lane.b32.xlu0 %v1676_v3, %s5252_s8 }
 0x1f2   : > { %v6694_v63 = vpop.permute.xlu1 %1457  ;;  %v6696_v24 = vpop.permute.xlu0 %1455 }
 0x1f3   : > { %9077 = vst [vmem:[#allocation174_spill] sm:$0xff] %v6694_v63  ;;  %9078 = vst [vmem:[#allocation175_spill] sm:$0xff] %v6696_v24  ;;  %v1685_v24 = vrot.slane %v6400_v36, 1 }
 0x1f4   : > { %1557 = vrot.lane.b32.xlu1 %v6384_v11, %s5251_s7  ;;  %1555 = vrot.lane.b32.xlu0 %v6381_v10, %s5251_s7  ;;  %v1687_v11 = vrot.slane %v4894_v19, 1  ;;  %v1684_v10 = vrot.slane %v6397_v4, 1 }
 0x1f6   : > { %v6704_v62 = vpop.permute.xlu1 %1461  ;;  %v6706_v3 = vpop.permute.xlu0 %1459  ;;  %v1688_v23 = vsel %vm818_vm1, %v1685_v24, %v1687_v11  ;;  %v1686_v9 = vsel %vm818_vm1, %v1684_v10, %v1685_v24  ;;  %v4900_v10 = vld [vmem:[%s5288_s17 + $0x1a8] sm:$0xff] }
 0x1f7   : > { %9079 = vst [vmem:[#allocation176_spill] sm:$0xff] %v6704_v62  ;;  %9080 = vst [vmem:[#allocation177_spill] sm:$0xff] %v6706_v3  ;;  %v9090_v3 = vld [vmem:[#allocation4_spill] sm:$0xff] }
 0x1f8   : > { %1749 = vrot.lane.b32.xlu1 %v1683_v46, %s5252_s8  ;;  %1747 = vrot.lane.b32.xlu0 %v1681_v16, %s5252_s8 }
 0x1fa   : > { %v6713_v63 = vpop.permute.xlu1 %1465  ;;  %v6715_v40 = vpop.permute.xlu0 %1463 }
 0x1fb   : > { %9081 = vst [vmem:[#allocation178_spill] sm:$0xff] %v6713_v63  ;;  %9082 = vst [vmem:[#allocation179_spill] sm:$0xff] %v6715_v40  ;;  %v9089_v63 = vld [vmem:[#allocation14_spill] sm:$0xff] }
 0x1fc   : > { %1561 = vrot.lane.b32.xlu1 %v6400_v36, %s5251_s7  ;;  %1559 = vrot.lane.b32.xlu0 %v6397_v4, %s5251_s7  ;;  %v5226_v36 = vld [vmem:[%s5288_s17 + $0x188] sm:$0xff]  ;;  %v5227_v4 = vld [vmem:[%s5288_s17 + $0x180] sm:$0xff] }
 0x1fe   : > { %v6723_v46 = vpop.permute.xlu1 %1469  ;;  %v6725_v16 = vpop.permute.xlu0 %1467 }
 0x1ff   : > { %9083 = vst [vmem:[#allocation180_spill] sm:$0xff] %v6723_v46  ;;  %9084 = vst [vmem:[#allocation181_spill] sm:$0xff] %v6725_v16  ;;  %v9087_v46 = vld [vmem:[#allocation3_spill] sm:$0xff] }
 0x200   : > { %1753 = vrot.lane.b32.xlu1 %v1688_v23, %s5252_s8  ;;  %1751 = vrot.lane.b32.xlu0 %v1686_v9, %s5252_s8  ;;  %v9088_v16 = vrot.slane %v9087_v46, 7  ;;  %v1695_v9 = vrot.slane %v6424_v53, 1  ;;  %v1796_v46 = vsel %vm171_vm3, %v9090_v3, %v9089_v63 }
 0x202   : > { %v6729_v19 = vpop.permute.xlu1 %1473  ;;  %v6731_v40 = vpop.permute.xlu0 %1471  ;;  %v368_v23 = vsel %vm287_vm0, 0.0, %v9088_v16  ;;  %v9091_v16 = vld [vmem:[#allocation11_spill] sm:$0xff] }
 0x203   : > { %9085 = vst [vmem:[#allocation182_spill] sm:$0xff] %v6729_v19  ;;  %9086 = vst [vmem:[#allocation183_spill] sm:$0xff] %v6731_v40  ;;  %v1795_v62 = vsel %vm171_vm3, %v368_v23, %v9091_v16  ;;  %v9095_v23 = vld [vmem:[#allocation21_spill] sm:$0xff] }
 0x204   : > { %1565 = vrot.lane.b32.xlu1 %v5226_v36, %s5251_s7  ;;  %1563 = vrot.lane.b32.xlu0 %v5227_v4, %s5251_s7  ;;  %v1697_v36 = vrot.slane %v4900_v10, 1  ;;  %v1694_v4 = vrot.slane %v6421_v58, 1  ;;  %v1797_v16 = vsel %vm171_vm3, %v9095_v23, %v9094_v42  ;;  %v9098_v42 = vld [vmem:[#allocation75_spill] sm:$0xff] }
 0x206   : > { %v1510_v11 = vpop.permute.xlu1 %1509  ;;  %v1508_v24 = vpop.permute.xlu0 %1507  ;;  %v1698_v63 = vsel %vm818_vm1, %v1695_v9, %v1697_v36  ;;  %v1696_v3 = vsel %vm818_vm1, %v1694_v4, %v1695_v9 }
 0x208   : > { %1757 = vrot.lane.b32.xlu1 %v6191_v43, %s5252_s8  ;;  %1755 = vrot.lane.b32.xlu0 %v6194_v51, %s5252_s8  ;;  %v9092_v43 = vld [vmem:[#allocation71_spill] sm:$0xff]  ;;  %v9093_v51 = vld [vmem:[#allocation72_spill] sm:$0xff] }
 0x209   : > { %v1829_v41 = vsel %vm1827_vm4, %v1796_v46, %v9092_v43  ;;  %v1828_v10 = vsel %vm1827_vm4, %v1795_v62, %v9093_v51  ;;  %v9097_v62 = vld [vmem:[#allocation22_spill] sm:$0xff] }
 0x20a   : > { %v1514_v40 = vpop.permute.xlu1 %1513  ;;  %v1512_v19 = vpop.permute.xlu0 %1511  ;;  %v1862_v46 = vsel %vm1860_vm5, %v1829_v41, %v6037_v25  ;;  %v1798_v51 = vsel %vm171_vm3, %v9097_v62, %v9096_v35  ;;  %v9099_v35 = vld [vmem:[#allocation76_spill] sm:$0xff]  ;;  %v9102_v62 = vld [vmem:[#allocation18_spill] sm:$0xff] }
 0x20b   : > { %v1895_v9 = vsel %vm1893_vm6, %v1862_v46, %v6165_v45  ;;  %v1831_v25 = vsel %vm1827_vm4, %v1798_v51, %v9098_v42  ;;  %v1830_v45 = vsel %vm1827_vm4, %v1797_v16, %v9099_v35 }
 0x20c   : > { %1569 = vrot.lane.b32.xlu1 %v6424_v53, %s5251_s7  ;;  %1567 = vrot.lane.b32.xlu0 %v6421_v58, %s5251_s7  ;;  %v1861_v53 = vsel %vm1860_vm5, %v1828_v10, %v6039_v26  ;;  %v1928_v26 = vsel %vm1926_vm7, %v1895_v9, %v6416_v52  ;;  %v1864_v52 = vsel %vm1860_vm5, %v1831_v25, %v6045_v27  ;;  %v9100_v27 = vld [vmem:[#allocation17_spill] sm:$0xff] }
 0x20d   : > { %v1894_v36 = vsel %vm1893_vm6, %v1861_v53, %v6167_v20  ;;  %v1961_v20 = vsel %vm1959_vm8, %v1928_v26, %v6590_v14  ;;  %v1897_v16 = vsel %vm1893_vm6, %v1864_v52, %v6176_v21  ;;  %v9101_v53 = vld [vmem:[#allocation25_spill] sm:$0xff] }
 0x20e   : > { %v1518_v58 = vpop.permute.xlu1 %1517  ;;  %v1516_v43 = vpop.permute.xlu0 %1515  ;;  %v1927_v41 = vsel %vm1926_vm7, %v1894_v36, %v6418_v18  ;;  %v1863_v18 = vsel %vm1860_vm5, %v1830_v45, %v6047_v28  ;;  %v1994_v10 = vsel %vm1992_vm9, %v1961_v20, %v1510_v11  ;;  %v1800_v28 = vsel %vm171_vm3, %v9101_v53, %v9100_v27  ;;  %v9103_v11 = vld [vmem:[#allocation26_spill] sm:$0xff]  ;;  %v9105_v52 = vld [vmem:[#allocation29_spill] sm:$0xff]  ;;  %v9111_v53 = vld [vmem:[#allocation12_spill] sm:$0xff] }
 0x20f   : > { %v1960_v4 = vsel %vm1959_vm8, %v1927_v41, %v6592_v12  ;;  %v1896_v14 = vsel %vm1893_vm6, %v1863_v18, %v6178_v44  ;;  %v1930_v51 = vsel %vm1926_vm7, %v1897_v16, %v6436_v37  ;;  %v1833_v44 = vsel %vm1827_vm4, %v1800_v28, %v5925_v39 }
 0x210   : > { %1761 = vrot.lane.b32.xlu1 %v1698_v63, %s5252_s8  ;;  %1759 = vrot.lane.b32.xlu0 %v1696_v3, %s5252_s8  ;;  %v1993_v63 = vsel %vm1992_vm9, %v1960_v4, %v1508_v24  ;;  %v1799_v24 = vsel %vm171_vm3, %v9103_v11, %v9102_v62  ;;  %v1929_v21 = vsel %vm1926_vm7, %v1896_v14, %v6438_v47  ;;  %v9104_v4 = vld [vmem:[#allocation19_spill] sm:$0xff] }
 0x211   : > { %v1832_v9 = vsel %vm1827_vm4, %v1799_v24, %v5927_v15  ;;  %v1963_v36 = vsel %vm1959_vm8, %v1930_v51, %v6599_v6  ;;  %v1962_v42 = vsel %vm1959_vm8, %v1929_v21, %v6601_v54  ;;  %v1866_v37 = vsel %vm1860_vm5, %v1833_v44, %v6053_v29 }
 0x212   : > { %v1702_v3 = vpop.permute.xlu1 %1701  ;;  %v1700_v23 = vpop.permute.xlu0 %1699  ;;  %v1865_v47 = vsel %vm1860_vm5, %v1832_v9, %v6055_v30  ;;  %v1996_v25 = vsel %vm1992_vm9, %v1963_v36, %v1514_v40  ;;  %v1995_v39 = vsel %vm1992_vm9, %v1962_v42, %v1512_v19  ;;  %v1899_v6 = vsel %vm1893_vm6, %v1866_v37, %v6198_v57 }
 0x213   : > { %v2027_v12 = vsel %vm2025_vm10, %v1994_v10, %v1702_v3  ;;  %v2026_v46 = vsel %vm2025_vm10, %v1993_v63, %v1700_v23  ;;  %v1898_v54 = vsel %vm1893_vm6, %v1865_v47, %v6200_v17  ;;  %v1932_v29 = vsel %vm1926_vm7, %v1899_v6, %v6452_v32  ;;  %v9107_v10 = vld [vmem:[#allocation30_spill] sm:$0xff]  ;;  %v9108_v63 = vld [vmem:[#allocation103_spill] sm:$0xff]  ;;  %v9109_v23 = vld [vmem:[#allocation104_spill] sm:$0xff] }
 0x214   : > { %5086 = vmatprep.mubr.msk.f32.mxu0 %vm2058_vm11, %v2026_v46  ;;  %v1931_v30 = vsel %vm1926_vm7, %v1898_v54, %v6454_v59  ;;  %v1965_v40 = vsel %vm1959_vm8, %v1932_v29, %v6609_v34  ;;  %v1802_v18 = vsel %vm171_vm3, %v9105_v52, %v9104_v4  ;;  %v9106_v34 = vld [vmem:[#allocation20_spill] sm:$0xff]  ;;  %v9110_v46 = vld [vmem:[#allocation9_spill] sm:$0xff]  ;;  %v9114_v47 = vld [vmem:[#allocation23_spill] sm:$0xff] }
 0x215   : > { %5087 = vmatmul.mubr.msk.f32.vlgmr.msra.gmra.mrb[0].mxu0 %vm2058_vm11, %v2027_v12  ;;  %v1964_v57 = vsel %vm1959_vm8, %v1931_v30, %v6611_v5  ;;  %v1998_v17 = vsel %vm1992_vm9, %v1965_v40, %v1518_v58  ;;  %v1801_v5 = vsel %vm171_vm3, %v9107_v10, %v9106_v34  ;;  %v1835_v58 = vsel %vm1827_vm4, %v1802_v18, %v5933_v1  ;;  %v9112_v1 = vld [vmem:[#allocation147_spill] sm:$0xff]  ;;  %v9119_v54 = vld [vmem:[#allocation80_spill] sm:$0xff]  ;;  %v9121_v30 = vld [vmem:[#allocation106_spill] sm:$0xff] }
 0x216   : > { %v1706_v26 = vpop.permute.xlu1 %1705  ;;  %v1704_v15 = vpop.permute.xlu0 %1703  ;;  %v1997_v19 = vsel %vm1992_vm9, %v1964_v57, %v1516_v43  ;;  %v1834_v43 = vsel %vm1827_vm4, %v1801_v5, %v5935_v38  ;;  %v1868_v3 = vsel %vm1860_vm5, %v1835_v58, %v9108_v63  ;;  %v9113_v38 = vld [vmem:[#allocation148_spill] sm:$0xff]  ;;  %v9125_v52 = vld [vmem:[#allocation150_spill] sm:$0xff] }
 0x217   : > { %v2029_v41 = vsel %vm2025_vm10, %v1996_v25, %v1706_v26  ;;  %v2028_v35 = vsel %vm2025_vm10, %v1995_v39, %v1704_v15  ;;  %v1867_v16 = vsel %vm1860_vm5, %v1834_v43, %v9109_v23  ;;  %v1901_v27 = vsel %vm1893_vm6, %v1868_v3, %v9110_v46  ;;  %v9115_v25 = vld [vmem:[#allocation33_spill] sm:$0xff]  ;;  %v9116_v26 = vld [vmem:[#allocation24_spill] sm:$0xff]  ;;  %v9117_v15 = vld [vmem:[#allocation34_spill] sm:$0xff] }
 0x218   : > { %5089 = vmatprep.mubr.msk.f32.mxu0 %vm2058_vm11, %v2028_v35  ;;  %v1900_v28 = vsel %vm1893_vm6, %v1867_v16, %v9111_v53  ;;  %v1934_v62 = vsel %vm1926_vm7, %v1901_v27, %v9112_v1  ;;  %v1804_v39 = vsel %vm171_vm3, %v9115_v25, %v9114_v47  ;;  %v9120_v35 = vld [vmem:[#allocation105_spill] sm:$0xff]  ;;  %v9126_v16 = vld [vmem:[#allocation27_spill] sm:$0xff]  ;;  %v9128_v46 = vld [vmem:[#allocation28_spill] sm:$0xff] }
 0x219   : > { %5090 = vmatmul.mubr.msk.f32.gmra.mrb[2].mxu0 %vm2058_vm11, %v2029_v41  ;;  %v1933_v11 = vsel %vm1926_vm7, %v1900_v28, %v9113_v38  ;;  %v1967_v24 = vsel %vm1959_vm8, %v1934_v62, %v6618_v49  ;;  %v1803_v49 = vsel %vm171_vm3, %v9117_v15, %v9116_v26  ;;  %v9129_v27 = vld [vmem:[#allocation38_spill] sm:$0xff]  ;;  %v9132_v62 = vld [vmem:[#allocation107_spill] sm:$0xff]  ;;  %v9137_v25 = vld [vmem:[#allocation152_spill] sm:$0xff] }
 0x21a   : > { %v1710_v45 = vpop.permute.xlu1 %1709  ;;  %v1708_v20 = vpop.permute.xlu0 %1707  ;;  %v1966_v51 = vsel %vm1959_vm8, %v1933_v11, %v6620_v7  ;;  %v9118_v7 = vld [vmem:[#allocation79_spill] sm:$0xff]  ;;  %v1836_v41 = vsel %vm1827_vm4, %v1803_v49, %v9119_v54  ;;  %v9131_v28 = vld [vmem:[#allocation82_spill] sm:$0xff]  ;;  %v9133_v11 = vld [vmem:[#allocation108_spill] sm:$0xff] }
 0x21b   : > { %v2031_v32 = vsel %vm2025_vm10, %v1998_v17, %v1710_v45  ;;  %v2030_v59 = vsel %vm2025_vm10, %v1997_v19, %v1708_v20  ;;  %v1837_v6 = vsel %vm1827_vm4, %v1804_v39, %v9118_v7  ;;  %v1869_v40 = vsel %vm1860_vm5, %v1836_v41, %v9121_v30  ;;  %v9122_v19 = vld [vmem:[#allocation15_spill] sm:$0xff]  ;;  %v9123_v20 = vld [vmem:[#allocation16_spill] sm:$0xff]  ;;  %v9139_v30 = vld [vmem:[#allocation41_spill] sm:$0xff] }
 0x21c   : > { %5092 = vmatprep.mubr.msk.f32.mxu0 %vm2058_vm11, %v2030_v59  ;;  %v1870_v29 = vsel %vm1860_vm5, %v1837_v6, %v9120_v35  ;;  %v9124_v59 = vld [vmem:[#allocation149_spill] sm:$0xff] }
 0x21d   : > { %5093 = vmatmul.mubr.msk.f32.gmra.mrb[4].mxu0 %vm2058_vm11, %v2031_v32  ;;  %v1903_v45 = vsel %vm1893_vm6, %v1870_v29, %v9122_v19  ;;  %v1902_v32 = vsel %vm1893_vm6, %v1869_v40, %v9123_v20  ;;  %v9138_v29 = vld [vmem:[#allocation31_spill] sm:$0xff] }
 0x21e   : > { %v1522_v14 = vpop.permute.xlu1 %1521  ;;  %v1520_v12 = vpop.permute.xlu0 %1519  ;;  %v1936_v4 = vsel %vm1926_vm7, %v1903_v45, %v9124_v59  ;;  %v1935_v18 = vsel %vm1926_vm7, %v1902_v32, %v9125_v52  ;;  %v1808_v40 = vsel %vm171_vm3, %v9139_v30, %v9138_v29  ;;  %v9143_v45 = vld [vmem:[#allocation84_spill] sm:$0xff]  ;;  %v9144_v32 = vld [vmem:[#allocation109_spill] sm:$0xff] }
 0x21f   : > { %v2000_v21 = vsel %vm1992_vm9, %v1967_v24, %v1522_v14  ;;  %v1999_v44 = vsel %vm1992_vm9, %v1966_v51, %v1520_v12  ;;  %v1969_v34 = vsel %vm1959_vm8, %v1936_v4, %v6628_v61  ;;  %v1968_v10 = vsel %vm1959_vm8, %v1935_v18, %v6630_v33  ;;  %v9127_v14 = vld [vmem:[#allocation37_spill] sm:$0xff]  ;;  %v9145_v4 = vld [vmem:[#allocation110_spill] sm:$0xff] }
 0x220   : > { %v1806_v12 = vsel %vm171_vm3, %v9127_v14, %v9126_v16  ;;  %v1805_v61 = vsel %vm171_vm3, %v9129_v27, %v9128_v46  ;;  %v9130_v33 = vld [vmem:[#allocation81_spill] sm:$0xff] }
 0x221   : > { %v1839_v53 = vsel %vm1827_vm4, %v1806_v12, %v9130_v33  ;;  %v1838_v1 = vsel %vm1827_vm4, %v1805_v61, %v9131_v28  ;;  %v9149_v28 = vld [vmem:[#allocation35_spill] sm:$0xff] }
 0x222   : > { %v1714_v9 = vpop.permute.xlu1 %1713  ;;  %v1712_v36 = vpop.permute.xlu0 %1711  ;;  %v1872_v38 = vsel %vm1860_vm5, %v1839_v53, %v9132_v62  ;;  %v1871_v24 = vsel %vm1860_vm5, %v1838_v1, %v9133_v11  ;;  %v9150_v1 = vld [vmem:[#allocation45_spill] sm:$0xff]  ;;  %v9151_v62 = vld [vmem:[#allocation36_spill] sm:$0xff] }
 0x223   : > { %v2033_v42 = vsel %vm2025_vm10, %v2000_v21, %v1714_v9  ;;  %v2032_v37 = vsel %vm2025_vm10, %v1999_v44, %v1712_v36  ;;  %v9134_v44 = vld [vmem:[#allocation125_spill] sm:$0xff]  ;;  %v9135_v36 = vld [vmem:[#allocation126_spill] sm:$0xff] }
 0x224   : > { %5095 = vmatprep.mubr.msk.f32.mxu0 %vm2058_vm11, %v2032_v37  ;;  %v1905_v9 = vsel %vm1893_vm6, %v1872_v38, %v9134_v44  ;;  %v9136_v37 = vld [vmem:[#allocation151_spill] sm:$0xff]  ;;  %v9152_v38 = vld [vmem:[#allocation46_spill] sm:$0xff] }
 0x225   : > { %5096 = vmatmul.mubr.msk.f32.gmra.mrb[6].mxu0 %vm2058_vm11, %v2033_v42  ;;  %v1904_v42 = vsel %vm1893_vm6, %v1871_v24, %v9135_v36  ;;  %v1938_v47 = vsel %vm1926_vm7, %v1905_v9, %v9136_v37  ;;  %v9154_v24 = vld [vmem:[#allocation86_spill] sm:$0xff]  ;;  %v9156_v9 = vld [vmem:[#allocation112_spill] sm:$0xff] }
 0x226   : > { %v1526_v57 = vpop.permute.xlu1 %1525  ;;  %v1524_v17 = vpop.permute.xlu0 %1523  ;;  %v1937_v39 = vsel %vm1926_vm7, %v1904_v42, %v9137_v25  ;;  %v1971_v26 = vsel %vm1959_vm8, %v1938_v47, %v6637_v2  ;;  %v9157_v47 = vld [vmem:[#allocation129_spill] sm:$0xff] }
 0x227   : > { %v2002_v5 = vsel %vm1992_vm9, %v1969_v34, %v1526_v57  ;;  %v2001_v58 = vsel %vm1992_vm9, %v1968_v10, %v1524_v17  ;;  %v1970_v15 = vsel %vm1959_vm8, %v1937_v39, %v6639_v48  ;;  %v9140_v57 = vld [vmem:[#allocation32_spill] sm:$0xff]  ;;  %v9141_v17 = vld [vmem:[#allocation42_spill] sm:$0xff]  ;;  %v9142_v48 = vld [vmem:[#allocation83_spill] sm:$0xff] }
 0x228   : > { %v1807_v2 = vsel %vm171_vm3, %v9141_v17, %v9140_v57  ;;  %v1841_v19 = vsel %vm1827_vm4, %v1808_v40, %v9142_v48  ;;  %v9146_v10 = vld [vmem:[#allocation127_spill] sm:$0xff]  ;;  %v9158_v39 = vld [vmem:[#allocation130_spill] sm:$0xff]  ;;  %v9160_v57 = vld [vmem:[#allocation49_spill] sm:$0xff] }
 0x229   : > { %v1840_v20 = vsel %vm1827_vm4, %v1807_v2, %v9143_v45  ;;  %v1874_v59 = vsel %vm1860_vm5, %v1841_v19, %v9144_v32  ;;  %v9161_v17 = vld [vmem:[#allocation40_spill] sm:$0xff]  ;;  %v9162_v2 = vld [vmem:[#allocation50_spill] sm:$0xff] }
 0x22a   : > { %v1718_v43 = vpop.permute.xlu1 %1717  ;;  %v1716_v63 = vpop.permute.xlu0 %1715  ;;  %v1873_v52 = vsel %vm1860_vm5, %v1840_v20, %v9145_v4  ;;  %v9164_v19 = vld [vmem:[#allocation88_spill] sm:$0xff]  ;;  %v9165_v20 = vld [vmem:[#allocation113_spill] sm:$0xff] }
 0x22b   : > { %v2035_v3 = vsel %vm2025_vm10, %v2002_v5, %v1718_v43  ;;  %v2034_v23 = vsel %vm2025_vm10, %v2001_v58, %v1716_v63  ;;  %v1907_v5 = vsel %vm1893_vm6, %v1874_v59, %v9146_v10  ;;  %v9147_v58 = vld [vmem:[#allocation128_spill] sm:$0xff]  ;;  %v9148_v63 = vld [vmem:[#allocation153_spill] sm:$0xff]  ;;  %v9166_v59 = vld [vmem:[#allocation114_spill] sm:$0xff] }
 0x22c   : > { %5098 = vmatprep.mubr.msk.f32.mxu0 %vm2058_vm11, %v2034_v23  ;;  %v1906_v43 = vsel %vm1893_vm6, %v1873_v52, %v9147_v58 }
 0x22d   : > { %5099 = vmatmul.mubr.msk.f32.gmra.mrb[8].mxu0 %vm2058_vm11, %v2035_v3  ;;  %v1940_v3 = vsel %vm1926_vm7, %v1907_v5, %v9148_v63  ;;  %v1939_v23 = vsel %vm1926_vm7, %v1906_v43, %v6497_v31  ;;  %v1810_v31 = vsel %vm171_vm3, %v9150_v1, %v9149_v28  ;;  %v9168_v5 = vld [vmem:[#allocation132_spill] sm:$0xff]  ;;  %v9169_v63 = vld [vmem:[#allocation154_spill] sm:$0xff]  ;;  %v9172_v28 = vld [vmem:[#allocation53_spill] sm:$0xff] }
 0x22e   : > { %v1530_v51 = vpop.permute.xlu1 %1529  ;;  %v1528_v21 = vpop.permute.xlu0 %1527  ;;  %v1973_v16 = vsel %vm1959_vm8, %v1940_v3, %v6647_v55  ;;  %v1972_v14 = vsel %vm1959_vm8, %v1939_v23, %v6649_v60  ;;  %v1809_v55 = vsel %vm171_vm3, %v9152_v38, %v9151_v62  ;;  %v9153_v60 = vld [vmem:[#allocation85_spill] sm:$0xff]  ;;  %v9174_v62 = vld [vmem:[#allocation54_spill] sm:$0xff] }
 0x22f   : > { %v2004_v49 = vsel %vm1992_vm9, %v1971_v26, %v1530_v51  ;;  %v2003_v7 = vsel %vm1992_vm9, %v1970_v15, %v1528_v21  ;;  %v1843_v11 = vsel %vm1827_vm4, %v1810_v31, %v9153_v60  ;;  %v1842_v51 = vsel %vm1827_vm4, %v1809_v55, %v9154_v24  ;;  %v9155_v21 = vld [vmem:[#allocation111_spill] sm:$0xff]  ;;  %v9173_v31 = vld [vmem:[#allocation44_spill] sm:$0xff]  ;;  %v9175_v38 = vld [vmem:[#allocation89_spill] sm:$0xff] }
 0x230   : > { %v1876_v44 = vsel %vm1860_vm5, %v1843_v11, %v9155_v21  ;;  %v1875_v36 = vsel %vm1860_vm5, %v1842_v51, %v9156_v9  ;;  %v9176_v60 = vld [vmem:[#allocation90_spill] sm:$0xff]  ;;  %v9177_v24 = vld [vmem:[#allocation115_spill] sm:$0xff]  ;;  %v9178_v21 = vld [vmem:[#allocation116_spill] sm:$0xff] }
 0x231   : > { %v1909_v25 = vsel %vm1893_vm6, %v1876_v44, %v9157_v47  ;;  %v1908_v26 = vsel %vm1893_vm6, %v1875_v36, %v9158_v39  ;;  %v9180_v47 = vld [vmem:[#allocation134_spill] sm:$0xff]  ;;  %v9181_v39 = vld [vmem:[#allocation155_spill] sm:$0xff] }
 0x232   : > { %v1722_v6 = vpop.permute.xlu1 %1721  ;;  %v1720_v54 = vpop.permute.xlu0 %1719  ;;  %v1942_v15 = vsel %vm1926_vm7, %v1909_v25, %v6506_v22  ;;  %v9159_v22 = vld [vmem:[#allocation39_spill] sm:$0xff] }
 0x233   : > { %v2037_v41 = vsel %vm2025_vm10, %v2004_v49, %v1722_v6  ;;  %v2036_v35 = vsel %vm2025_vm10, %v2003_v7, %v1720_v54  ;;  %v1941_v49 = vsel %vm1926_vm7, %v1908_v26, %v6508_v56  ;;  %v1975_v7 = vsel %vm1959_vm8, %v1942_v15, %v6656_v8  ;;  %v9182_v15 = vld [vmem:[#allocation156_spill] sm:$0xff] }
 0x234   : > { %5101 = vmatprep.mubr.msk.f32.mxu0 %vm2058_vm11, %v2036_v35  ;;  %v1974_v6 = vsel %vm1959_vm8, %v1941_v49, %v6658_v0  ;;  %v1812_v56 = vsel %vm171_vm3, %v9160_v57, %v9159_v22  ;;  %v1811_v8 = vsel %vm171_vm3, %v9162_v2, %v9161_v17  ;;  %v9163_v0 = vld [vmem:[#allocation87_spill] sm:$0xff]  ;;  %v9186_v17 = vld [vmem:[#allocation57_spill] sm:$0xff] }
 0x235   : > { %5102 = vmatmul.mubr.msk.f32.gmra.mrb[10].mxu0 %vm2058_vm11, %v2037_v41  ;;  %v1845_v48 = vsel %vm1827_vm4, %v1812_v56, %v9163_v0  ;;  %v1844_v45 = vsel %vm1827_vm4, %v1811_v8, %v9164_v19  ;;  %v9185_v56 = vld [vmem:[#allocation47_spill] sm:$0xff]  ;;  %v9187_v8 = vld [vmem:[#allocation48_spill] sm:$0xff]  ;;  %v9188_v0 = vld [vmem:[#allocation58_spill] sm:$0xff] }
 0x236   : > { %v1534_v18 = vpop.permute.xlu1 %1533  ;;  %v1532_v34 = vpop.permute.xlu0 %1531  ;;  %v1878_v32 = vsel %vm1860_vm5, %v1845_v48, %v9165_v20  ;;  %v1877_v4 = vsel %vm1860_vm5, %v1844_v45, %v9166_v59  ;;  %v1816_v2 = vsel %vm171_vm3, %v9186_v17, %v9185_v56  ;;  %v1815_v48 = vsel %vm171_vm3, %v9188_v0, %v9187_v8  ;;  %v9189_v19 = vld [vmem:[#allocation91_spill] sm:$0xff]  ;;  %v9190_v20 = vld [vmem:[#allocation92_spill] sm:$0xff]  ;;  %v9191_v59 = vld [vmem:[#allocation117_spill] sm:$0xff] }
 0x237   : > { %v2006_v12 = vsel %vm1992_vm9, %v1973_v16, %v1534_v18  ;;  %v2005_v46 = vsel %vm1992_vm9, %v1972_v14, %v1532_v34  ;;  %v9167_v34 = vld [vmem:[#allocation131_spill] sm:$0xff]  ;;  %v1910_v58 = vsel %vm1893_vm6, %v1877_v4, %v9168_v5  ;;  %v9170_v16 = vld [vmem:[#allocation169_spill] sm:$0xff]  ;;  %v1849_v45 = vsel %vm1827_vm4, %v1816_v2, %v9189_v19 }
 0x238   : > { %v1911_v10 = vsel %vm1893_vm6, %v1878_v32, %v9167_v34  ;;  %v1943_v3 = vsel %vm1926_vm7, %v1910_v58, %v9169_v63  ;;  %v1848_v32 = vsel %vm1827_vm4, %v1815_v48, %v9190_v20  ;;  %v1882_v4 = vsel %vm1860_vm5, %v1849_v45, %v9191_v59  ;;  %v9193_v5 = vld [vmem:[#allocation135_spill] sm:$0xff]  ;;  %v9214_v48 = vld [vmem:[#allocation65_spill] sm:$0xff]  ;;  %v9215_v45 = vld [vmem:[#allocation56_spill] sm:$0xff] }
 0x239   : > { %v1944_v43 = vsel %vm1926_vm7, %v1911_v10, %v6514_v50  ;;  %v1976_v14 = vsel %vm1959_vm8, %v1943_v3, %v9170_v16  ;;  %v9171_v50 = vld [vmem:[#allocation43_spill] sm:$0xff]  ;;  %v1915_v58 = vsel %vm1893_vm6, %v1882_v4, %v9193_v5  ;;  %v9195_v3 = vld [vmem:[#allocation157_spill] sm:$0xff]  ;;  %v9196_v16 = vld [vmem:[#allocation158_spill] sm:$0xff] }
 0x23a   : > { %v1726_v27 = vpop.permute.xlu1 %1725  ;;  %v1724_v61 = vpop.permute.xlu0 %1723  ;;  %v1977_v23 = vsel %vm1959_vm8, %v1944_v43, %v6666_v13  ;;  %v1814_v1 = vsel %vm171_vm3, %v9172_v28, %v9171_v50  ;;  %v1813_v13 = vsel %vm171_vm3, %v9174_v62, %v9173_v31  ;;  %v9194_v43 = vld [vmem:[#allocation136_spill] sm:$0xff]  ;;  %v9199_v62 = vld [vmem:[#allocation51_spill] sm:$0xff]  ;;  %v9216_v20 = vld [vmem:[#allocation66_spill] sm:$0xff] }
 0x23b   : > { %v2039_v33 = vsel %vm2025_vm10, %v2006_v12, %v1726_v27  ;;  %v2038_v53 = vsel %vm2025_vm10, %v2005_v46, %v1724_v61  ;;  %v1847_v55 = vsel %vm1827_vm4, %v1814_v1, %v9175_v38  ;;  %v1846_v11 = vsel %vm1827_vm4, %v1813_v13, %v9176_v60  ;;  %v9200_v13 = vld [vmem:[#allocation61_spill] sm:$0xff]  ;;  %v9202_v60 = vld [vmem:[#allocation62_spill] sm:$0xff]  ;;  %v9213_v0 = vld [vmem:[#allocation55_spill] sm:$0xff] }
 0x23c   : > { %5104 = vmatprep.mubr.msk.f32.mxu0 %vm2058_vm11, %v2038_v53  ;;  %v1880_v51 = vsel %vm1860_vm5, %v1847_v55, %v9177_v24  ;;  %v1879_v44 = vsel %vm1860_vm5, %v1846_v11, %v9178_v21  ;;  %v1818_v38 = vsel %vm171_vm3, %v9200_v13, %v9199_v62  ;;  %v9201_v55 = vld [vmem:[#allocation52_spill] sm:$0xff]  ;;  %v9203_v24 = vld [vmem:[#allocation93_spill] sm:$0xff]  ;;  %v9204_v21 = vld [vmem:[#allocation94_spill] sm:$0xff]  ;;  %v1820_v19 = vsel %vm171_vm3, %v9214_v48, %v9213_v0 }
 0x23d   : > { %5105 = vmatmul.mubr.msk.f32.gmra.mrb[12].mxu0 %vm2058_vm11, %v2039_v33  ;;  %v1912_v25 = vsel %vm1893_vm6, %v1879_v44, %v9180_v47  ;;  %v1817_v11 = vsel %vm171_vm3, %v9202_v60, %v9201_v55  ;;  %v9217_v59 = vld [vmem:[#allocation95_spill] sm:$0xff]  ;;  %v9220_v5 = vld [vmem:[#allocation122_spill] sm:$0xff] }
 0x23e   : > { %v1538_v42 = vpop.permute.xlu1 %1537  ;;  %v1536_v37 = vpop.permute.xlu0 %1535  ;;  %v1945_v49 = vsel %vm1926_vm7, %v1912_v25, %v9182_v15  ;;  %v1850_v44 = vsel %vm1827_vm4, %v1817_v11, %v9204_v21  ;;  %v9208_v15 = vld [vmem:[#allocation138_spill] sm:$0xff]  ;;  %v1853_v4 = vsel %vm1827_vm4, %v1820_v19, %v9217_v59  ;;  %v9227_v11 = vld [vmem:[#allocation59_spill] sm:$0xff]  ;;  %v9229_v21 = vld [vmem:[#allocation60_spill] sm:$0xff] }
 0x23f   : > { %v2008_v54 = vsel %vm1992_vm9, %v1975_v7, %v1538_v42  ;;  %v2007_v41 = vsel %vm1992_vm9, %v1974_v6, %v1536_v37  ;;  %v9179_v42 = vld [vmem:[#allocation133_spill] sm:$0xff]  ;;  %v9183_v7 = vld [vmem:[#allocation170_spill] sm:$0xff] }
 0x240   : > { %v1913_v37 = vsel %vm1893_vm6, %v1880_v51, %v9179_v42  ;;  %v1851_v51 = vsel %vm1827_vm4, %v1818_v38, %v9203_v24  ;;  %v9206_v42 = vld [vmem:[#allocation120_spill] sm:$0xff]  ;;  %v9228_v24 = vld [vmem:[#allocation69_spill] sm:$0xff] }
 0x241   : > { %v1946_v26 = vsel %vm1926_vm7, %v1913_v37, %v9181_v39  ;;  %v1883_v37 = vsel %vm1860_vm5, %v1850_v44, %v9206_v42  ;;  %v9207_v39 = vld [vmem:[#allocation137_spill] sm:$0xff]  ;;  %v9230_v44 = vld [vmem:[#allocation70_spill] sm:$0xff] }
 0x242   : > { %v1730_v35 = vpop.permute.xlu1 %1729  ;;  %v1728_v29 = vpop.permute.xlu0 %1727  ;;  %v1979_v6 = vsel %vm1959_vm8, %v1946_v26, %v9183_v7  ;;  %v9209_v7 = vld [vmem:[#allocation159_spill] sm:$0xff] }
 0x243   : > { %v2041_v30 = vsel %vm2025_vm10, %v2008_v54, %v1730_v35  ;;  %v2040_v40 = vsel %vm2025_vm10, %v2007_v41, %v1728_v29  ;;  %v9184_v54 = vld [vmem:[#allocation171_spill] sm:$0xff] }
 0x244   : > { %5107 = vmatprep.mubr.msk.f32.mxu0 %vm2058_vm11, %v2040_v40  ;;  %v1978_v41 = vsel %vm1959_vm8, %v1945_v49, %v9184_v54  ;;  %v1916_v49 = vsel %vm1893_vm6, %v1883_v37, %v9208_v15  ;;  %v9210_v54 = vld [vmem:[#allocation160_spill] sm:$0xff]  ;;  %v9232_v37 = vld [vmem:[#allocation98_spill] sm:$0xff] }
 0x245   : > { %5108 = vmatmul.mubr.msk.f32.gmra.mrb[14].mxu0 %vm2058_vm11, %v2041_v30 }
 0x246   : > { %v1542_v52 = vpop.permute.xlu1 %1541  ;;  %v1540_v18 = vpop.permute.xlu0 %1539 }
 0x247   : > { %v2010_v12 = vsel %vm1992_vm9, %v1977_v23, %v1542_v52  ;;  %v2009_v46 = vsel %vm1992_vm9, %v1976_v14, %v1540_v18  ;;  %v9192_v52 = vld [vmem:[#allocation118_spill] sm:$0xff]  ;;  %v1948_v23 = vsel %vm1926_vm7, %v1915_v58, %v9195_v3  ;;  %v9221_v3 = vld [vmem:[#allocation139_spill] sm:$0xff] }
 0x248   : > { %v1881_v18 = vsel %vm1860_vm5, %v1848_v32, %v9192_v52  ;;  %v1819_v32 = vsel %vm171_vm3, %v9216_v20, %v9215_v45  ;;  %v9218_v52 = vld [vmem:[#allocation96_spill] sm:$0xff] }
 0x249   : > { %v1914_v63 = vsel %vm1893_vm6, %v1881_v18, %v9194_v43  ;;  %v1852_v18 = vsel %vm1827_vm4, %v1819_v32, %v9218_v52  ;;  %v9242_v52 = vld [vmem:[#allocation73_spill] sm:$0xff] }
 0x24a   : > { %v1734_v27 = vpop.permute.xlu1 %1733  ;;  %v1732_v61 = vpop.permute.xlu0 %1731  ;;  %v1947_v14 = vsel %vm1926_vm7, %v1914_v63, %v9196_v16  ;;  %v1885_v58 = vsel %vm1860_vm5, %v1852_v18, %v9220_v5  ;;  %v9222_v16 = vld [vmem:[#allocation140_spill] sm:$0xff] }
 0x24b   : > { %v2043_v33 = vsel %vm2025_vm10, %v2010_v12, %v1734_v27  ;;  %v2042_v53 = vsel %vm2025_vm10, %v2009_v46, %v1732_v61  ;;  %v9197_v12 = vld [vmem:[#allocation172_spill] sm:$0xff]  ;;  %v9198_v27 = vld [vmem:[#allocation173_spill] sm:$0xff] }
 0x24c   : > { %5110 = vmatprep.mubr.msk.f32.mxu0 %vm2058_vm11, %v2042_v53  ;;  %v1981_v46 = vsel %vm1959_vm8, %v1948_v23, %v9197_v12  ;;  %v1980_v61 = vsel %vm1959_vm8, %v1947_v14, %v9198_v27  ;;  %v1918_v14 = vsel %vm1893_vm6, %v1885_v58, %v9222_v16  ;;  %v5253_v12 = vmov 0.0   ;;  %v9245_v58 = vld [vmem:[#allocation99_spill] sm:$0xff] }
 0x24d   : > { %5111 = vmatmul.mubr.msk.f32.gmra.mrb[16].mxu0 %vm2058_vm11, %v2043_v33  ;;  %173 = vst.msk [vmem:[#allocation2 + $0x8] sm:$0xff] %vm171_vm3, %v5253_v12  ;;  %172 = vst.msk [vmem:[#allocation2] sm:$0xff] %vm171_vm3, %v5253_v12 }
 0x24e   : > { %v1546_v9 = vpop.permute.xlu1 %1545  ;;  %v1544_v36 = vpop.permute.xlu0 %1543  ;;  %174 = vst.msk [vmem:[#allocation2 + $0x10] sm:$0xff] %vm171_vm3, %v5253_v12  ;;  %176 = vst.msk [vmem:[#allocation2 + $0x198] sm:$0xff] %vm171_vm3, %v5253_v12 }
 0x24f   : > { %v2012_v35 = vsel %vm1992_vm9, %v1979_v6, %v1546_v9  ;;  %v2011_v29 = vsel %vm1992_vm9, %v1978_v41, %v1544_v36  ;;  %v9205_v9 = vld [vmem:[#allocation119_spill] sm:$0xff]  ;;  %v1949_v41 = vsel %vm1926_vm7, %v1916_v49, %v9210_v54  ;;  %177 = vst.msk [vmem:[#allocation2 + $0x1a0] sm:$0xff] %vm171_vm3, %v5253_v12  ;;  %178 = vst.msk [vmem:[#allocation2 + $0x1a8] sm:$0xff] %vm171_vm3, %v5253_v12  ;;  %v9235_v54 = vld [vmem:[#allocation141_spill] sm:$0xff] }
 0x250   : > { %v1884_v36 = vsel %vm1860_vm5, %v1851_v51, %v9205_v9  ;;  %180 = vst.msk [vmem:[#allocation2 + $0x28] sm:$0xff] %vm171_vm3, %v5253_v12  ;;  %181 = vst.msk [vmem:[#allocation2 + $0x40] sm:$0xff] %vm171_vm3, %v5253_v12  ;;  %v1822_v51 = vsel %vm171_vm3, %v9228_v24, %v9227_v11  ;;  %v1821_v9 = vsel %vm171_vm3, %v9230_v44, %v9229_v21 }
 0x251   : > { %v1917_v26 = vsel %vm1893_vm6, %v1884_v36, %v9207_v39  ;;  %182 = vst.msk [vmem:[#allocation2 + $0x58] sm:$0xff] %vm171_vm3, %v5253_v12  ;;  %183 = vst.msk [vmem:[#allocation2 + $0x70] sm:$0xff] %vm171_vm3, %v5253_v12  ;;  %v9231_v36 = vld [vmem:[#allocation97_spill] sm:$0xff] }
 0x252   : > { %v1738_v30 = vpop.permute.xlu1 %1737  ;;  %v1736_v40 = vpop.permute.xlu0 %1735  ;;  %v1950_v6 = vsel %vm1926_vm7, %v1917_v26, %v9209_v7  ;;  %184 = vst.msk [vmem:[#allocation2 + $0x88] sm:$0xff] %vm171_vm3, %v5253_v12  ;;  %185 = vst.msk [vmem:[#allocation2 + $0xa0] sm:$0xff] %vm171_vm3, %v5253_v12  ;;  %v1855_v42 = vsel %vm1827_vm4, %v1822_v51, %v9231_v36  ;;  %v9234_v26 = vld [vmem:[#allocation123_spill] sm:$0xff] }
 0x253   : > { %v2045_v22 = vsel %vm2025_vm10, %v2012_v35, %v1738_v30  ;;  %v2044_v57 = vsel %vm2025_vm10, %v2011_v29, %v1736_v40  ;;  %v9211_v35 = vld [vmem:[#allocation174_spill] sm:$0xff]  ;;  %v9212_v30 = vld [vmem:[#allocation175_spill] sm:$0xff]  ;;  %186 = vst.msk [vmem:[#allocation2 + $0xb8] sm:$0xff] %vm171_vm3, %v5253_v12  ;;  %187 = vst.msk [vmem:[#allocation2 + $0xd0] sm:$0xff] %vm171_vm3, %v5253_v12 }
 0x254   : > { %5113 = vmatprep.mubr.msk.f32.mxu0 %vm2058_vm11, %v2044_v57  ;;  %v1983_v29 = vsel %vm1959_vm8, %v1950_v6, %v9211_v35  ;;  %v1982_v40 = vsel %vm1959_vm8, %v1949_v41, %v9212_v30  ;;  %188 = vst.msk [vmem:[#allocation2 + $0xe8] sm:$0xff] %vm171_vm3, %v5253_v12  ;;  %189 = vst.msk [vmem:[#allocation2 + $0x100] sm:$0xff] %vm171_vm3, %v5253_v12  ;;  %v7208_v6 = vld [vmem:[#allocation2 + $0x8] sm:$0xff]  ;;  %v7216_v30 = vld [vmem:[#allocation2] sm:$0xff] }
 0x255   : > { %5114 = vmatmul.mubr.msk.f32.gmra.mrb[18].mxu0 %vm2058_vm11, %v2045_v22  ;;  %190 = vst.msk [vmem:[#allocation2 + $0x118] sm:$0xff] %vm171_vm3, %v5253_v12  ;;  %191 = vst.msk [vmem:[#allocation2 + $0x130] sm:$0xff] %vm171_vm3, %v5253_v12  ;;  %v9236_v35 = vld [vmem:[#allocation142_spill] sm:$0xff]  ;;  %2948 = vrot.lane.b32.xlu1 %v7208_v6, %s5245_s18  ;;  %v9255_v36 = vld [vmem:[#allocation67_spill] sm:$0xff] }
 0x256   : > { %v1550_v34 = vpop.permute.xlu1 %1549  ;;  %v1548_v10 = vpop.permute.xlu0 %1547  ;;  %192 = vst.msk [vmem:[#allocation2 + $0x148] sm:$0xff] %vm171_vm3, %v5253_v12  ;;  %193 = vst.msk [vmem:[#allocation2 + $0x160] sm:$0xff] %vm171_vm3, %v5253_v12  ;;  %2946 = vrot.lane.b32.xlu0 %v7216_v30, %s5245_s18 }
 0x257   : > { %v2014_v33 = vsel %vm1992_vm9, %v1981_v46, %v1550_v34  ;;  %v2013_v53 = vsel %vm1992_vm9, %v1980_v61, %v1548_v10  ;;  %v9219_v34 = vld [vmem:[#allocation121_spill] sm:$0xff]  ;;  %194 = vst.msk [vmem:[#allocation2 + $0x178] sm:$0xff] %vm171_vm3, %v5253_v12  ;;  %195 = vst.msk [vmem:[#allocation2 + $0x190] sm:$0xff] %vm171_vm3, %v5253_v12  ;;  %v9224_v61 = vld [vmem:[#allocation162_spill] sm:$0xff] }
 0x258   : > { %v1886_v10 = vsel %vm1860_vm5, %v1853_v4, %v9219_v34  ;;  %v9223_v46 = vld [vmem:[#allocation161_spill] sm:$0xff]  ;;  %179 = vst.msk [vmem:[#allocation2 + $0x10] sm:$0xff] %vm171_vm3, %v5253_v12  ;;  %196 = vst.msk [vmem:[#allocation2 + $0x1a8] sm:$0xff] %vm171_vm3, %v5253_v12  ;;  %v9241_v4 = vld [vmem:[#allocation63_spill] sm:$0xff] }
 0x259   : > { %v1919_v23 = vsel %vm1893_vm6, %v1886_v10, %v9221_v3  ;;  %v1824_v18 = vsel %vm171_vm3, %v9242_v52, %v9241_v4  ;;  %v9243_v34 = vld [vmem:[#allocation64_spill] sm:$0xff]  ;;  %v9244_v10 = vld [vmem:[#allocation74_spill] sm:$0xff] }
 0x25a   : > { %v1742_v50 = vpop.permute.xlu1 %1741  ;;  %v1740_v28 = vpop.permute.xlu0 %1739  ;;  %v1952_v27 = vsel %vm1926_vm7, %v1919_v23, %v9223_v46  ;;  %v1823_v5 = vsel %vm171_vm3, %v9244_v10, %v9243_v34  ;;  %v9247_v23 = vld [vmem:[#allocation6_spill] sm:$0xff] }
 0x25b   : > { %v2047_v1 = vsel %vm2025_vm10, %v2014_v33, %v1742_v50  ;;  %v2046_v31 = vsel %vm2025_vm10, %v2013_v53, %v1740_v28  ;;  %v1951_v33 = vsel %vm1926_vm7, %v1918_v14, %v9224_v61  ;;  %v9225_v53 = vld [vmem:[#allocation176_spill] sm:$0xff]  ;;  %v9226_v28 = vld [vmem:[#allocation177_spill] sm:$0xff]  ;;  %v9248_v14 = vld [vmem:[#allocation7_spill] sm:$0xff] }
 0x25c   : > { %5116 = vmatprep.mubr.msk.f32.mxu0 %vm2058_vm11, %v2046_v31  ;;  %v1985_v50 = vsel %vm1959_vm8, %v1952_v27, %v9225_v53  ;;  %v9249_v61 = vld [vmem:[#allocation143_spill] sm:$0xff]  ;;  %v9250_v53 = vld [vmem:[#allocation144_spill] sm:$0xff] }
 0x25d   : > { %5117 = vmatmul.mubr.msk.f32.gmra.mrb[20].mxu0 %vm2058_vm11, %v2047_v1  ;;  %v1984_v1 = vsel %vm1959_vm8, %v1951_v33, %v9226_v28  ;;  %v9251_v28 = vld [vmem:[#allocation165_spill] sm:$0xff] }
 0x25e   : > { %v1554_v47 = vpop.permute.xlu1 %1553  ;;  %v1552_v25 = vpop.permute.xlu0 %1551 }
 0x25f   : > { %v2016_v22 = vsel %vm1992_vm9, %v1983_v29, %v1554_v47  ;;  %v2015_v57 = vsel %vm1992_vm9, %v1982_v40, %v1552_v25  ;;  %v1854_v47 = vsel %vm1827_vm4, %v1821_v9, %v9232_v37  ;;  %v9233_v25 = vld [vmem:[#allocation5_spill] sm:$0xff]  ;;  %v9237_v40 = vld [vmem:[#allocation163_spill] sm:$0xff] }
 0x260   : > { %v1888_v39 = vsel %vm1860_vm5, %v1855_v42, %v9233_v25  ;;  %v1887_v15 = vsel %vm1860_vm5, %v1854_v47, %v9234_v26  ;;  %v9256_v42 = vld [vmem:[#allocation77_spill] sm:$0xff]  ;;  %v9257_v47 = vld [vmem:[#allocation68_spill] sm:$0xff]  ;;  %v9258_v25 = vld [vmem:[#allocation78_spill] sm:$0xff] }
 0x261   : > { %v1921_v41 = vsel %vm1893_vm6, %v1888_v39, %v9235_v54  ;;  %v1920_v29 = vsel %vm1893_vm6, %v1887_v15, %v9236_v35  ;;  %v1826_v37 = vsel %vm171_vm3, %v9256_v42, %v9255_v36  ;;  %v1825_v39 = vsel %vm171_vm3, %v9258_v25, %v9257_v47  ;;  %v9259_v26 = vld [vmem:[#allocation101_spill] sm:$0xff]  ;;  %v9261_v54 = vld [vmem:[#allocation8_spill] sm:$0xff] }
 0x262   : > { %v1746_v56 = vpop.permute.xlu1 %1745  ;;  %v1744_v17 = vpop.permute.xlu0 %1743  ;;  %v1859_v15 = vsel %vm1827_vm4, %v1826_v37, %v9259_v26  ;;  %v9262_v35 = vld [vmem:[#allocation124_spill] sm:$0xff] }
 0x263   : > { %v2049_v2 = vsel %vm2025_vm10, %v2016_v22, %v1746_v56  ;;  %v2048_v8 = vsel %vm2025_vm10, %v2015_v57, %v1744_v17  ;;  %v1954_v22 = vsel %vm1926_vm7, %v1921_v41, %v9237_v40  ;;  %v9238_v57 = vld [vmem:[#allocation164_spill] sm:$0xff]  ;;  %v9239_v17 = vld [vmem:[#allocation178_spill] sm:$0xff]  ;;  %v1892_v41 = vsel %vm1860_vm5, %v1859_v15, %v9261_v54 }
 0x264   : > { %5119 = vmatprep.mubr.msk.f32.mxu0 %vm2058_vm11, %v2048_v8  ;;  %v1953_v56 = vsel %vm1926_vm7, %v1920_v29, %v9238_v57  ;;  %v9240_v8 = vld [vmem:[#allocation179_spill] sm:$0xff]  ;;  %v9263_v57 = vld [vmem:[#allocation145_spill] sm:$0xff] }
 0x265   : > { %5120 = vmatmul.mubr.msk.f32.gmra.mrb[22].mxu0 %vm2058_vm11, %v2049_v2  ;;  %v1987_v2 = vsel %vm1959_vm8, %v1954_v22, %v9239_v17  ;;  %v1986_v0 = vsel %vm1959_vm8, %v1953_v56, %v9240_v8  ;;  %v1925_v56 = vsel %vm1893_vm6, %v1892_v41, %v9263_v57  ;;  %v9264_v17 = vld [vmem:[#allocation146_spill] sm:$0xff]  ;;  %v9265_v8 = vld [vmem:[#allocation167_spill] sm:$0xff] }
 0x266   : > { %v1558_v43 = vpop.permute.xlu1 %1557  ;;  %v1556_v63 = vpop.permute.xlu0 %1555 }
 0x267   : > { %v2018_v31 = vsel %vm1992_vm9, %v1985_v50, %v1558_v43  ;;  %v2017_v62 = vsel %vm1992_vm9, %v1984_v1, %v1556_v63  ;;  %v1857_v43 = vsel %vm1827_vm4, %v1824_v18, %v9245_v58  ;;  %v9246_v63 = vld [vmem:[#allocation100_spill] sm:$0xff]  ;;  %v3059_v58 = vrot.slane %v7208_v6, 1 }
 0x268   : > { %v1856_v3 = vsel %vm1827_vm4, %v1823_v5, %v9246_v63  ;;  %v1890_v16 = vsel %vm1860_vm5, %v1857_v43, %v9247_v23  ;;  %v3058_v43 = vrot.slane %v7216_v30, 1  ;;  %v2530_v63 = vrot.slane %v7208_v6, 7 }
 0x269   : > { %v1889_v12 = vsel %vm1860_vm5, %v1856_v3, %v9248_v14  ;;  %v1923_v33 = vsel %vm1893_vm6, %v1890_v16, %v9249_v61  ;;  %v8863_v3 = vrot.slane %v7216_v30, 7 }
 0x26a   : > { %v1750_v13 = vpop.permute.xlu1 %1749  ;;  %v1748_v38 = vpop.permute.xlu0 %1747  ;;  %v1922_v50 = vsel %vm1893_vm6, %v1889_v12, %v9250_v53  ;;  %v1956_v1 = vsel %vm1926_vm7, %v1923_v33, %v9251_v28  ;;  %v7305_v23 = vsel %vm818_vm1, %v3058_v43, %v3059_v58 }
 0x26b   : > { %v2051_v55 = vsel %vm2025_vm10, %v2018_v31, %v1750_v13  ;;  %v2050_v60 = vsel %vm2025_vm10, %v2017_v62, %v1748_v38  ;;  %v9252_v31 = vld [vmem:[#allocation166_spill] sm:$0xff]  ;;  %v9253_v13 = vld [vmem:[#allocation180_spill] sm:$0xff]  ;;  %v7310_v16 = vsel %vm287_vm0, %v8863_v3, %v2530_v63 }
 0x26c   : > { %5122 = vmatprep.mubr.msk.f32.mxu0 %vm2058_vm11, %v2050_v60  ;;  %v1955_v62 = vsel %vm1926_vm7, %v1922_v50, %v9252_v31  ;;  %v1989_v38 = vsel %vm1959_vm8, %v1956_v1, %v9253_v13 }
 0x26d   : > { %5123 = vmatmul.mubr.msk.f32.gmra.mrb[24].mxu0 %vm2058_vm11, %v2051_v55  ;;  %v9254_v55 = vld [vmem:[#allocation181_spill] sm:$0xff] }
 0x26e   : > { %v1562_v49 = vpop.permute.xlu1 %1561  ;;  %v1560_v7 = vpop.permute.xlu0 %1559  ;;  %v1988_v60 = vsel %vm1959_vm8, %v1955_v62, %v9254_v55 }
 0x26f   : > { %v2020_v48 = vsel %vm1992_vm9, %v1987_v2, %v1562_v49  ;;  %v2019_v19 = vsel %vm1992_vm9, %v1986_v0, %v1560_v7  ;;  %v9260_v49 = vld [vmem:[#allocation102_spill] sm:$0xff]  ;;  %v1958_v0 = vsel %vm1926_vm7, %v1925_v56, %v9265_v8 }
 0x270   : > { %v1858_v7 = vsel %vm1827_vm4, %v1825_v39, %v9260_v49 }
 0x271   : > { %v1891_v29 = vsel %vm1860_vm5, %v1858_v7, %v9262_v35 }
 0x272   : > { %v1754_v45 = vpop.permute.xlu1 %1753  ;;  %v1752_v20 = vpop.permute.xlu0 %1751  ;;  %v1924_v2 = vsel %vm1893_vm6, %v1891_v29, %v9264_v17 }
 0x273   : > { %v2053_v32 = vsel %vm2025_vm10, %v2020_v48, %v1754_v45  ;;  %v2052_v59 = vsel %vm2025_vm10, %v2019_v19, %v1752_v20  ;;  %v9266_v48 = vld [vmem:[#allocation168_spill] sm:$0xff]  ;;  %v9267_v45 = vld [vmem:[#allocation182_spill] sm:$0xff] }
 0x274   : > { %5125 = vmatprep.mubr.msk.f32.mxu0 %vm2058_vm11, %v2052_v59  ;;  %v1957_v19 = vsel %vm1926_vm7, %v1924_v2, %v9266_v48  ;;  %v1991_v20 = vsel %vm1959_vm8, %v1958_v0, %v9267_v45 }
 0x275   : > { %5126 = vmatmul.mubr.msk.f32.gmra.mrb[26].mxu0 %vm2058_vm11, %v2053_v32  ;;  %v9268_v32 = vld [vmem:[#allocation183_spill] sm:$0xff] }
 0x276   : > { %v1566_v46 = vpop.permute.xlu1 %1565  ;;  %v1564_v27 = vpop.permute.xlu0 %1563  ;;  %v1990_v59 = vsel %vm1959_vm8, %v1957_v19, %v9268_v32 }
 0x277   : > { %v2022_v11 = vsel %vm1992_vm9, %v1989_v38, %v1566_v46  ;;  %v2021_v24 = vsel %vm1992_vm9, %v1988_v60, %v1564_v27 }
 0x27a   : > { %v1758_v51 = vpop.permute.xlu1 %1757  ;;  %v1756_v21 = vpop.permute.xlu0 %1755 }
 0x27b   : > { %v2055_v44 = vsel %vm2025_vm10, %v2022_v11, %v1758_v51  ;;  %v2054_v9 = vsel %vm2025_vm10, %v2021_v24, %v1756_v21 }
 0x27c   : > { %5128 = vmatprep.mubr.msk.f32.mxu0 %vm2058_vm11, %v2054_v9 }
 0x27d   : > { %5129 = vmatmul.mubr.msk.f32.gmra.mrb[28].mxu0 %vm2058_vm11, %v2055_v44 }
 0x27e   : > { %v1570_v40 = vpop.permute.xlu1 %1569  ;;  %v1568_v22 = vpop.permute.xlu0 %1567 }
 0x27f   : > { %v2024_v4 = vsel %vm1992_vm9, %v1991_v20, %v1570_v40  ;;  %v2023_v52 = vsel %vm1992_vm9, %v1990_v59, %v1568_v22 }
 0x282   : > { %v1762_v18 = vpop.permute.xlu1 %1761  ;;  %v1760_v34 = vpop.permute.xlu0 %1759 }
 0x283   : > { %v2057_v10 = vsel %vm2025_vm10, %v2024_v4, %v1762_v18  ;;  %v2056_v5 = vsel %vm2025_vm10, %v2023_v52, %v1760_v34 }
 0x284   : > { %5131 = vmatprep.mubr.msk.f32.mxu0 %vm2058_vm11, %v2056_v5 }
 0x285   : > { %5132 = vmatmul.mubr.msk.f32.gmra.mrb[30].mxu0 %vm2058_vm11, %v2057_v10 }
 0x2e8   : > { %v5088_v14 = vpop.f32.mrb[0].mxu0 }
 0x2e9   : > { %v2385_v12 = vmax.f32 %v5088_v14, 0.0  ;;  %v2225_v46 = vpop.f32.mrb[1].mxu0 }
 0x2ea   : > { %v2384_v27 = vmax.f32 %v2225_v46, 0.0 }
 0x2eb   : > { %2418 = vst.msk [vmem:[#allocation2 + $0x20] sm:$0xff] %vm171_vm3, %v2385_v12 }
 0x2ec   : > { %2417 = vst.msk [vmem:[#allocation2 + $0x18] sm:$0xff] %vm171_vm3, %v2384_v27  ;;  %v5091_v61 = vpop.f32.mrb[2].mxu0 }
 0x2ed   : > { %v2387_v33 = vmax.f32 %v5091_v61, 0.0  ;;  %v2235_v53 = vpop.f32.mrb[3].mxu0 }
 0x2ee   : > { %v2386_v50 = vmax.f32 %v2235_v53, 0.0 }
 0x2ef   : > { %2420 = vst.msk [vmem:[#allocation2 + $0x38] sm:$0xff] %vm171_vm3, %v2387_v33 }
 0x2f0   : > { %2419 = vst.msk [vmem:[#allocation2 + $0x30] sm:$0xff] %vm171_vm3, %v2386_v50  ;;  %v5094_v28 = vpop.f32.mrb[4].mxu0 }
 0x2f1   : > { %v2389_v1 = vmax.f32 %v5094_v28, 0.0  ;;  %v2245_v31 = vpop.f32.mrb[5].mxu0 }
 0x2f2   : > { %v2388_v62 = vmax.f32 %v2245_v31, 0.0  ;;  %v7316_v13 = vld [vmem:[#allocation2 + $0x20] sm:$0xff] }
 0x2f3   : > { %2422 = vst.msk [vmem:[#allocation2 + $0x50] sm:$0xff] %vm171_vm3, %v2389_v1  ;;  %2952 = vrot.lane.b32.xlu1 %v7316_v13, %s5245_s18  ;;  %v7321_v38 = vld [vmem:[#allocation2 + $0x18] sm:$0xff] }
 0x2f4   : > { %2421 = vst.msk [vmem:[#allocation2 + $0x48] sm:$0xff] %vm171_vm3, %v2388_v62  ;;  %2950 = vrot.lane.b32.xlu0 %v7321_v38, %s5245_s18 }
 0x2f6   : > { %v7326_v55 = vld [vmem:[#allocation2 + $0x38] sm:$0xff] }
 0x2f7   : > { %2956 = vrot.lane.b32.xlu1 %v7326_v55, %s5245_s18  ;;  %v7330_v60 = vld [vmem:[#allocation2 + $0x30] sm:$0xff]  ;;  %v3069_v6 = vrot.slane %v7326_v55, 1 }
 0x2f8   : > { %2954 = vrot.lane.b32.xlu0 %v7330_v60, %s5245_s18  ;;  %v5097_v11 = vpop.f32.mrb[6].mxu0 }
 0x2f9   : > { %v2391_v24 = vmax.f32 %v5097_v11, 0.0  ;;  %v2255_v51 = vpop.f32.mrb[7].mxu0 }
 0x2fa   : > { %v2390_v21 = vmax.f32 %v2255_v51, 0.0  ;;  %v7334_v44 = vld [vmem:[#allocation2 + $0x50] sm:$0xff] }
 0x2fb   : > { %2424 = vst.msk [vmem:[#allocation2 + $0x68] sm:$0xff] %vm171_vm3, %v2391_v24  ;;  %2960 = vrot.lane.b32.xlu1 %v7334_v44, %s5245_s18  ;;  %v7339_v9 = vld [vmem:[#allocation2 + $0x48] sm:$0xff] }
 0x2fc   : > { %2423 = vst.msk [vmem:[#allocation2 + $0x60] sm:$0xff] %vm171_vm3, %v2390_v21  ;;  %2958 = vrot.lane.b32.xlu0 %v7339_v9, %s5245_s18 }
 0x300   : > { %v5100_v36 = vpop.f32.mrb[8].mxu0 }
 0x301   : > { %v2393_v42 = vmax.f32 %v5100_v36, 0.0  ;;  %v2265_v37 = vpop.f32.mrb[9].mxu0 }
 0x302   : > { %v2392_v47 = vmax.f32 %v2265_v37, 0.0  ;;  %v7344_v25 = vld [vmem:[#allocation2 + $0x68] sm:$0xff] }
 0x303   : > { %2426 = vst.msk [vmem:[#allocation2 + $0x80] sm:$0xff] %vm171_vm3, %v2393_v42  ;;  %2964 = vrot.lane.b32.xlu1 %v7344_v25, %s5245_s18  ;;  %v7349_v39 = vld [vmem:[#allocation2 + $0x60] sm:$0xff] }
 0x304   : > { %2425 = vst.msk [vmem:[#allocation2 + $0x78] sm:$0xff] %vm171_vm3, %v2392_v47  ;;  %2962 = vrot.lane.b32.xlu0 %v7349_v39, %s5245_s18 }
 0x308   : > { %v5103_v26 = vpop.f32.mrb[10].mxu0 }
 0x309   : > { %v2395_v15 = vmax.f32 %v5103_v26, 0.0  ;;  %v2275_v49 = vpop.f32.mrb[11].mxu0 }
 0x30a   : > { %v2394_v7 = vmax.f32 %v2275_v49, 0.0  ;;  %v7354_v54 = vld [vmem:[#allocation2 + $0x80] sm:$0xff] }
 0x30b   : > { %2428 = vst.msk [vmem:[#allocation2 + $0x98] sm:$0xff] %vm171_vm3, %v2395_v15  ;;  %2968 = vrot.lane.b32.xlu1 %v7354_v54, %s5245_s18  ;;  %v7359_v41 = vld [vmem:[#allocation2 + $0x78] sm:$0xff] }
 0x30c   : > { %2427 = vst.msk [vmem:[#allocation2 + $0x90] sm:$0xff] %vm171_vm3, %v2394_v7  ;;  %2966 = vrot.lane.b32.xlu0 %v7359_v41, %s5245_s18 }
 0x310   : > { %v5106_v35 = vpop.f32.mrb[12].mxu0 }
 0x311   : > { %v2397_v29 = vmax.f32 %v5106_v35, 0.0  ;;  %v2285_v40 = vpop.f32.mrb[13].mxu0 }
 0x312   : > { %v2396_v22 = vmax.f32 %v2285_v40, 0.0  ;;  %v7364_v57 = vld [vmem:[#allocation2 + $0x98] sm:$0xff] }
 0x313   : > { %2430 = vst.msk [vmem:[#allocation2 + $0xb0] sm:$0xff] %vm171_vm3, %v2397_v29  ;;  %2972 = vrot.lane.b32.xlu1 %v7364_v57, %s5245_s18  ;;  %v7369_v56 = vld [vmem:[#allocation2 + $0x90] sm:$0xff] }
 0x314   : > { %2429 = vst.msk [vmem:[#allocation2 + $0xa8] sm:$0xff] %vm171_vm3, %v2396_v22  ;;  %2970 = vrot.lane.b32.xlu0 %v7369_v56, %s5245_s18 }
 0x318   : > { %v5109_v17 = vpop.f32.mrb[14].mxu0 }
 0x319   : > { %v2399_v2 = vmax.f32 %v5109_v17, 0.0  ;;  %v2295_v8 = vpop.f32.mrb[15].mxu0 }
 0x31a   : > { %v2398_v0 = vmax.f32 %v2295_v8, 0.0  ;;  %v7374_v48 = vld [vmem:[#allocation2 + $0xb0] sm:$0xff] }
 0x31b   : > { %2432 = vst.msk [vmem:[#allocation2 + $0xc8] sm:$0xff] %vm171_vm3, %v2399_v2  ;;  %2976 = vrot.lane.b32.xlu1 %v7374_v48, %s5245_s18  ;;  %v7379_v19 = vld [vmem:[#allocation2 + $0xa8] sm:$0xff] }
 0x31c   : > { %2431 = vst.msk [vmem:[#allocation2 + $0xc0] sm:$0xff] %vm171_vm3, %v2398_v0  ;;  %2974 = vrot.lane.b32.xlu0 %v7379_v19, %s5245_s18 }
 0x320   : > { %v5112_v45 = vpop.f32.mrb[16].mxu0 }
 0x321   : > { %v2401_v20 = vmax.f32 %v5112_v45, 0.0  ;;  %v2305_v32 = vpop.f32.mrb[17].mxu0 }
 0x322   : > { %v2400_v59 = vmax.f32 %v2305_v32, 0.0  ;;  %v7384_v4 = vld [vmem:[#allocation2 + $0xc8] sm:$0xff] }
 0x323   : > { %2434 = vst.msk [vmem:[#allocation2 + $0xe0] sm:$0xff] %vm171_vm3, %v2401_v20  ;;  %2980 = vrot.lane.b32.xlu1 %v7384_v4, %s5245_s18  ;;  %v7389_v52 = vld [vmem:[#allocation2 + $0xc0] sm:$0xff] }
 0x324   : > { %2433 = vst.msk [vmem:[#allocation2 + $0xd8] sm:$0xff] %vm171_vm3, %v2400_v59  ;;  %2978 = vrot.lane.b32.xlu0 %v7389_v52, %s5245_s18 }
 0x328   : > { %v5115_v18 = vpop.f32.mrb[18].mxu0 }
 0x329   : > { %v2403_v34 = vmax.f32 %v5115_v18, 0.0  ;;  %v2315_v10 = vpop.f32.mrb[19].mxu0 }
 0x32a   : > { %v2402_v5 = vmax.f32 %v2315_v10, 0.0  ;;  %v7394_v43 = vld [vmem:[#allocation2 + $0xe0] sm:$0xff] }
 0x32b   : > { %2436 = vst.msk [vmem:[#allocation2 + $0xf8] sm:$0xff] %vm171_vm3, %v2403_v34  ;;  %2984 = vrot.lane.b32.xlu1 %v7394_v43, %s5245_s18  ;;  %v7399_v63 = vld [vmem:[#allocation2 + $0xd8] sm:$0xff] }
 0x32c   : > { %2435 = vst.msk [vmem:[#allocation2 + $0xf0] sm:$0xff] %vm171_vm3, %v2402_v5  ;;  %2982 = vrot.lane.b32.xlu0 %v7399_v63, %s5245_s18 }
 0x330   : > { %v5118_v14 = vpop.f32.mrb[20].mxu0 }
 0x331   : > { %v2405_v12 = vmax.f32 %v5118_v14, 0.0  ;;  %v2325_v46 = vpop.f32.mrb[21].mxu0 }
 0x332   : > { %v2404_v27 = vmax.f32 %v2325_v46, 0.0  ;;  %v7404_v61 = vld [vmem:[#allocation2 + $0xf8] sm:$0xff] }
 0x333   : > { %2438 = vst.msk [vmem:[#allocation2 + $0x110] sm:$0xff] %vm171_vm3, %v2405_v12  ;;  %2988 = vrot.lane.b32.xlu1 %v7404_v61, %s5245_s18  ;;  %v7409_v33 = vld [vmem:[#allocation2 + $0xf0] sm:$0xff] }
 0x334   : > { %2437 = vst.msk [vmem:[#allocation2 + $0x108] sm:$0xff] %vm171_vm3, %v2404_v27  ;;  %2986 = vrot.lane.b32.xlu0 %v7409_v33, %s5245_s18 }
 0x338   : > { %v5121_v53 = vpop.f32.mrb[22].mxu0 }
 0x339   : > { %v2407_v50 = vmax.f32 %v5121_v53, 0.0  ;;  %v2335_v28 = vpop.f32.mrb[23].mxu0 }
 0x33a   : > { %v2406_v1 = vmax.f32 %v2335_v28, 0.0  ;;  %v7414_v31 = vld [vmem:[#allocation2 + $0x110] sm:$0xff] }
 0x33b   : > { %2440 = vst.msk [vmem:[#allocation2 + $0x128] sm:$0xff] %vm171_vm3, %v2407_v50  ;;  %2992 = vrot.lane.b32.xlu1 %v7414_v31, %s5245_s18  ;;  %v7419_v62 = vld [vmem:[#allocation2 + $0x108] sm:$0xff]  ;;  %v2451_v28 = vld [vmem:[#allocation2 + $0x10] sm:$0xff] }
 0x33c   : > { %2439 = vst.msk [vmem:[#allocation2 + $0x120] sm:$0xff] %vm171_vm3, %v2406_v1  ;;  %2990 = vrot.lane.b32.xlu0 %v7419_v62, %s5245_s18 }
 0x340   : > { %v5124_v11 = vpop.f32.mrb[24].mxu0 }
 0x341   : > { %v2409_v24 = vmax.f32 %v5124_v11, 0.0  ;;  %v2345_v51 = vpop.f32.mrb[25].mxu0 }
 0x342   : > { %v2408_v21 = vmax.f32 %v2345_v51, 0.0  ;;  %v7424_v36 = vld [vmem:[#allocation2 + $0x128] sm:$0xff]  ;;  %v3061_v51 = vrot.slane %v2451_v28, 1  ;;  %v3068_v28 = vrot.slane %v7330_v60, 1 }
 0x343   : > { %2442 = vst.msk [vmem:[#allocation2 + $0x140] sm:$0xff] %vm171_vm3, %v2409_v24  ;;  %2996 = vrot.lane.b32.xlu1 %v7424_v36, %s5245_s18  ;;  %v2566_v42 = vrot.slane %v7424_v36, 7  ;;  %v8869_v37 = vrot.slane %v7424_v36, 1  ;;  %v7431_v47 = vld [vmem:[#allocation2 + $0x120] sm:$0xff] }
 0x344   : > { %9269 = vst [vmem:[#allocation3_spill] sm:$0xff] %v7431_v47  ;;  %2441 = vst.msk [vmem:[#allocation2 + $0x138] sm:$0xff] %vm171_vm3, %v2408_v21  ;;  %2994 = vrot.lane.b32.xlu0 %v7431_v47, %s5245_s18  ;;  %v8862_v26 = vrot.slane %v7431_v47, 7  ;;  %v3118_v15 = vrot.slane %v7431_v47, 1 }
 0x346   : > { %v7441_v49 = vsel %vm818_vm1, %v3118_v15, %v8869_v37  ;;  %v7446_v7 = vsel %vm287_vm0, %v8862_v26, %v2566_v42  ;;  %v3099_v37 = vrot.slane %v7384_v4, 1 }
 0x347   : > { %9270 = vst [vmem:[#allocation14_spill] sm:$0xff] %v7446_v7  ;;  %v2481_v7 = vld [vmem:[#allocation2 + $0x100] sm:$0xff] }
 0x348   : > { %v5127_v35 = vpop.f32.mrb[26].mxu0 }
 0x349   : > { %v2411_v29 = vmax.f32 %v5127_v35, 0.0  ;;  %v2355_v40 = vpop.f32.mrb[27].mxu0 }
 0x34a   : > { %v2410_v22 = vmax.f32 %v2355_v40, 0.0  ;;  %v7448_v17 = vld [vmem:[#allocation2 + $0x140] sm:$0xff] }
 0x34b   : > { %2444 = vst.msk [vmem:[#allocation2 + $0x158] sm:$0xff] %vm171_vm3, %v2411_v29  ;;  %3000 = vrot.lane.b32.xlu1 %v7448_v17, %s5245_s18  ;;  %v2569_v2 = vrot.slane %v7448_v17, 7  ;;  %v8868_v8 = vrot.slane %v7448_v17, 1  ;;  %v7455_v0 = vld [vmem:[#allocation2 + $0x138] sm:$0xff] }
 0x34c   : > { %9271 = vst [vmem:[#allocation4_spill] sm:$0xff] %v7455_v0  ;;  %2443 = vst.msk [vmem:[#allocation2 + $0x150] sm:$0xff] %vm171_vm3, %v2410_v22  ;;  %2998 = vrot.lane.b32.xlu0 %v7455_v0, %s5245_s18  ;;  %v8861_v45 = vrot.slane %v7455_v0, 7  ;;  %v3123_v20 = vrot.slane %v7455_v0, 1  ;;  %v2454_v22 = vld [vmem:[#allocation2 + $0x28] sm:$0xff]  ;;  %v3103_v0 = vrot.slane %v7399_v63, 1 }
 0x34e   : > { %v7465_v32 = vsel %vm818_vm1, %v3123_v20, %v8868_v8  ;;  %v7470_v59 = vsel %vm287_vm0, %v8861_v45, %v2569_v2  ;;  %v3062_v20 = vsel %vm818_vm1, %v3059_v58, %v3061_v51  ;;  %v7531_v51 = vld [vmem:[#allocation2 + $0x58] sm:$0xff]  ;;  %v3089_v45 = vrot.slane %v7364_v57, 1 }
 0x34f   : > { %9272 = vst [vmem:[#allocation11_spill] sm:$0xff] %v7470_v59  ;;  %v8873_v8 = vrot.slane %v7379_v19, 1 }
 0x350   : > { %v5130_v18 = vpop.f32.mrb[28].mxu0 }
 0x351   : > { %v2413_v34 = vmax.f32 %v5130_v18, 0.0  ;;  %v2365_v10 = vpop.f32.mrb[29].mxu0  ;;  %v3064_v18 = vrot.slane %v7316_v13, 1 }
 0x352   : > { %v2412_v5 = vmax.f32 %v2365_v10, 0.0  ;;  %v7472_v14 = vld [vmem:[#allocation2 + $0x158] sm:$0xff] }
 0x353   : > { %2446 = vst.msk [vmem:[#allocation2 + $0x170] sm:$0xff] %vm171_vm3, %v2413_v34  ;;  %3004 = vrot.lane.b32.xlu1 %v7472_v14, %s5245_s18  ;;  %v2572_v12 = vrot.slane %v7472_v14, 7  ;;  %v8867_v46 = vrot.slane %v7472_v14, 1  ;;  %v7479_v27 = vld [vmem:[#allocation2 + $0x150] sm:$0xff]  ;;  %v3066_v34 = vrot.slane %v2454_v22, 1 }
 0x354   : > { %9273 = vst [vmem:[#allocation71_spill] sm:$0xff] %v7479_v27  ;;  %2445 = vst.msk [vmem:[#allocation2 + $0x168] sm:$0xff] %vm171_vm3, %v2412_v5  ;;  %3002 = vrot.lane.b32.xlu0 %v7479_v27, %s5245_s18  ;;  %v8860_v53 = vrot.slane %v7479_v27, 7  ;;  %v3128_v50 = vrot.slane %v7479_v27, 1  ;;  %v3063_v5 = vrot.slane %v7321_v38, 1  ;;  %v7546_v22 = vld [vmem:[#allocation2 + $0x70] sm:$0xff] }
 0x355   : > { %v7523_v58 = vsel %vm818_vm1, %v3064_v18, %v3066_v34  ;;  %v8864_v34 = vrot.slane %v7546_v22, 1 }
 0x356   : > { %v7489_v1 = vsel %vm818_vm1, %v3128_v50, %v8867_v46  ;;  %v7494_v11 = vsel %vm287_vm0, %v8860_v53, %v2572_v12  ;;  %v2457_v12 = vld [vmem:[#allocation2 + $0x40] sm:$0xff]  ;;  %v3083_v53 = vrot.slane %v7359_v41, 1 }
 0x357   : > { %9274 = vst [vmem:[#allocation72_spill] sm:$0xff] %v7494_v11  ;;  %v3071_v50 = vrot.slane %v2457_v12, 1 }
 0x358   : > { %v5133_v24 = vpop.f32.mrb[30].mxu0 }
 0x359   : > { %v2415_v21 = vmax.f32 %v5133_v24, 0.0  ;;  %v2375_v42 = vpop.f32.mrb[31].mxu0  ;;  %v7529_v24 = vsel %vm818_vm1, %v3063_v5, %v3064_v18  ;;  %v3078_v5 = vrot.slane %v7349_v39, 1 }
 0x35a   : > { %v2414_v15 = vmax.f32 %v2375_v42, 0.0  ;;  %v7496_v35 = vld [vmem:[#allocation2 + $0x170] sm:$0xff]  ;;  %v8865_v42 = vrot.slane %v7531_v51, 1 }
 0x35b   : > { %2448 = vst.msk [vmem:[#allocation2 + $0x188] sm:$0xff] %vm171_vm3, %v2415_v21  ;;  %3008 = vrot.lane.b32.xlu1 %v7496_v35, %s5245_s18  ;;  %v2575_v29 = vrot.slane %v7496_v35, 7  ;;  %v7502_v40 = vld [vmem:[#allocation2 + $0x168] sm:$0xff]  ;;  %v7537_v21 = vsel %vm818_vm1, %v3069_v6, %v3071_v50  ;;  %v3084_v50 = vrot.slane %v7354_v54, 1 }
 0x35c   : > { %9275 = vst [vmem:[#allocation10_spill] sm:$0xff] %v7502_v40  ;;  %2447 = vst.msk [vmem:[#allocation2 + $0x180] sm:$0xff] %vm171_vm3, %v2414_v15  ;;  %3006 = vrot.lane.b32.xlu0 %v7502_v40, %s5245_s18  ;;  %v8859_v2 = vrot.slane %v7502_v40, 7  ;;  %v3073_v15 = vrot.slane %v7339_v9, 1 }
 0x35e   : > { %v7515_v10 = vsel %vm287_vm0, %v8859_v2, %v2575_v29  ;;  %v7544_v29 = vsel %vm818_vm1, %v3068_v28, %v3069_v6  ;;  %v7563_v6 = vld [vmem:[#allocation2 + $0x88] sm:$0xff] }
 0x35f   : > { %9276 = vst [vmem:[#allocation21_spill] sm:$0xff] %v7515_v10  ;;  %3140 = vrot.lane.b32.xlu1 %v3062_v20, %s5246_s19  ;;  %v3079_v20 = vrot.slane %v7344_v25, 1  ;;  %v8866_v2 = vrot.slane %v7563_v6, 1 }
 0x360   : > { %3138 = vrot.lane.b32.xlu0 %v7305_v23, %s5246_s19  ;;  %v3074_v23 = vrot.slane %v7334_v44, 1 }
 0x361   : > { %v7571_v28 = vsel %vm818_vm1, %v3079_v20, %v8864_v34  ;;  %v7588_v26 = vsel %vm818_vm1, %v3084_v50, %v8866_v2  ;;  %v3088_v34 = vrot.slane %v7369_v56, 1 }
 0x362   : > { %v7554_v18 = vsel %vm818_vm1, %v3074_v23, %v8865_v42  ;;  %v7561_v12 = vsel %vm818_vm1, %v3073_v15, %v3074_v23  ;;  %v7578_v23 = vsel %vm818_vm1, %v3078_v5, %v3079_v20  ;;  %v7580_v15 = vld [vmem:[#allocation2 + $0xa0] sm:$0xff]  ;;  %v7595_v20 = vsel %vm818_vm1, %v3083_v53, %v3084_v50  ;;  %v2472_v5 = vld [vmem:[#allocation2 + $0xb8] sm:$0xff]  ;;  %v2475_v50 = vld [vmem:[#allocation2 + $0xd0] sm:$0xff] }
 0x363   : > { %3144 = vrot.lane.b32.xlu1 %v7523_v58, %s5246_s19  ;;  %v8870_v3 = vrot.slane %v7580_v15, 1  ;;  %v3094_v42 = vrot.slane %v7374_v48, 1  ;;  %v7605_v46 = vrot.slane %v2472_v5, 1  ;;  %v7611_v53 = vsel %vm818_vm1, %v3088_v34, %v3089_v45 }
 0x364   : > { %3142 = vrot.lane.b32.xlu0 %v7529_v24, %s5246_s19  ;;  %v3101_v10 = vrot.slane %v2475_v50, 1  ;;  %v3098_v5 = vrot.slane %v7389_v52, 1  ;;  %v3104_v34 = vrot.slane %v7394_v43, 1 }
 0x365   : > { %v7603_v2 = vsel %vm818_vm1, %v3089_v45, %v8870_v3  ;;  %v3097_v3 = vsel %vm818_vm1, %v3094_v42, %v7605_v46  ;;  %v3095_v11 = vsel %vm818_vm1, %v8873_v8, %v3094_v42  ;;  %v2478_v45 = vld [vmem:[#allocation2 + $0xe8] sm:$0xff]  ;;  %v3111_v8 = vrot.slane %v2481_v7, 1 }
 0x366   : > { %v3102_v27 = vsel %vm818_vm1, %v3099_v37, %v3101_v10  ;;  %v3106_v59 = vrot.slane %v2478_v45, 1  ;;  %v3100_v50 = vsel %vm818_vm1, %v3098_v5, %v3099_v37  ;;  %v3105_v10 = vsel %vm818_vm1, %v3103_v0, %v3104_v34  ;;  %v2484_v45 = vld [vmem:[#allocation2 + $0x118] sm:$0xff] }
 0x367   : > { %3148 = vrot.lane.b32.xlu1 %v7537_v21, %s5246_s19  ;;  %v3116_v5 = vrot.slane %v2484_v45, 1  ;;  %v7647_v45 = vpop.permute.xlu0 %2946 }
 0x368   : > { %3146 = vrot.lane.b32.xlu0 %v7544_v29, %s5246_s19  ;;  %v3107_v42 = vsel %vm818_vm1, %v3104_v34, %v3106_v59  ;;  %v2487_v59 = vld [vmem:[#allocation2 + $0x130] sm:$0xff]  ;;  %v7643_v34 = vpop.permute.xlu1 %2948 }
 0x369   : > { %v3121_v0 = vrot.slane %v2487_v59, 1 }
 0x36b   : > { %3152 = vrot.lane.b32.xlu1 %v7554_v18, %s5246_s19  ;;  %v7658_v59 = vpop.permute.xlu0 %2950 }
 0x36c   : > { %3150 = vrot.lane.b32.xlu0 %v7561_v12, %s5246_s19 }
 0x36f   : > { %3156 = vrot.lane.b32.xlu1 %v7571_v28, %s5246_s19 }
 0x370   : > { %3154 = vrot.lane.b32.xlu0 %v7578_v23, %s5246_s19 }
 0x373   : > { %3160 = vrot.lane.b32.xlu1 %v7588_v26, %s5246_s19 }
 0x374   : > { %3158 = vrot.lane.b32.xlu0 %v7595_v20, %s5246_s19 }
 0x377   : > { %3164 = vrot.lane.b32.xlu1 %v7603_v2, %s5246_s19 }
 0x378   : > { %3162 = vrot.lane.b32.xlu0 %v7611_v53, %s5246_s19 }
 0x37b   : > { %3168 = vrot.lane.b32.xlu1 %v3097_v3, %s5246_s19  ;;  %v3109_v3 = vrot.slane %v7404_v61, 1 }
 0x37c   : > { %3166 = vrot.lane.b32.xlu0 %v3095_v11, %s5246_s19  ;;  %v3108_v11 = vrot.slane %v7409_v33, 1 }
 0x37d   : > { %v3112_v37 = vsel %vm818_vm1, %v3109_v3, %v3111_v8  ;;  %v2490_v8 = vld [vmem:[#allocation2 + $0x148] sm:$0xff] }
 0x37e   : > { %v3110_v7 = vsel %vm818_vm1, %v3108_v11, %v3109_v3  ;;  %v3126_v11 = vrot.slane %v2490_v8, 1 }
 0x37f   : > { %3172 = vrot.lane.b32.xlu1 %v3102_v27, %s5246_s19  ;;  %v3114_v27 = vrot.slane %v7414_v31, 1 }
 0x380   : > { %3170 = vrot.lane.b32.xlu0 %v3100_v50, %s5246_s19  ;;  %v3113_v50 = vrot.slane %v7419_v62, 1 }
 0x383   : > { %3176 = vrot.lane.b32.xlu1 %v3107_v42, %s5246_s19  ;;  %v3117_v42 = vsel %vm818_vm1, %v3114_v27, %v3116_v5  ;;  %v2493_v5 = vld [vmem:[#allocation2 + $0x160] sm:$0xff] }
 0x384   : > { %3174 = vrot.lane.b32.xlu0 %v3105_v10, %s5246_s19  ;;  %v3115_v10 = vsel %vm818_vm1, %v3113_v50, %v3114_v27  ;;  %v9278_v27 = vrot.slane %v7448_v17, 1  ;;  %v7674_v17 = vpop.permute.xlu0 %2954 }
 0x386   : > { %v3127_v50 = vsel %vm818_vm1, %v9278_v27, %v3126_v11  ;;  %v2536_v27 = vrot.slane %v7326_v55, 7 }
 0x387   : > { %3180 = vrot.lane.b32.xlu1 %v3112_v37, %s5246_s19  ;;  %v9277_v37 = vrot.slane %v7424_v36, 1  ;;  %v2496_v36 = vld [vmem:[#allocation2 + $0x178] sm:$0xff] }
 0x388   : > { %3178 = vrot.lane.b32.xlu0 %v3110_v7, %s5246_s19  ;;  %v7656_v7 = vpop.permute.xlu1 %2952  ;;  %v3136_v8 = vrot.slane %v2496_v36, 1 }
 0x389   : > { %v3122_v3 = vsel %vm818_vm1, %v9277_v37, %v3121_v0  ;;  %v3134_v0 = vrot.slane %v7496_v35, 1  ;;  %v3133_v37 = vrot.slane %v7502_v40, 1  ;;  %v2532_v35 = vrot.slane %v7321_v38, 7 }
 0x38b   : > { %3184 = vrot.lane.b32.xlu1 %v3117_v42, %s5246_s19  ;;  %v3131_v42 = vrot.slane %v2493_v5, 1  ;;  %v3135_v11 = vsel %vm818_vm1, %v3133_v37, %v3134_v0  ;;  %v7694_v36 = vsel %vm287_vm0, 0.0, %v2532_v35 }
 0x38c   : > { %3182 = vrot.lane.b32.xlu0 %v3115_v10, %s5246_s19  ;;  %v9279_v10 = vrot.slane %v7472_v14, 1  ;;  %v3137_v14 = vsel %vm818_vm1, %v3134_v0, %v3136_v8 }
 0x38f   : > { %3188 = vrot.lane.b32.xlu1 %v3122_v3, %s5246_s19  ;;  %v7671_v3 = vpop.permute.xlu1 %2956 }
 0x390   : > { %3186 = vrot.lane.b32.xlu0 %v7441_v49, %s5246_s19  ;;  %v3132_v49 = vsel %vm818_vm1, %v9279_v10, %v3131_v42  ;;  %v7691_v42 = vpop.permute.xlu0 %2958  ;;  %v2539_v10 = vrot.slane %v7334_v44, 7 }
 0x393   : > { %3192 = vrot.lane.b32.xlu1 %v3127_v50, %s5246_s19  ;;  %v7684_v5 = vpop.permute.xlu1 %2960  ;;  %v2535_v50 = vrot.slane %v7330_v60, 7 }
 0x394   : > { %3190 = vrot.lane.b32.xlu0 %v7465_v32, %s5246_s19  ;;  %v2533_v32 = vrot.slane %v7316_v13, 7  ;;  %9280 = vst [vmem:[#allocation13_spill] sm:$0xff] %v7684_v5  ;;  %v7707_v37 = vpop.permute.xlu0 %2962 }
 0x395   : > { %v7705_v8 = vsel %vm287_vm0, %v2535_v50, %v2536_v27  ;;  %9282 = vst [vmem:[#allocation75_spill] sm:$0xff] %v7707_v37 }
 0x397   : > { %3196 = vrot.lane.b32.xlu1 %v3132_v49, %s5246_s19  ;;  %v7700_v0 = vpop.permute.xlu1 %2964  ;;  %v2538_v49 = vrot.slane %v7339_v9, 7 }
 0x398   : > { %3194 = vrot.lane.b32.xlu0 %v7489_v1, %s5246_s19  ;;  %v7689_v1 = vsel %vm287_vm0, %v2532_v35, %v2533_v32  ;;  %9281 = vst [vmem:[#allocation22_spill] sm:$0xff] %v7700_v0  ;;  %v7710_v32 = vsel %vm287_vm0, 0.0, %v2535_v50  ;;  %v7723_v40 = vpop.permute.xlu0 %2966  ;;  %v2544_v0 = vrot.slane %v7359_v41, 7 }
 0x399   : > { %v7721_v27 = vsel %vm287_vm0, %v2538_v49, %v2539_v10  ;;  %9285 = vst [vmem:[#allocation25_spill] sm:$0xff] %v7723_v40  ;;  %v7726_v50 = vsel %vm287_vm0, 0.0, %v2538_v49 }
 0x39a   : > { %9284 = vst [vmem:[#allocation17_spill] sm:$0xff] %v7721_v27 }
 0x39b   : > { %3200 = vrot.lane.b32.xlu1 %v3137_v14, %s5246_s19  ;;  %v7716_v35 = vpop.permute.xlu1 %2968  ;;  %v2542_v14 = vrot.slane %v7344_v25, 7 }
 0x39c   : > { %3198 = vrot.lane.b32.xlu0 %v3135_v11, %s5246_s19  ;;  %9283 = vst [vmem:[#allocation76_spill] sm:$0xff] %v7716_v35  ;;  %v2541_v11 = vrot.slane %v7349_v39, 7  ;;  %v2545_v35 = vrot.slane %v7354_v54, 7  ;;  %v7739_v37 = vpop.permute.xlu0 %2970 }
 0x39d   : > { %9288 = vst [vmem:[#allocation19_spill] sm:$0xff] %v7739_v37 }
 0x39e   : > { %v7737_v10 = vsel %vm287_vm0, %v2541_v11, %v2542_v14  ;;  %v7742_v49 = vsel %vm287_vm0, 0.0, %v2541_v11  ;;  %v7753_v14 = vsel %vm287_vm0, %v2544_v0, %v2545_v35  ;;  %v7758_v11 = vsel %vm287_vm0, 0.0, %v2544_v0 }
 0x39f   : > { %3252 = vrot.lane.b32.xlu1 %v7689_v1, %s5247_s20  ;;  %v7732_v47 = vpop.permute.xlu1 %2972  ;;  %9287 = vst [vmem:[#allocation26_spill] sm:$0xff] %v7737_v10  ;;  %9289 = vst [vmem:[#allocation29_spill] sm:$0xff] %v7742_v49 }
 0x3a0   : > { %3250 = vrot.lane.b32.xlu0 %v7694_v36, %s5247_s20  ;;  %9286 = vst [vmem:[#allocation18_spill] sm:$0xff] %v7732_v47  ;;  %v2548_v47 = vrot.slane %v7364_v57, 7  ;;  %9291 = vst [vmem:[#allocation30_spill] sm:$0xff] %v7753_v14  ;;  %v7755_v5 = vpop.permute.xlu0 %2974 }
 0x3a1   : > { %9292 = vst [vmem:[#allocation103_spill] sm:$0xff] %v7755_v5 }
 0x3a3   : > { %3256 = vrot.lane.b32.xlu1 %v7705_v8, %s5247_s20  ;;  %v7748_v40 = vpop.permute.xlu1 %2976 }
 0x3a4   : > { %3254 = vrot.lane.b32.xlu0 %v7710_v32, %s5247_s20  ;;  %9290 = vst [vmem:[#allocation20_spill] sm:$0xff] %v7748_v40  ;;  %v2551_v40 = vrot.slane %v7374_v48, 7  ;;  %v2554_v48 = vrot.slane %v7384_v4, 7  ;;  %v2557_v4 = vrot.slane %v7394_v43, 7  ;;  %v2560_v43 = vrot.slane %v7404_v61, 7 }
 0x3a5   : > { %v2563_v61 = vrot.slane %v7414_v31, 7 }
 0x3a7   : > { %3260 = vrot.lane.b32.xlu1 %v7721_v27, %s5247_s20  ;;  %v2547_v27 = vrot.slane %v7369_v56, 7  ;;  %v7764_v37 = vpop.permute.xlu1 %2980 }
 0x3a8   : > { %3258 = vrot.lane.b32.xlu0 %v7726_v50, %s5247_s20  ;;  %9293 = vst [vmem:[#allocation104_spill] sm:$0xff] %v7764_v37  ;;  %v2553_v37 = vrot.slane %v7389_v52, 7  ;;  %v2556_v52 = vrot.slane %v7399_v63, 7  ;;  %v2559_v63 = vrot.slane %v7409_v33, 7  ;;  %v2562_v33 = vrot.slane %v7419_v62, 7 }
 0x3a9   : > { %v7769_v35 = vsel %vm287_vm0, %v2547_v27, %v2548_v47  ;;  %v7774_v0 = vsel %vm287_vm0, 0.0, %v2547_v27 }
 0x3aa   : > { %v7847_v31 = vsel %vm287_vm0, %v2562_v33, %v2563_v61 }
 0x3ab   : > { %3264 = vrot.lane.b32.xlu1 %v7737_v10, %s5247_s20  ;;  %v2550_v10 = vrot.slane %v7379_v19, 7  ;;  %v7780_v5 = vpop.permute.xlu1 %2984  ;;  %9312 = vst [vmem:[#allocation28_spill] sm:$0xff] %v7847_v31 }
 0x3ac   : > { %3262 = vrot.lane.b32.xlu0 %v7742_v49, %s5247_s20  ;;  %v7771_v49 = vpop.permute.xlu0 %2978  ;;  %9295 = vst [vmem:[#allocation12_spill] sm:$0xff] %v7780_v5 }
 0x3ad   : > { %9294 = vst [vmem:[#allocation9_spill] sm:$0xff] %v7771_v49  ;;  %v7785_v47 = vsel %vm287_vm0, %v2550_v10, %v2551_v40  ;;  %v7790_v27 = vsel %vm287_vm0, 0.0, %v2550_v10  ;;  %v7801_v40 = vsel %vm287_vm0, %v2553_v37, %v2554_v48  ;;  %v7806_v10 = vsel %vm287_vm0, 0.0, %v2553_v37 }
 0x3ae   : > { %9296 = vst [vmem:[#allocation147_spill] sm:$0xff] %v7785_v47  ;;  %9298 = vst [vmem:[#allocation23_spill] sm:$0xff] %v7790_v27  ;;  %v7817_v48 = vsel %vm287_vm0, %v2556_v52, %v2557_v4  ;;  %v7822_v37 = vsel %vm287_vm0, 0.0, %v2556_v52  ;;  %v7833_v4 = vsel %vm287_vm0, %v2559_v63, %v2560_v43  ;;  %v7838_v52 = vsel %vm287_vm0, 0.0, %v2559_v63 }
 0x3af   : > { %3268 = vrot.lane.b32.xlu1 %v7753_v14, %s5247_s20  ;;  %v7796_v49 = vpop.permute.xlu1 %2988  ;;  %9300 = vst [vmem:[#allocation24_spill] sm:$0xff] %v7801_v40  ;;  %9302 = vst [vmem:[#allocation79_spill] sm:$0xff] %v7806_v10  ;;  %v7852_v43 = vsel %vm287_vm0, 0.0, %v2562_v33  ;;  %v202_v33 = vld [vmem:[%s8817_s2] sm:$0xff] }
 0x3b0   : > { %3266 = vrot.lane.b32.xlu0 %v7758_v11, %s5247_s20  ;;  %v7787_v14 = vpop.permute.xlu0 %2982  ;;  %9299 = vst [vmem:[#allocation33_spill] sm:$0xff] %v7796_v49  ;;  %9304 = vst [vmem:[#allocation105_spill] sm:$0xff] %v7817_v48 }
 0x3b1   : > { %9297 = vst [vmem:[#allocation148_spill] sm:$0xff] %v7787_v14  ;;  %9306 = vst [vmem:[#allocation15_spill] sm:$0xff] %v7822_v37 }
 0x3b2   : > { %9308 = vst [vmem:[#allocation149_spill] sm:$0xff] %v7833_v4  ;;  %9310 = vst [vmem:[#allocation27_spill] sm:$0xff] %v7838_v52 }
 0x3b3   : > { %3272 = vrot.lane.b32.xlu1 %v7769_v35, %s5247_s20  ;;  %v7812_v14 = vpop.permute.xlu1 %2992  ;;  %9314 = vst [vmem:[#allocation81_spill] sm:$0xff] %v7852_v43 }
 0x3b4   : > { %3270 = vrot.lane.b32.xlu0 %v7774_v0, %s5247_s20  ;;  %v7803_v5 = vpop.permute.xlu0 %2986  ;;  %9303 = vst [vmem:[#allocation80_spill] sm:$0xff] %v7812_v14 }
 0x3b5   : > { %9301 = vst [vmem:[#allocation34_spill] sm:$0xff] %v7803_v5 }
 0x3b7   : > { %3276 = vrot.lane.b32.xlu1 %v7785_v47, %s5247_s20  ;;  %v7828_v5 = vpop.permute.xlu1 %2996  ;;  %v2793_v47 = vld [vmem:[#allocation2 + $0x68] sm:$0xff] }
 0x3b8   : > { %3274 = vrot.lane.b32.xlu0 %v7790_v27, %s5247_s20  ;;  %v7819_v49 = vpop.permute.xlu0 %2990  ;;  %9307 = vst [vmem:[#allocation16_spill] sm:$0xff] %v7828_v5 }
 0x3b9   : > { %9305 = vst [vmem:[#allocation106_spill] sm:$0xff] %v7819_v49 }
 0x3bb   : > { %3280 = vrot.lane.b32.xlu1 %v7801_v40, %s5247_s20 }
 0x3bc   : > { %3278 = vrot.lane.b32.xlu0 %v7806_v10, %s5247_s20  ;;  %v7835_v14 = vpop.permute.xlu0 %2994 }
 0x3bd   : > { %9309 = vst [vmem:[#allocation150_spill] sm:$0xff] %v7835_v14  ;;  %v7844_v49 = vpop.permute.xlu1 %3000 }
 0x3be   : > { %9311 = vst [vmem:[#allocation37_spill] sm:$0xff] %v7844_v49  ;;  %v203_v49 = vld [vmem:[%s8817_s2 + $0x8] sm:$0xff] }
 0x3bf   : > { %3284 = vrot.lane.b32.xlu1 %v7817_v48, %s5247_s20 }
 0x3c0   : > { %3282 = vrot.lane.b32.xlu0 %v7822_v37, %s5247_s20  ;;  %v7849_v62 = vpop.permute.xlu0 %2998 }
 0x3c1   : > { %9313 = vst [vmem:[#allocation38_spill] sm:$0xff] %v7849_v62 }
 0x3c3   : > { %3288 = vrot.lane.b32.xlu1 %v7833_v4, %s5247_s20 }
 0x3c4   : > { %3286 = vrot.lane.b32.xlu0 %v7838_v52, %s5247_s20 }
 0x3c5   : > { %v7858_v63 = vpop.permute.xlu1 %3004 }
 0x3c6   : > { %9315 = vst [vmem:[#allocation82_spill] sm:$0xff] %v7858_v63  ;;  %v7860_v5 = vpop.permute.xlu0 %3002  ;;  %v5200_v63 = vpack.c.bf16 %v203_v49, %v202_v33 }
 0x3c7   : > { %3292 = vrot.lane.b32.xlu1 %v7847_v31, %s5247_s20  ;;  %9316 = vst [vmem:[#allocation107_spill] sm:$0xff] %v7860_v5  ;;  %v2790_v5 = vld [vmem:[#allocation2 + $0x50] sm:$0xff] }
 0x3c8   : > { %3290 = vrot.lane.b32.xlu0 %v7852_v43, %s5247_s20  ;;  %5201 = vmatprep.subr.bf16.mxu1 %v5200_v63  ;;  %v2870_v43 = vrot.slane %v2790_v5, 7  ;;  %v3864_v10 = vrot.slane %v2790_v5, 1 }
 0x3c9   : > { %5203 = vmatpush3.bf16.msra.mxu1 %v5200_v63  ;;  %v206_v63 = vld [vmem:[%s8817_s2 + $0x20] sm:$0xf] }
 0x3cb   : > { %3348 = vrot.lane.b32.xlu1 %v7316_v13, %s5248_s21 }
 0x3cc   : > { %3346 = vrot.lane.b32.xlu0 %v7321_v38, %s5248_s21  ;;  %v204_v38 = vld [vmem:[%s8817_s2 + $0x10] sm:$0xff] }
 0x3cd   : > { %v7866_v61 = vpop.permute.xlu1 %3008 }
 0x3ce   : > { %9317 = vst [vmem:[#allocation108_spill] sm:$0xff] %v7866_v61  ;;  %v7874_v62 = vpop.permute.xlu0 %3006  ;;  %v205_v61 = vld [vmem:[%s8817_s2 + $0x18] sm:$0xff] }
 0x3cf   : > { %9318 = vst [vmem:[#allocation125_spill] sm:$0xff] %v7874_v62  ;;  %3540 = vrot.lane.b32.xlu1 %v7523_v58, %s5249_s22  ;;  %v5204_v49 = vpack.c.bf16 %v205_v61, %v204_v38 }
 0x3d0   : > { %3538 = vrot.lane.b32.xlu0 %v7529_v24, %s5249_s22 }
 0x3d1   : > { %v7880_v13 = vpop.permute.xlu1 %3140  ;;  %5205 = vmatprep.subr.bf16.mxu1 %v5204_v49 }
 0x3d2   : > { %v7888_v62 = vpop.permute.xlu0 %3138  ;;  %5207 = vmatpush3.bf16.msra.mxu1 %v5204_v49 }
 0x3d3   : > { %3652 = vrot.lane.b32.xlu1 %v7705_v8, %s5250_s23  ;;  %5142 = vmatprep.subr.msk.mxu1 %vm2155_vm2, %v206_v63 }
 0x3d4   : > { %3650 = vrot.lane.b32.xlu0 %v7710_v32, %s5250_s23 }
 0x3d5   : > { %v7894_v58 = vpop.permute.xlu1 %3144 }
 0x3d6   : > { %v7896_v24 = vpop.permute.xlu0 %3142  ;;  %5143 = vmatpush3.msk.msra.mxu1 %vm2155_vm2, %v206_v63 }
 0x3d7   : > { %3350 = vrot.lane.b32.xlu1 %v7330_v60, %s5248_s21 }
 0x3d8   : > { %3746 = vrot.lane.b32.xlu0 %v7330_v60, %s5251_s7  ;;  %v2789_v60 = vld [vmem:[#allocation2 + $0x48] sm:$0xff] }
 0x3d9   : > { %v7906_v61 = vpop.permute.xlu1 %3148  ;;  %v2869_v31 = vrot.slane %v2789_v60, 7  ;;  %v3863_v40 = vrot.slane %v2789_v60, 1 }
 0x3da   : > { %v7909_v33 = vpop.permute.xlu0 %3146 }
 0x3db   : > { %3938 = vrot.lane.b32.xlu1 %v7544_v29, %s5252_s8  ;;  %v2871_v52 = vsel %vm287_vm0, %v2869_v31, %v2870_v43 }
 0x3dc   : > { %3748 = vrot.lane.b32.xlu0 %v7326_v55, %s5251_s7 }
 0x3dd   : > { %v7915_v38 = vpop.permute.xlu1 %3152 }
 0x3de   : > { %v7917_v49 = vpop.permute.xlu0 %3150 }
 0x3df   : > { %3542 = vrot.lane.b32.xlu1 %v7544_v29, %s5249_s22 }
 0x3e0   : > { %3352 = vrot.lane.b32.xlu0 %v7326_v55, %s5248_s21  ;;  %v2931_v55 = vsel %vm287_vm0, 0.0, %v2869_v31 }
 0x3e1   : > { %v7923_v63 = vpop.permute.xlu1 %3156 }
 0x3e2   : > { %v7925_v14 = vpop.permute.xlu0 %3154 }
 0x3e3   : > { %3544 = vrot.lane.b32.xlu1 %v7537_v21, %s5249_s22 }
 0x3e4   : > { %3940 = vrot.lane.b32.xlu0 %v7537_v21, %s5252_s8 }
 0x3e5   : > { %v7931_v4 = vpop.permute.xlu1 %3160 }
 0x3e6   : > { %v7933_v29 = vpop.permute.xlu0 %3158 }
 0x3e7   : > { %3656 = vrot.lane.b32.xlu1 %v2871_v52, %s5250_s23  ;;  %v3865_v52 = vsel %vm818_vm1, %v3863_v40, %v3864_v10 }
 0x3e8   : > { %3654 = vrot.lane.b32.xlu0 %v2931_v55, %s5250_s23 }
 0x3e9   : > { %v7939_v48 = vpop.permute.xlu1 %3164 }
 0x3ea   : > { %9319 = vst [vmem:[#allocation126_spill] sm:$0xff] %v7939_v48  ;;  %v7941_v37 = vpop.permute.xlu0 %3162 }
 0x3eb   : > { %3354 = vrot.lane.b32.xlu1 %v7339_v9, %s5248_s21  ;;  %v2792_v9 = vld [vmem:[#allocation2 + $0x60] sm:$0xff] }
 0x3ec   : > { %3750 = vrot.lane.b32.xlu0 %v2789_v60, %s5251_s7  ;;  %v2872_v40 = vrot.slane %v2792_v9, 7 }
 0x3ed   : > { %v7946_v21 = vpop.permute.xlu1 %3168 }
 0x3ee   : > { %9320 = vst [vmem:[#allocation151_spill] sm:$0xff] %v7946_v21  ;;  %v7948_v43 = vpop.permute.xlu0 %3166 }
 0x3ef   : > { %9321 = vst [vmem:[#allocation152_spill] sm:$0xff] %v7948_v43  ;;  %3942 = vrot.lane.b32.xlu1 %v3865_v52, %s5252_s8  ;;  %v2873_v52 = vrot.slane %v2793_v47, 7 }
 0x3f0   : > { %3752 = vrot.lane.b32.xlu0 %v2790_v5, %s5251_s7  ;;  %v9326_v5 = vrot.slane %v7531_v51, 1  ;;  %v3868_v51 = vrot.slane %v2792_v9, 1 }
 0x3f1   : > { %v7953_v31 = vpop.permute.xlu1 %3172 }
 0x3f2   : > { %9322 = vst [vmem:[#allocation31_spill] sm:$0xff] %v7953_v31  ;;  %v7955_v55 = vpop.permute.xlu0 %3170  ;;  %v3867_v31 = vsel %vm818_vm1, %v3864_v10, %v9326_v5  ;;  %v3869_v10 = vrot.slane %v2793_v47, 1 }
 0x3f3   : > { %9323 = vst [vmem:[#allocation41_spill] sm:$0xff] %v7955_v55  ;;  %3546 = vrot.lane.b32.xlu1 %v7561_v12, %s5249_s22 }
 0x3f4   : > { %3356 = vrot.lane.b32.xlu0 %v7334_v44, %s5248_s21  ;;  %v2874_v44 = vsel %vm287_vm0, %v2872_v40, %v2873_v52  ;;  %v3870_v5 = vsel %vm818_vm1, %v3868_v51, %v3869_v10 }
 0x3f5   : > { %v7961_v60 = vpop.permute.xlu1 %3176 }
 0x3f6   : > { %9324 = vst [vmem:[#allocation32_spill] sm:$0xff] %v7961_v60  ;;  %v7963_v21 = vpop.permute.xlu0 %3174  ;;  %v2932_v60 = vsel %vm287_vm0, 0.0, %v2872_v40 }
 0x3f7   : > { %9325 = vst [vmem:[#allocation42_spill] sm:$0xff] %v7963_v21  ;;  %3548 = vrot.lane.b32.xlu1 %v7554_v18, %s5249_s22 }
 0x3f8   : > { %3944 = vrot.lane.b32.xlu0 %v3867_v31, %s5252_s8 }
 0x3f9   : > { %v7971_v12 = vpop.permute.xlu1 %3180 }
 0x3fa   : > { %9327 = vst [vmem:[#allocation83_spill] sm:$0xff] %v7971_v12  ;;  %v7973_v55 = vpop.permute.xlu0 %3178 }
 0x3fb   : > { %9328 = vst [vmem:[#allocation84_spill] sm:$0xff] %v7973_v55  ;;  %3660 = vrot.lane.b32.xlu1 %v2874_v44, %s5250_s23  ;;  %v2796_v44 = vld [vmem:[#allocation2 + $0x80] sm:$0xff] }
 0x3fc   : > { %3658 = vrot.lane.b32.xlu0 %v2932_v60, %s5250_s23 }
 0x3fd   : > { %v7979_v21 = vpop.permute.xlu1 %3184 }
 0x3fe   : > { %9329 = vst [vmem:[#allocation109_spill] sm:$0xff] %v7979_v21  ;;  %v7981_v18 = vpop.permute.xlu0 %3182 }
 0x3ff   : > { %9330 = vst [vmem:[#allocation110_spill] sm:$0xff] %v7981_v18  ;;  %3358 = vrot.lane.b32.xlu1 %v7349_v39, %s5248_s21  ;;  %v2795_v39 = vld [vmem:[#allocation2 + $0x78] sm:$0xff] }
 0x400   : > { %3754 = vrot.lane.b32.xlu0 %v2792_v9, %s5251_s7  ;;  %v2875_v51 = vrot.slane %v2795_v39, 7 }
 0x401   : > { %v7986_v31 = vpop.permute.xlu1 %3188 }
 0x402   : > { %9331 = vst [vmem:[#allocation127_spill] sm:$0xff] %v7986_v31  ;;  %v7988_v52 = vpop.permute.xlu0 %3186 }
 0x403   : > { %9332 = vst [vmem:[#allocation128_spill] sm:$0xff] %v7988_v52  ;;  %3946 = vrot.lane.b32.xlu1 %v3870_v5, %s5252_s8  ;;  %v2876_v5 = vrot.slane %v2796_v44, 7 }
 0x404   : > { %3756 = vrot.lane.b32.xlu0 %v2793_v47, %s5251_s7  ;;  %v9337_v47 = vrot.slane %v7546_v22, 1  ;;  %v3873_v22 = vrot.slane %v2795_v39, 1 }
 0x405   : > { %v7993_v60 = vpop.permute.xlu1 %3192 }
 0x406   : > { %9333 = vst [vmem:[#allocation153_spill] sm:$0xff] %v7993_v60  ;;  %v7995_v40 = vpop.permute.xlu0 %3190  ;;  %v3872_v60 = vsel %vm818_vm1, %v3869_v10, %v9337_v47  ;;  %v3874_v10 = vrot.slane %v2796_v44, 1 }
 0x407   : > { %9334 = vst [vmem:[#allocation35_spill] sm:$0xff] %v7995_v40  ;;  %3550 = vrot.lane.b32.xlu1 %v7578_v23, %s5249_s22 }
 0x408   : > { %3360 = vrot.lane.b32.xlu0 %v7344_v25, %s5248_s21  ;;  %v2877_v25 = vsel %vm287_vm0, %v2875_v51, %v2876_v5  ;;  %v3875_v47 = vsel %vm818_vm1, %v3873_v22, %v3874_v10 }
 0x409   : > { %v8001_v9 = vpop.permute.xlu1 %3196 }
 0x40a   : > { %9335 = vst [vmem:[#allocation45_spill] sm:$0xff] %v8001_v9  ;;  %v8003_v31 = vpop.permute.xlu0 %3194  ;;  %v2933_v9 = vsel %vm287_vm0, 0.0, %v2875_v51 }
 0x40b   : > { %9336 = vst [vmem:[#allocation36_spill] sm:$0xff] %v8003_v31  ;;  %3552 = vrot.lane.b32.xlu1 %v7571_v28, %s5249_s22 }
 0x40c   : > { %3948 = vrot.lane.b32.xlu0 %v3872_v60, %s5252_s8 }
 0x40d   : > { %v8011_v23 = vpop.permute.xlu1 %3200 }
 0x40e   : > { %9338 = vst [vmem:[#allocation46_spill] sm:$0xff] %v8011_v23  ;;  %v8013_v40 = vpop.permute.xlu0 %3198 }
 0x40f   : > { %9339 = vst [vmem:[#allocation85_spill] sm:$0xff] %v8013_v40  ;;  %3664 = vrot.lane.b32.xlu1 %v2877_v25, %s5250_s23  ;;  %v2799_v25 = vld [vmem:[#allocation2 + $0x98] sm:$0xff] }
 0x410   : > { %3662 = vrot.lane.b32.xlu0 %v2933_v9, %s5250_s23 }
 0x411   : > { %v8019_v31 = vpop.permute.xlu1 %3252 }
 0x412   : > { %v8021_v28 = vpop.permute.xlu0 %3250 }
 0x413   : > { %3362 = vrot.lane.b32.xlu1 %v7359_v41, %s5248_s21  ;;  %v2798_v41 = vld [vmem:[#allocation2 + $0x90] sm:$0xff] }
 0x414   : > { %3758 = vrot.lane.b32.xlu0 %v2795_v39, %s5251_s7  ;;  %v2878_v22 = vrot.slane %v2798_v41, 7 }
 0x415   : > { %v8026_v60 = vpop.permute.xlu1 %3256 }
 0x416   : > { %v8028_v5 = vpop.permute.xlu0 %3254  ;;  %v2934_v21 = vsel %vm287_vm0, 0.0, %v2878_v22 }
 0x417   : > { %3950 = vrot.lane.b32.xlu1 %v3875_v47, %s5252_s8  ;;  %v2879_v47 = vrot.slane %v2799_v25, 7 }
 0x418   : > { %3760 = vrot.lane.b32.xlu0 %v2796_v44, %s5251_s7  ;;  %v9340_v44 = vrot.slane %v7563_v6, 1  ;;  %v3878_v6 = vrot.slane %v2798_v41, 1 }
 0x419   : > { %v8033_v9 = vpop.permute.xlu1 %3260 }
 0x41a   : > { %v8035_v51 = vpop.permute.xlu0 %3258  ;;  %v3877_v40 = vsel %vm818_vm1, %v3874_v10, %v9340_v44  ;;  %v3879_v10 = vrot.slane %v2799_v25, 1 }
 0x41b   : > { %3554 = vrot.lane.b32.xlu1 %v7595_v20, %s5249_s22 }
 0x41c   : > { %3364 = vrot.lane.b32.xlu0 %v7354_v54, %s5248_s21  ;;  %v2880_v54 = vsel %vm287_vm0, %v2878_v22, %v2879_v47  ;;  %v3880_v44 = vsel %vm818_vm1, %v3878_v6, %v3879_v10 }
 0x41d   : > { %v8041_v39 = vpop.permute.xlu1 %3264 }
 0x41e   : > { %v8043_v23 = vpop.permute.xlu0 %3262 }
 0x41f   : > { %3556 = vrot.lane.b32.xlu1 %v7588_v26, %s5249_s22 }
 0x420   : > { %3952 = vrot.lane.b32.xlu0 %v3877_v40, %s5252_s8 }
 0x421   : > { %v8051_v20 = vpop.permute.xlu1 %3268 }
 0x422   : > { %v8053_v52 = vpop.permute.xlu0 %3266 }
 0x423   : > { %3668 = vrot.lane.b32.xlu1 %v2880_v54, %s5250_s23  ;;  %v2802_v54 = vld [vmem:[#allocation2 + $0xb0] sm:$0xff] }
 0x424   : > { %3666 = vrot.lane.b32.xlu0 %v2934_v21, %s5250_s23 }
 0x425   : > { %v8059_v18 = vpop.permute.xlu1 %3272 }
 0x426   : > { %v8061_v26 = vpop.permute.xlu0 %3270 }
 0x427   : > { %3366 = vrot.lane.b32.xlu1 %v7369_v56, %s5248_s21  ;;  %v2801_v56 = vld [vmem:[#allocation2 + $0xa8] sm:$0xff] }
 0x428   : > { %3762 = vrot.lane.b32.xlu0 %v2798_v41, %s5251_s7  ;;  %v2881_v6 = vrot.slane %v2801_v56, 7 }
 0x429   : > { %v8066_v40 = vpop.permute.xlu1 %3276 }
 0x42a   : > { %9341 = vst [vmem:[#allocation86_spill] sm:$0xff] %v8066_v40  ;;  %v8068_v47 = vpop.permute.xlu0 %3274 }
 0x42b   : > { %3954 = vrot.lane.b32.xlu1 %v3880_v44, %s5252_s8  ;;  %v2882_v44 = vrot.slane %v2802_v54, 7 }
 0x42c   : > { %3764 = vrot.lane.b32.xlu0 %v2799_v25, %s5251_s7  ;;  %v9346_v25 = vrot.slane %v7580_v15, 1  ;;  %v3883_v15 = vrot.slane %v2801_v56, 1 }
 0x42d   : > { %v8073_v21 = vpop.permute.xlu1 %3280 }
 0x42e   : > { %9342 = vst [vmem:[#allocation111_spill] sm:$0xff] %v8073_v21  ;;  %v8075_v22 = vpop.permute.xlu0 %3278  ;;  %v3882_v55 = vsel %vm818_vm1, %v3879_v10, %v9346_v25  ;;  %v3884_v10 = vrot.slane %v2802_v54, 1 }
 0x42f   : > { %9343 = vst [vmem:[#allocation112_spill] sm:$0xff] %v8075_v22  ;;  %3558 = vrot.lane.b32.xlu1 %v7611_v53, %s5249_s22  ;;  %v9352_v22 = vrot.slane %v7216_v30, 7 }
 0x430   : > { %3368 = vrot.lane.b32.xlu0 %v7364_v57, %s5248_s21  ;;  %v2883_v57 = vsel %vm287_vm0, %v2881_v6, %v2882_v44  ;;  %v3885_v44 = vsel %vm818_vm1, %v3883_v15, %v3884_v10  ;;  %v3887_v30 = vsel %vm818_vm1, %v3884_v10, %v7605_v46 }
 0x431   : > { %v8081_v41 = vpop.permute.xlu1 %3284  ;;  %v2609_v15 = vsel %vm287_vm0, 0.0, %v9352_v22 }
 0x432   : > { %9344 = vst [vmem:[#allocation129_spill] sm:$0xff] %v8081_v41  ;;  %v8083_v12 = vpop.permute.xlu0 %3282  ;;  %v2935_v41 = vsel %vm287_vm0, 0.0, %v2881_v6 }
 0x433   : > { %9345 = vst [vmem:[#allocation130_spill] sm:$0xff] %v8083_v12  ;;  %3560 = vrot.lane.b32.xlu1 %v7603_v2, %s5249_s22 }
 0x434   : > { %3956 = vrot.lane.b32.xlu0 %v3882_v55, %s5252_s8 }
 0x435   : > { %v8091_v53 = vpop.permute.xlu1 %3288 }
 0x436   : > { %9347 = vst [vmem:[#allocation39_spill] sm:$0xff] %v8091_v53  ;;  %v8093_v21 = vpop.permute.xlu0 %3286 }
 0x437   : > { %9348 = vst [vmem:[#allocation49_spill] sm:$0xff] %v8093_v21  ;;  %3672 = vrot.lane.b32.xlu1 %v2883_v57, %s5250_s23  ;;  %v5228_v57 = vld [vmem:[#allocation2 + $0xb0] sm:$0xff]  ;;  %v2804_v21 = vld [vmem:[#allocation2 + $0xc0] sm:$0xff] }
 0x438   : > { %3670 = vrot.lane.b32.xlu0 %v2935_v41, %s5250_s23  ;;  %v3489_v53 = vrot.slane %v5228_v57, 1  ;;  %v2884_v27 = vrot.slane %v2804_v21, 7 }
 0x439   : > { %v8099_v12 = vpop.permute.xlu1 %3292 }
 0x43a   : > { %9349 = vst [vmem:[#allocation40_spill] sm:$0xff] %v8099_v12  ;;  %v8101_v2 = vpop.permute.xlu0 %3290  ;;  %v9351_v12 = vrot.slane %v7379_v19, 1 }
 0x43b   : > { %9350 = vst [vmem:[#allocation50_spill] sm:$0xff] %v8101_v2  ;;  %3370 = vrot.lane.b32.xlu1 %v7379_v19, %s5248_s21 }
 0x43c   : > { %3766 = vrot.lane.b32.xlu0 %v2801_v56, %s5251_s7  ;;  %v3490_v2 = vsel %vm818_vm1, %v9351_v12, %v3489_v53  ;;  %v8113_v56 = vld [vmem:[#allocation2 + $0xc8] sm:$0xff]  ;;  %v4034_v12 = vsel %vm171_vm3, %v2609_v15, %v7647_v45 }
 0x43d   : > { %v3349_v55 = vpop.permute.xlu1 %3348  ;;  %v2885_v19 = vrot.slane %v8113_v56, 7  ;;  %v4066_v22 = vsel %vm1827_vm4, %v4034_v12, %v7888_v62  ;;  %v3889_v12 = vrot.slane %v8113_v56, 1 }
 0x43e   : > { %v3347_v25 = vpop.permute.xlu0 %3346 }
 0x43f   : > { %3958 = vrot.lane.b32.xlu1 %v3885_v44, %s5252_s8  ;;  %v2886_v48 = vsel %vm287_vm0, %v2884_v27, %v2885_v19  ;;  %v5229_v19 = vld [vmem:[#allocation2 + $0xc0] sm:$0xff] }
 0x440   : > { %3768 = vrot.lane.b32.xlu0 %v2802_v54, %s5251_s7  ;;  %v3492_v54 = vsel %vm818_vm1, %v3489_v53, %v7605_v46  ;;  %v2936_v46 = vsel %vm287_vm0, 0.0, %v2884_v27  ;;  %v4035_v27 = vsel %vm171_vm3, %v7310_v16, %v7643_v34  ;;  %v2648_v16 = vld [vmem:[#allocation2 + $0xd0] sm:$0xff] }
 0x441   : > { %v3541_v41 = vpop.permute.xlu1 %3540 }
 0x442   : > { %v3539_v6 = vpop.permute.xlu0 %3538 }
 0x443   : > { %3562 = vrot.lane.b32.xlu1 %v3490_v2, %s5249_s22  ;;  %v4098_v2 = vsel %vm1860_vm5, %v4066_v22, %v8021_v28  ;;  %v3493_v22 = vrot.slane %v5229_v19, 1 }
 0x444   : > { %3372 = vrot.lane.b32.xlu0 %v5228_v57, %s5248_s21  ;;  %v4130_v57 = vsel %vm1893_vm6, %v4098_v2, %v3347_v25  ;;  %v3888_v25 = vrot.slane %v2804_v21, 1  ;;  %v5230_v2 = vld [vmem:[#allocation2 + $0xc8] sm:$0xff] }
 0x445   : > { %v3653_v44 = vpop.permute.xlu1 %3652  ;;  %v4162_v45 = vsel %vm1926_vm7, %v4130_v57, %v3539_v6  ;;  %v3494_v57 = vrot.slane %v5230_v2, 1 }
 0x446   : > { %v3651_v43 = vpop.permute.xlu0 %3650 }
 0x447   : > { %3564 = vrot.lane.b32.xlu1 %v3492_v54, %s5249_s22  ;;  %v4194_v10 = vsel %vm1959_vm8, %v4162_v45, %v3651_v43 }
 0x448   : > { %3960 = vrot.lane.b32.xlu0 %v3887_v30, %s5252_s8  ;;  %v3890_v30 = vsel %vm818_vm1, %v3888_v25, %v3889_v12 }
 0x449   : > { %v3351_v53 = vpop.permute.xlu1 %3350 }
 0x44a   : > { %v3747_v40 = vpop.permute.xlu0 %3746 }
 0x44b   : > { %3676 = vrot.lane.b32.xlu1 %v2886_v48, %s5250_s23  ;;  %v4226_v62 = vsel %vm1992_vm9, %v4194_v10, %v3747_v40  ;;  %v4067_v48 = vsel %vm1827_vm4, %v4035_v27, %v7880_v13  ;;  %v3495_v10 = vsel %vm818_vm1, %v3493_v22, %v3494_v57 }
 0x44c   : > { %3674 = vrot.lane.b32.xlu0 %v2936_v46, %s5250_s23  ;;  %v4099_v40 = vsel %vm1860_vm5, %v4067_v48, %v8019_v31 }
 0x44d   : > { %v3939_v15 = vpop.permute.xlu1 %3938  ;;  %v4131_v45 = vsel %vm1893_vm6, %v4099_v40, %v3349_v55  ;;  %v2807_v55 = vld [vmem:[#allocation2 + $0xd8] sm:$0xff] }
 0x44e   : > { %v3749_v28 = vpop.permute.xlu0 %3748  ;;  %v4258_v54 = vsel %vm2025_vm10, %v4226_v62, %v3939_v15  ;;  %v4163_v34 = vsel %vm1926_vm7, %v4131_v45, %v3541_v41  ;;  %v3496_v62 = vrot.slane %v2648_v16, 1 }
 0x44f   : > { %3374 = vrot.lane.b32.xlu1 %v5229_v19, %s5248_s21  ;;  %5144 = vmatprep.mubr.msk.f32.mxu1 %vm2058_vm11, %v4258_v54  ;;  %v4195_v13 = vsel %vm1959_vm8, %v4163_v34, %v3653_v44  ;;  %v8163_v54 = vld [vmem:[#allocation2 + $0xe0] sm:$0xff]  ;;  %v4036_v19 = vsel %vm171_vm3, %v7694_v36, %v7658_v59 }
 0x450   : > { %3770 = vrot.lane.b32.xlu0 %v2804_v21, %s5251_s7  ;;  %v4227_v31 = vsel %vm1992_vm9, %v4195_v13, %v3749_v28  ;;  %v3497_v44 = vsel %vm818_vm1, %v3494_v57, %v3496_v62  ;;  %v2887_v28 = vrot.slane %v2807_v55, 7  ;;  %v2888_v25 = vrot.slane %v8163_v54, 7  ;;  %v5231_v13 = vld [vmem:[#allocation2 + $0xd8] sm:$0xff] }
 0x451   : > { %v3543_v43 = vpop.permute.xlu1 %3542  ;;  %v3892_v27 = vsel %vm818_vm1, %v3889_v12, %v3496_v62  ;;  %v4068_v48 = vsel %vm1827_vm4, %v4036_v19, %v7896_v24  ;;  %v3894_v34 = vrot.slane %v8163_v54, 1 }
 0x452   : > { %v3353_v6 = vpop.permute.xlu0 %3352  ;;  %v4100_v40 = vsel %vm1860_vm5, %v4068_v48, %v8028_v5  ;;  %v2889_v57 = vsel %vm287_vm0, %v2887_v28, %v2888_v25  ;;  %v2937_v36 = vsel %vm287_vm0, 0.0, %v2887_v28 }
 0x453   : > { %3962 = vrot.lane.b32.xlu1 %v3890_v30, %s5252_s8  ;;  %v4132_v22 = vsel %vm1893_vm6, %v4100_v40, %v3351_v53  ;;  %v3893_v53 = vrot.slane %v2807_v55, 1 }
 0x454   : > { %3772 = vrot.lane.b32.xlu0 %v8113_v56, %s5251_s7  ;;  %v4164_v59 = vsel %vm1926_vm7, %v4132_v22, %v3543_v43  ;;  %v4037_v43 = vsel %vm171_vm3, %v7689_v1, %v7656_v7  ;;  %v2651_v7 = vld [vmem:[#allocation2 + $0xe8] sm:$0xff]  ;;  %v8210_v22 = vld [vmem:[#allocation2 + $0xf8] sm:$0xff] }
 0x455   : > { %v3545_v21 = vpop.permute.xlu1 %3544  ;;  %v3501_v48 = vrot.slane %v2651_v7, 1 }
 0x456   : > { %v3941_v46 = vpop.permute.xlu0 %3940 }
 0x457   : > { %v4259_v15 = vsel %vm2025_vm10, %v4227_v31, %v3941_v46  ;;  %3566 = vrot.lane.b32.xlu1 %v3495_v10, %s5249_s22  ;;  %v4069_v31 = vsel %vm1827_vm4, %v4037_v43, %v7894_v58 }
 0x458   : > { %3376 = vrot.lane.b32.xlu0 %v5230_v2, %s5248_s21  ;;  %5145 = vmatmul.mubr.msk.f32.vlgmr.msra.gmra.mrb[0].mxu1 %vm2058_vm11, %v4259_v15  ;;  %v4101_v10 = vsel %vm1860_vm5, %v4069_v31, %v8026_v60  ;;  %v3895_v15 = vsel %vm818_vm1, %v3893_v53, %v3894_v34  ;;  %v3899_v31 = vrot.slane %v8210_v22, 1 }
 0x459   : > { %v3657_v41 = vpop.permute.xlu1 %3656  ;;  %v4133_v25 = vsel %vm1893_vm6, %v4101_v10, %v3353_v6  ;;  %v2810_v6 = vld [vmem:[#allocation2 + $0xf0] sm:$0xff] }
 0x45a   : > { %v3655_v56 = vpop.permute.xlu0 %3654  ;;  %v4165_v1 = vsel %vm1926_vm7, %v4133_v25, %v3545_v21  ;;  %v5233_v10 = vld [vmem:[#allocation2 + $0xf0] sm:$0xff] }
 0x45b   : > { %3568 = vrot.lane.b32.xlu1 %v3497_v44, %s5249_s22  ;;  %v4196_v12 = vsel %vm1959_vm8, %v4164_v59, %v3655_v56  ;;  %v3498_v56 = vrot.slane %v5231_v13, 1  ;;  %v5232_v44 = vld [vmem:[#allocation2 + $0xe0] sm:$0xff]  ;;  %v4197_v58 = vsel %vm1959_vm8, %v4165_v1, %v3657_v41  ;;  %v4038_v59 = vsel %vm171_vm3, %v7710_v32, %v7674_v17  ;;  %v5234_v1 = vld [vmem:[#allocation2 + $0xf8] sm:$0xff] }
 0x45c   : > { %3964 = vrot.lane.b32.xlu0 %v3892_v27, %s5252_s8  ;;  %v3499_v28 = vrot.slane %v5232_v44, 1  ;;  %v3503_v7 = vrot.slane %v5233_v10, 1 }
 0x45d   : > { %v3355_v30 = vpop.permute.xlu1 %3354 }
 0x45e   : > { %v3751_v2 = vpop.permute.xlu0 %3750  ;;  %v3500_v27 = vsel %vm818_vm1, %v3498_v56, %v3499_v28  ;;  %v3502_v41 = vsel %vm818_vm1, %v3499_v28, %v3501_v48 }
 0x45f   : > { %3680 = vrot.lane.b32.xlu1 %v2889_v57, %s5250_s23  ;;  %v4228_v24 = vsel %vm1992_vm9, %v4196_v12, %v3751_v2  ;;  %v2890_v2 = vrot.slane %v2810_v6, 7  ;;  %v2891_v57 = vrot.slane %v8210_v22, 7  ;;  %v4070_v12 = vsel %vm1827_vm4, %v4038_v59, %v7909_v33 }
 0x460   : > { %3678 = vrot.lane.b32.xlu0 %v2937_v36, %s5250_s23  ;;  %v3897_v36 = vsel %vm818_vm1, %v3894_v34, %v3501_v48 }
 0x461   : > { %v3943_v45 = vpop.permute.xlu1 %3942  ;;  %v2892_v53 = vsel %vm287_vm0, %v2890_v2, %v2891_v57  ;;  %v2938_v32 = vsel %vm287_vm0, 0.0, %v2890_v2  ;;  %v4040_v57 = vsel %vm171_vm3, %v7726_v50, %v7691_v42 }
 0x462   : > { %v4260_v5 = vsel %vm2025_vm10, %v4228_v24, %v3943_v45  ;;  %v3753_v16 = vpop.permute.xlu0 %3752  ;;  %v4102_v24 = vsel %vm1860_vm5, %v4070_v12, %v8035_v51 }
 0x463   : > { %3378 = vrot.lane.b32.xlu1 %v5231_v13, %s5248_s21  ;;  %5147 = vmatprep.mubr.msk.f32.mxu1 %vm2058_vm11, %v4260_v5  ;;  %v4229_v60 = vsel %vm1992_vm9, %v4197_v58, %v3753_v16  ;;  %v4134_v5 = vsel %vm1893_vm6, %v4102_v24, %v3355_v30  ;;  %v3898_v30 = vrot.slane %v2810_v6, 1  ;;  %v3504_v58 = vrot.slane %v5234_v1, 1 }
 0x464   : > { %3774 = vrot.lane.b32.xlu0 %v2807_v55, %s5251_s7 }
 0x465   : > { %v3547_v46 = vpop.permute.xlu1 %3546  ;;  %v3900_v25 = vsel %vm818_vm1, %v3898_v30, %v3899_v31  ;;  %v3505_v48 = vsel %vm818_vm1, %v3503_v7, %v3504_v58 }
 0x466   : > { %v3357_v62 = vpop.permute.xlu0 %3356  ;;  %v4166_v17 = vsel %vm1926_vm7, %v4134_v5, %v3547_v46  ;;  %v4039_v46 = vsel %vm171_vm3, %v7705_v8, %v7671_v3  ;;  %v2654_v3 = vld [vmem:[#allocation2 + $0x100] sm:$0xff] }
 0x467   : > { %3966 = vrot.lane.b32.xlu1 %v3895_v15, %s5252_s8  ;;  %v4071_v15 = vsel %vm1827_vm4, %v4039_v46, %v7906_v61 }
 0x468   : > { %3776 = vrot.lane.b32.xlu0 %v8163_v54, %s5251_s7 }
 0x469   : > { %v3549_v55 = vpop.permute.xlu1 %3548 }
 0x46a   : > { %v3945_v19 = vpop.permute.xlu0 %3944 }
 0x46b   : > { %v4261_v40 = vsel %vm2025_vm10, %v4229_v60, %v3945_v19  ;;  %3570 = vrot.lane.b32.xlu1 %v3500_v27, %s5249_s22 }
 0x46c   : > { %3380 = vrot.lane.b32.xlu0 %v5232_v44, %s5248_s21  ;;  %5148 = vmatmul.mubr.msk.f32.gmra.mrb[2].mxu1 %vm2058_vm11, %v4261_v40  ;;  %v4103_v44 = vsel %vm1860_vm5, %v4071_v15, %v8033_v9  ;;  %v3506_v40 = vrot.slane %v2654_v3, 1 }
 0x46d   : > { %v3661_v21 = vpop.permute.xlu1 %3660  ;;  %v4135_v60 = vsel %vm1893_vm6, %v4103_v44, %v3357_v62  ;;  %v2813_v62 = vld [vmem:[#allocation2 + $0x108] sm:$0xff] }
 0x46e   : > { %v3659_v54 = vpop.permute.xlu0 %3658  ;;  %v4167_v8 = vsel %vm1926_vm7, %v4135_v60, %v3549_v55  ;;  %v3902_v59 = vsel %vm818_vm1, %v3899_v31, %v3506_v40 }
 0x46f   : > { %3572 = vrot.lane.b32.xlu1 %v3502_v41, %s5249_s22  ;;  %v4198_v34 = vsel %vm1959_vm8, %v4166_v17, %v3659_v54  ;;  %v4199_v61 = vsel %vm1959_vm8, %v4167_v8, %v3661_v21  ;;  %v8257_v54 = vld [vmem:[#allocation2 + $0x110] sm:$0xff]  ;;  %v3507_v21 = vsel %vm818_vm1, %v3504_v58, %v3506_v40  ;;  %v2893_v41 = vrot.slane %v2813_v62, 7  ;;  %v2657_v58 = vld [vmem:[#allocation2 + $0x118] sm:$0xff] }
 0x470   : > { %3968 = vrot.lane.b32.xlu0 %v3897_v36, %s5252_s8  ;;  %v2894_v2 = vrot.slane %v8257_v54, 7  ;;  %v4072_v36 = vsel %vm1827_vm4, %v4040_v57, %v7917_v49 }
 0x471   : > { %v3359_v45 = vpop.permute.xlu1 %3358  ;;  %v4104_v12 = vsel %vm1860_vm5, %v4072_v36, %v8043_v23  ;;  %v2939_v50 = vsel %vm287_vm0, 0.0, %v2893_v41 }
 0x472   : > { %v3755_v16 = vpop.permute.xlu0 %3754  ;;  %v4136_v5 = vsel %vm1893_vm6, %v4104_v12, %v3359_v45  ;;  %v3903_v45 = vrot.slane %v2813_v62, 1 }
 0x473   : > { %3684 = vrot.lane.b32.xlu1 %v2892_v53, %s5250_s23  ;;  %v4230_v33 = vsel %vm1992_vm9, %v4198_v34, %v3755_v16  ;;  %v2895_v53 = vsel %vm287_vm0, %v2893_v41, %v2894_v2  ;;  %v2817_v41 = vld [vmem:[#allocation2 + $0x128] sm:$0xff] }
 0x474   : > { %3682 = vrot.lane.b32.xlu0 %v2938_v32, %s5250_s23 }
 0x475   : > { %v3947_v13 = vpop.permute.xlu1 %3946 }
 0x476   : > { %v4262_v51 = vsel %vm2025_vm10, %v4230_v33, %v3947_v13  ;;  %v3757_v43 = vpop.permute.xlu0 %3756  ;;  %v3904_v33 = vrot.slane %v8257_v54, 1  ;;  %v5235_v13 = vld [vmem:[#allocation2 + $0x108] sm:$0xff] }
 0x477   : > { %3382 = vrot.lane.b32.xlu1 %v5233_v10, %s5248_s21  ;;  %5150 = vmatprep.mubr.msk.f32.mxu1 %vm2058_vm11, %v4262_v51  ;;  %v4231_v9 = vsel %vm1992_vm9, %v4199_v61, %v3757_v43  ;;  %v9353_v51 = vld [vmem:[#allocation13_spill] sm:$0xff]  ;;  %v3508_v44 = vrot.slane %v5235_v13, 1 }
 0x478   : > { %3778 = vrot.lane.b32.xlu0 %v2810_v6, %s5251_s7  ;;  %v9354_v43 = vld [vmem:[#allocation17_spill] sm:$0xff] }
 0x479   : > { %v3551_v56 = vpop.permute.xlu1 %3550  ;;  %v4041_v30 = vsel %vm171_vm3, %v9354_v43, %v9353_v51  ;;  %v3909_v51 = vrot.slane %v2817_v41, 1 }
 0x47a   : > { %v3361_v28 = vpop.permute.xlu0 %3360  ;;  %v4168_v42 = vsel %vm1926_vm7, %v4136_v5, %v3551_v56  ;;  %v4073_v31 = vsel %vm1827_vm4, %v4041_v30, %v7915_v38  ;;  %v3905_v56 = vsel %vm818_vm1, %v3903_v45, %v3904_v33 }
 0x47b   : > { %3970 = vrot.lane.b32.xlu1 %v3900_v25, %s5252_s8  ;;  %v4105_v46 = vsel %vm1860_vm5, %v4073_v31, %v8041_v39  ;;  %v5236_v25 = vld [vmem:[#allocation2 + $0x110] sm:$0xff] }
 0x47c   : > { %3780 = vrot.lane.b32.xlu0 %v8210_v22, %s5251_s7  ;;  %v3509_v7 = vrot.slane %v5236_v25, 1 }
 0x47d   : > { %v3553_v19 = vpop.permute.xlu1 %3552 }
 0x47e   : > { %v3949_v27 = vpop.permute.xlu0 %3948  ;;  %v3510_v61 = vsel %vm818_vm1, %v3508_v44, %v3509_v7  ;;  %v2660_v44 = vld [vmem:[#allocation2 + $0x130] sm:$0xff] }
 0x47f   : > { %v4263_v6 = vsel %vm2025_vm10, %v4231_v9, %v3949_v27  ;;  %3574 = vrot.lane.b32.xlu1 %v3505_v48, %s5249_s22  ;;  %v3511_v9 = vrot.slane %v2657_v58, 1 }
 0x480   : > { %3384 = vrot.lane.b32.xlu0 %v5234_v1, %s5248_s21  ;;  %5151 = vmatmul.mubr.msk.f32.gmra.mrb[4].mxu1 %vm2058_vm11, %v4263_v6  ;;  %v4137_v1 = vsel %vm1893_vm6, %v4105_v46, %v3361_v28  ;;  %v2658_v28 = vld [vmem:[#allocation2 + $0x120] sm:$0xff] }
 0x481   : > { %v3665_v55 = vpop.permute.xlu1 %3664  ;;  %v4169_v60 = vsel %vm1926_vm7, %v4137_v1, %v3553_v19  ;;  %v3512_v40 = vsel %vm818_vm1, %v3509_v7, %v3511_v9  ;;  %v2738_v6 = vrot.slane %v2658_v28, 7  ;;  %v3516_v7 = vrot.slane %v2660_v44, 1  ;;  %v9359_v1 = vld [vmem:[#allocation25_spill] sm:$0xff]  ;;  %v2823_v44 = vld [vmem:[#allocation2 + $0x158] sm:$0xff] }
 0x482   : > { %v3663_v22 = vpop.permute.xlu0 %3662  ;;  %v4201_v38 = vsel %vm1959_vm8, %v4169_v60, %v3665_v55  ;;  %v4044_v58 = vsel %vm171_vm3, %v7758_v11, %v9359_v1  ;;  %v2661_v60 = vld [vmem:[#allocation2 + $0x138] sm:$0xff]  ;;  %v9365_v1 = vld [vmem:[#allocation86_spill] sm:$0xff] }
 0x483   : > { %3576 = vrot.lane.b32.xlu1 %v3507_v21, %s5249_s22  ;;  %v4200_v17 = vsel %vm1959_vm8, %v4168_v42, %v3663_v22  ;;  %v3907_v22 = vsel %vm818_vm1, %v3904_v33, %v3511_v9  ;;  %v2780_v12 = vsel %vm287_vm0, 0.0, %v2738_v6  ;;  %v3517_v9 = vsel %vm818_vm1, %v3909_v51, %v3516_v7 }
 0x484   : > { %3972 = vrot.lane.b32.xlu0 %v3902_v59, %s5252_s8 }
 0x485   : > { %v3363_v24 = vpop.permute.xlu1 %3362 }
 0x486   : > { %v3759_v16 = vpop.permute.xlu0 %3758 }
 0x487   : > { %3688 = vrot.lane.b32.xlu1 %v2895_v53, %s5250_s23  ;;  %v4232_v49 = vsel %vm1992_vm9, %v4200_v17, %v3759_v16  ;;  %v2897_v16 = vrot.slane %v2817_v41, 7  ;;  %v9357_v17 = vld [vmem:[#allocation22_spill] sm:$0xff] }
 0x488   : > { %3686 = vrot.lane.b32.xlu0 %v2939_v50, %s5250_s23 }
 0x489   : > { %v3951_v32 = vpop.permute.xlu1 %3950 }
 0x48a   : > { %v4264_v23 = vsel %vm2025_vm10, %v4232_v49, %v3951_v32  ;;  %v3761_v34 = vpop.permute.xlu0 %3760  ;;  %v9358_v49 = vld [vmem:[#allocation26_spill] sm:$0xff] }
 0x48b   : > { %3386 = vrot.lane.b32.xlu1 %v5235_v13, %s5248_s21  ;;  %5153 = vmatprep.mubr.msk.f32.mxu1 %vm2058_vm11, %v4264_v23  ;;  %v4233_v39 = vsel %vm1992_vm9, %v4201_v38, %v3761_v34  ;;  %v4043_v32 = vsel %vm171_vm3, %v9358_v49, %v9357_v17  ;;  %v3908_v13 = vrot.slane %v2658_v28, 1  ;;  %v4076_v38 = vsel %vm1827_vm4, %v4044_v58, %v7933_v29  ;;  %v2820_v29 = vld [vmem:[#allocation2 + $0x140] sm:$0xff]  ;;  %v9362_v17 = vld [vmem:[#allocation19_spill] sm:$0xff] }
 0x48c   : > { %3782 = vrot.lane.b32.xlu0 %v2813_v62, %s5251_s7  ;;  %v9355_v62 = vld [vmem:[#allocation75_spill] sm:$0xff]  ;;  %v4075_v23 = vsel %vm1827_vm4, %v4043_v32, %v7923_v63  ;;  %v4046_v49 = vsel %vm171_vm3, %v7774_v0, %v9362_v17  ;;  %v2663_v32 = vld [vmem:[#allocation2 + $0x148] sm:$0xff] }
 0x48d   : > { %v3555_v10 = vpop.permute.xlu1 %3554  ;;  %v4107_v45 = vsel %vm1860_vm5, %v4075_v23, %v8051_v20  ;;  %v4078_v23 = vsel %vm1827_vm4, %v4046_v49, %v7941_v37  ;;  %v2664_v0 = vld [vmem:[#allocation2 + $0x150] sm:$0xff] }
 0x48e   : > { %v3365_v15 = vpop.permute.xlu0 %3364  ;;  %v9372_v17 = vld [vmem:[#allocation151_spill] sm:$0xff] }
 0x48f   : > { %3974 = vrot.lane.b32.xlu1 %v3905_v56, %s5252_s8  ;;  %v4139_v43 = vsel %vm1893_vm6, %v4107_v45, %v3365_v15  ;;  %v3910_v56 = vsel %vm818_vm1, %v3908_v13, %v3909_v51  ;;  %v3521_v51 = vrot.slane %v2663_v32, 1 }
 0x490   : > { %3784 = vrot.lane.b32.xlu0 %v8257_v54, %s5251_s7  ;;  %v9356_v54 = vld [vmem:[#allocation29_spill] sm:$0xff] }
 0x491   : > { %v3557_v3 = vpop.permute.xlu1 %3556  ;;  %v4042_v55 = vsel %vm171_vm3, %v9356_v54, %v9355_v62  ;;  %v2900_v62 = vrot.slane %v2820_v29, 7  ;;  %v9360_v54 = vld [vmem:[#allocation76_spill] sm:$0xff] }
 0x492   : > { %v3953_v8 = vpop.permute.xlu0 %3952  ;;  %v4074_v21 = vsel %vm1827_vm4, %v4042_v55, %v7925_v14  ;;  %v4171_v30 = vsel %vm1926_vm7, %v4139_v43, %v3557_v3  ;;  %v4108_v3 = vsel %vm1860_vm5, %v4076_v38, %v8061_v26  ;;  %v9361_v55 = vld [vmem:[#allocation30_spill] sm:$0xff] }
 0x493   : > { %v4265_v27 = vsel %vm2025_vm10, %v4233_v39, %v3953_v8  ;;  %3578 = vrot.lane.b32.xlu1 %v3510_v61, %s5249_s22  ;;  %v4106_v2 = vsel %vm1860_vm5, %v4074_v21, %v8053_v52 }
 0x494   : > { %3388 = vrot.lane.b32.xlu0 %v5236_v25, %s5248_s21  ;;  %5154 = vmatmul.mubr.msk.f32.gmra.mrb[6].mxu1 %vm2058_vm11, %v4265_v27  ;;  %v4138_v59 = vsel %vm1893_vm6, %v4106_v2, %v3363_v24  ;;  %v2898_v24 = vsel %vm287_vm0, %v2738_v6, %v2897_v16  ;;  %v2741_v27 = vrot.slane %v2661_v60, 7 }
 0x495   : > { %v3669_v19 = vpop.permute.xlu1 %3668  ;;  %v4170_v5 = vsel %vm1926_vm7, %v4138_v59, %v3555_v10 }
 0x496   : > { %v3667_v48 = vpop.permute.xlu0 %3666  ;;  %v4203_v31 = vsel %vm1959_vm8, %v4171_v30, %v3669_v19  ;;  %v2781_v6 = vsel %vm287_vm0, 0.0, %v2741_v27 }
 0x497   : > { %3580 = vrot.lane.b32.xlu1 %v3512_v40, %s5249_s22  ;;  %v4202_v53 = vsel %vm1959_vm8, %v4170_v5, %v3667_v48 }
 0x498   : > { %3976 = vrot.lane.b32.xlu0 %v3907_v22, %s5252_s8  ;;  %v4045_v22 = vsel %vm171_vm3, %v9361_v55, %v9360_v54  ;;  %v9368_v54 = vld [vmem:[#allocation152_spill] sm:$0xff] }
 0x499   : > { %v3367_v57 = vpop.permute.xlu1 %3366  ;;  %v4077_v21 = vsel %vm1827_vm4, %v4045_v22, %v7931_v4  ;;  %v9369_v22 = vld [vmem:[#allocation112_spill] sm:$0xff] }
 0x49a   : > { %v3763_v36 = vpop.permute.xlu0 %3762  ;;  %v4140_v8 = vsel %vm1893_vm6, %v4108_v3, %v3367_v57  ;;  %v4109_v2 = vsel %vm1860_vm5, %v4077_v21, %v8059_v18 }
 0x49b   : > { %3294 = vrot.lane.b32.xlu1 %v2780_v12, %s5247_s20  ;;  %v4234_v14 = vsel %vm1992_vm9, %v4202_v53, %v3763_v36  ;;  %v2901_v36 = vsel %vm287_vm0, %v2741_v27, %v2900_v62 }
 0x49c   : > { %3690 = vrot.lane.b32.xlu0 %v2780_v12, %s5250_s23 }
 0x49d   : > { %v3955_v42 = vpop.permute.xlu1 %3954 }
 0x49e   : > { %v4266_v52 = vsel %vm2025_vm10, %v4234_v14, %v3955_v42  ;;  %v3765_v50 = vpop.permute.xlu0 %3764  ;;  %v3913_v14 = vrot.slane %v2661_v60, 1  ;;  %v3914_v42 = vrot.slane %v2820_v29, 1 }
 0x49f   : > { %3786 = vrot.lane.b32.xlu1 %v2658_v28, %s5251_s7  ;;  %5156 = vmatprep.mubr.msk.f32.mxu1 %vm2058_vm11, %v4266_v52  ;;  %v4235_v63 = vsel %vm1992_vm9, %v4203_v31, %v3765_v50 }
 0x4a0   : > { %3692 = vrot.lane.b32.xlu0 %v2898_v24, %s5250_s23 }
 0x4a1   : > { %v3559_v34 = vpop.permute.xlu1 %3558 }
 0x4a2   : > { %v3369_v33 = vpop.permute.xlu0 %3368  ;;  %v4172_v11 = vsel %vm1926_vm7, %v4140_v8, %v3559_v34  ;;  %v4110_v34 = vsel %vm1860_vm5, %v4078_v23, %v8068_v47  ;;  %v9373_v23 = vld [vmem:[#allocation111_spill] sm:$0xff] }
 0x4a3   : > { %3390 = vrot.lane.b32.xlu1 %v2658_v28, %s5248_s21  ;;  %v4141_v59 = vsel %vm1893_vm6, %v4109_v2, %v3369_v33 }
 0x4a4   : > { %3296 = vrot.lane.b32.xlu0 %v2898_v24, %s5247_s20  ;;  %v3915_v24 = vsel %vm818_vm1, %v3913_v14, %v3914_v42 }
 0x4a5   : > { %v3561_v10 = vpop.permute.xlu1 %3560 }
 0x4a6   : > { %v3957_v46 = vpop.permute.xlu0 %3956  ;;  %v4173_v12 = vsel %vm1926_vm7, %v4141_v59, %v3561_v10 }
 0x4a7   : > { %v4267_v20 = vsel %vm2025_vm10, %v4235_v63, %v3957_v46  ;;  %3978 = vrot.lane.b32.xlu1 %v3910_v56, %s5252_s8  ;;  %v3522_v63 = vsel %vm818_vm1, %v3914_v42, %v3521_v51  ;;  %v2744_v46 = vrot.slane %v2664_v0, 7 }
 0x4a8   : > { %3788 = vrot.lane.b32.xlu0 %v2817_v41, %s5251_s7  ;;  %5157 = vmatmul.mubr.msk.f32.gmra.mrb[8].mxu1 %vm2058_vm11, %v4267_v20 }
 0x4a9   : > { %v3673_v15 = vpop.permute.xlu1 %3672  ;;  %v2782_v38 = vsel %vm287_vm0, 0.0, %v2744_v46 }
 0x4aa   : > { %v3671_v25 = vpop.permute.xlu0 %3670  ;;  %v4205_v5 = vsel %vm1959_vm8, %v4173_v12, %v3673_v15  ;;  %v9364_v15 = vld [vmem:[#allocation126_spill] sm:$0xff]  ;;  %v2666_v12 = vld [vmem:[#allocation2 + $0x160] sm:$0xff] }
 0x4ab   : > { %3582 = vrot.lane.b32.xlu1 %v3910_v56, %s5249_s22  ;;  %v4204_v28 = vsel %vm1959_vm8, %v4172_v11, %v3671_v25  ;;  %v9363_v56 = vld [vmem:[#allocation18_spill] sm:$0xff]  ;;  %v3526_v42 = vrot.slane %v2666_v12, 1 }
 0x4ac   : > { %3392 = vrot.lane.b32.xlu0 %v2817_v41, %s5248_s21  ;;  %v4047_v20 = vsel %vm171_vm3, %v7769_v35, %v9363_v56 }
 0x4ad   : > { %v3371_v39 = vpop.permute.xlu1 %3370  ;;  %v4079_v25 = vsel %vm1827_vm4, %v4047_v20, %v9364_v15  ;;  %v9375_v15 = vld [vmem:[#allocation79_spill] sm:$0xff] }
 0x4ae   : > { %v3767_v61 = vpop.permute.xlu0 %3766  ;;  %v4142_v33 = vsel %vm1893_vm6, %v4110_v34, %v3371_v39  ;;  %v4111_v58 = vsel %vm1860_vm5, %v4079_v25, %v9365_v1  ;;  %v2903_v39 = vrot.slane %v2823_v44, 7  ;;  %v9376_v1 = vld [vmem:[#allocation41_spill] sm:$0xff] }
 0x4af   : > { %3584 = vrot.lane.b32.xlu1 %v3517_v9, %s5249_s22  ;;  %v4236_v19 = vsel %vm1992_vm9, %v4204_v28, %v3767_v61 }
 0x4b0   : > { %3980 = vrot.lane.b32.xlu0 %v3517_v9, %s5252_s8  ;;  %v2904_v28 = vsel %vm287_vm0, %v2744_v46, %v2903_v39 }
 0x4b1   : > { %v3959_v48 = vpop.permute.xlu1 %3958 }
 0x4b2   : > { %v4268_v26 = vsel %vm2025_vm10, %v4236_v19, %v3959_v48  ;;  %v3769_v40 = vpop.permute.xlu0 %3768  ;;  %v3918_v48 = vrot.slane %v2664_v0, 1 }
 0x4b3   : > { %3298 = vrot.lane.b32.xlu1 %v2781_v6, %s5247_s20  ;;  %5159 = vmatprep.mubr.msk.f32.mxu1 %vm2058_vm11, %v4268_v26  ;;  %v4237_v4 = vsel %vm1992_vm9, %v4205_v5, %v3769_v40  ;;  %v3919_v26 = vrot.slane %v2823_v44, 1  ;;  %v9366_v40 = vld [vmem:[#allocation103_spill] sm:$0xff] }
 0x4b4   : > { %3694 = vrot.lane.b32.xlu0 %v2781_v6, %s5250_s23  ;;  %v9367_v6 = vld [vmem:[#allocation23_spill] sm:$0xff] }
 0x4b5   : > { %v3563_v41 = vpop.permute.xlu1 %3562  ;;  %v4048_v62 = vsel %vm171_vm3, %v9367_v6, %v9366_v40  ;;  %v3920_v59 = vsel %vm818_vm1, %v3918_v48, %v3919_v26  ;;  %v9378_v40 = vld [vmem:[#allocation104_spill] sm:$0xff] }
 0x4b6   : > { %v3373_v57 = vpop.permute.xlu0 %3372  ;;  %v4174_v43 = vsel %vm1926_vm7, %v4142_v33, %v3563_v41  ;;  %v4080_v55 = vsel %vm1827_vm4, %v4048_v62, %v9368_v54  ;;  %v3527_v33 = vsel %vm818_vm1, %v3919_v26, %v3526_v42  ;;  %v2669_v26 = vld [vmem:[#allocation2 + $0x178] sm:$0xff]  ;;  %v9380_v54 = vld [vmem:[#allocation31_spill] sm:$0xff] }
 0x4b7   : > { %3790 = vrot.lane.b32.xlu1 %v2661_v60, %s5251_s7  ;;  %v4143_v3 = vsel %vm1893_vm6, %v4111_v58, %v3373_v57  ;;  %v4112_v21 = vsel %vm1860_vm5, %v4080_v55, %v9369_v22  ;;  %v9379_v6 = vld [vmem:[#allocation24_spill] sm:$0xff] }
 0x4b8   : > { %3696 = vrot.lane.b32.xlu0 %v2901_v36, %s5250_s23  ;;  %v4051_v62 = vsel %vm171_vm3, %v9379_v6, %v9378_v40 }
 0x4b9   : > { %v3565_v16 = vpop.permute.xlu1 %3564  ;;  %v4083_v55 = vsel %vm1827_vm4, %v4051_v62, %v9380_v54 }
 0x4ba   : > { %v3961_v53 = vpop.permute.xlu0 %3960  ;;  %v4175_v35 = vsel %vm1926_vm7, %v4143_v3, %v3565_v16 }
 0x4bb   : > { %v4269_v18 = vsel %vm2025_vm10, %v4237_v4, %v3961_v53  ;;  %3394 = vrot.lane.b32.xlu1 %v2661_v60, %s5248_s21 }
 0x4bc   : > { %3300 = vrot.lane.b32.xlu0 %v2901_v36, %s5247_s20  ;;  %5160 = vmatmul.mubr.msk.f32.gmra.mrb[10].mxu1 %vm2058_vm11, %v4269_v18  ;;  %v2667_v18 = vld [vmem:[#allocation2 + $0x168] sm:$0xff] }
 0x4bd   : > { %v3677_v52 = vpop.permute.xlu1 %3676 }
 0x4be   : > { %v3675_v50 = vpop.permute.xlu0 %3674  ;;  %v4207_v8 = vsel %vm1959_vm8, %v4175_v35, %v3677_v52  ;;  %v9370_v52 = vld [vmem:[#allocation20_spill] sm:$0xff] }
 0x4bf   : > { %3982 = vrot.lane.b32.xlu1 %v3915_v24, %s5252_s8  ;;  %v4206_v30 = vsel %vm1959_vm8, %v4174_v43, %v3675_v50  ;;  %v9371_v50 = vld [vmem:[#allocation147_spill] sm:$0xff] }
 0x4c0   : > { %3792 = vrot.lane.b32.xlu0 %v2820_v29, %s5251_s7 }
 0x4c1   : > { %v3375_v45 = vpop.permute.xlu1 %3374 }
 0x4c2   : > { %v3771_v13 = vpop.permute.xlu0 %3770  ;;  %v4144_v2 = vsel %vm1893_vm6, %v4112_v21, %v3375_v45  ;;  %v9381_v21 = vld [vmem:[#allocation129_spill] sm:$0xff] }
 0x4c3   : > { %3586 = vrot.lane.b32.xlu1 %v3915_v24, %s5249_s22  ;;  %v4238_v37 = vsel %vm1992_vm9, %v4206_v30, %v3771_v13  ;;  %v4049_v24 = vsel %vm171_vm3, %v9371_v50, %v9370_v52  ;;  %v2747_v13 = vrot.slane %v2667_v18, 7  ;;  %v2829_v52 = vld [vmem:[#allocation2 + $0x188] sm:$0xff] }
 0x4c4   : > { %3396 = vrot.lane.b32.xlu0 %v2820_v29, %s5248_s21  ;;  %v4081_v49 = vsel %vm1827_vm4, %v4049_v24, %v9372_v17 }
 0x4c5   : > { %v3963_v31 = vpop.permute.xlu1 %3962  ;;  %v4113_v34 = vsel %vm1860_vm5, %v4081_v49, %v9373_v23  ;;  %v9382_v49 = vld [vmem:[#allocation148_spill] sm:$0xff] }
 0x4c6   : > { %v4270_v10 = vsel %vm2025_vm10, %v4238_v37, %v3963_v31  ;;  %v3773_v47 = vpop.permute.xlu0 %3772 }
 0x4c7   : > { %3588 = vrot.lane.b32.xlu1 %v3522_v63, %s5249_s22  ;;  %5162 = vmatprep.mubr.msk.f32.mxu1 %vm2058_vm11, %v4270_v10  ;;  %v4239_v9 = vsel %vm1992_vm9, %v4207_v8, %v3773_v47  ;;  %v2783_v47 = vsel %vm287_vm0, 0.0, %v2747_v13  ;;  %v3923_v8 = vrot.slane %v2667_v18, 1 }
 0x4c8   : > { %3984 = vrot.lane.b32.xlu0 %v3522_v63, %s5252_s8 }
 0x4c9   : > { %v3567_v7 = vpop.permute.xlu1 %3566 }
 0x4ca   : > { %v3377_v60 = vpop.permute.xlu0 %3376  ;;  %v4176_v36 = vsel %vm1926_vm7, %v4144_v2, %v3567_v7 }
 0x4cb   : > { %3302 = vrot.lane.b32.xlu1 %v2782_v38, %s5247_s20  ;;  %v4145_v51 = vsel %vm1893_vm6, %v4113_v34, %v3377_v60  ;;  %v9377_v60 = vld [vmem:[#allocation130_spill] sm:$0xff]  ;;  %v2909_v34 = vrot.slane %v2829_v52, 7 }
 0x4cc   : > { %3698 = vrot.lane.b32.xlu0 %v2782_v38, %s5250_s23 }
 0x4cd   : > { %v3569_v61 = vpop.permute.xlu1 %3568 }
 0x4ce   : > { %v3965_v27 = vpop.permute.xlu0 %3964  ;;  %v4177_v43 = vsel %vm1926_vm7, %v4145_v51, %v3569_v61 }
 0x4cf   : > { %v4271_v11 = vsel %vm2025_vm10, %v4239_v9, %v3965_v27  ;;  %3794 = vrot.lane.b32.xlu1 %v2664_v0, %s5251_s7 }
 0x4d0   : > { %3700 = vrot.lane.b32.xlu0 %v2904_v28, %s5250_s23  ;;  %5163 = vmatmul.mubr.msk.f32.gmra.mrb[12].mxu1 %vm2058_vm11, %v4271_v11 }
 0x4d1   : > { %v3681_v29 = vpop.permute.xlu1 %3680 }
 0x4d2   : > { %v3679_v19 = vpop.permute.xlu0 %3678  ;;  %v4209_v30 = vsel %vm1959_vm8, %v4177_v43, %v3681_v29 }
 0x4d3   : > { %3398 = vrot.lane.b32.xlu1 %v2664_v0, %s5248_s21  ;;  %v4208_v5 = vsel %vm1959_vm8, %v4176_v36, %v3679_v19  ;;  %v2826_v0 = vld [vmem:[#allocation2 + $0x170] sm:$0xff]  ;;  %v2670_v36 = vld [vmem:[#allocation2 + $0x180] sm:$0xff] }
 0x4d4   : > { %3304 = vrot.lane.b32.xlu0 %v2904_v28, %s5247_s20  ;;  %v2906_v46 = vrot.slane %v2826_v0, 7  ;;  %v3924_v61 = vrot.slane %v2826_v0, 1  ;;  %v2750_v42 = vrot.slane %v2670_v36, 7 }
 0x4d5   : > { %v3379_v41 = vpop.permute.xlu1 %3378 }
 0x4d6   : > { %v3775_v57 = vpop.permute.xlu0 %3774  ;;  %v2907_v7 = vsel %vm287_vm0, %v2747_v13, %v2906_v46  ;;  %v3925_v48 = vsel %vm818_vm1, %v3923_v8, %v3924_v61  ;;  %v2784_v17 = vsel %vm287_vm0, 0.0, %v2750_v42  ;;  %v9385_v13 = vld [vmem:[#allocation49_spill] sm:$0xff] }
 0x4d7   : > { %3986 = vrot.lane.b32.xlu1 %v3920_v59, %s5252_s8  ;;  %v4240_v16 = vsel %vm1992_vm9, %v4208_v5, %v3775_v57  ;;  %v3531_v57 = vrot.slane %v2669_v26, 1 }
 0x4d8   : > { %3796 = vrot.lane.b32.xlu0 %v2823_v44, %s5251_s7 }
 0x4d9   : > { %v3967_v4 = vpop.permute.xlu1 %3966 }
 0x4da   : > { %v4272_v53 = vsel %vm2025_vm10, %v4240_v16, %v3967_v4  ;;  %v3777_v14 = vpop.permute.xlu0 %3776 }
 0x4db   : > { %3590 = vrot.lane.b32.xlu1 %v3920_v59, %s5249_s22  ;;  %5165 = vmatprep.mubr.msk.f32.mxu1 %vm2058_vm11, %v4272_v53  ;;  %v4241_v31 = vsel %vm1992_vm9, %v4209_v30, %v3777_v14  ;;  %v3532_v14 = vsel %vm818_vm1, %v3924_v61, %v3531_v57  ;;  %v2672_v61 = vld [vmem:[#allocation2 + $0x190] sm:$0xff]  ;;  %v2833_v57 = vld [vmem:[#allocation2 + $0x1a8] sm:$0xff] }
 0x4dc   : > { %3400 = vrot.lane.b32.xlu0 %v2823_v44, %s5248_s21  ;;  %v9374_v44 = vld [vmem:[#allocation9_spill] sm:$0xff]  ;;  %v3536_v26 = vrot.slane %v2672_v61, 1 }
 0x4dd   : > { %v3571_v32 = vpop.permute.xlu1 %3570  ;;  %v4050_v25 = vsel %vm171_vm3, %v9375_v15, %v9374_v44  ;;  %v3929_v44 = vrot.slane %v2829_v52, 1  ;;  %v9386_v15 = vld [vmem:[#allocation12_spill] sm:$0xff]  ;;  %v9399_v61 = vld [vmem:[#allocation81_spill] sm:$0xff] }
 0x4de   : > { %v3381_v45 = vpop.permute.xlu0 %3380  ;;  %v4082_v58 = vsel %vm1827_vm4, %v4050_v25, %v9376_v1  ;;  %v9387_v25 = vld [vmem:[#allocation105_spill] sm:$0xff]  ;;  %v9388_v1 = vld [vmem:[#allocation32_spill] sm:$0xff] }
 0x4df   : > { %3592 = vrot.lane.b32.xlu1 %v3527_v33, %s5249_s22  ;;  %v4114_v38 = vsel %vm1860_vm5, %v4082_v58, %v9377_v60 }
 0x4e0   : > { %3988 = vrot.lane.b32.xlu0 %v3527_v33, %s5252_s8  ;;  %v4146_v39 = vsel %vm1893_vm6, %v4114_v38, %v3379_v41  ;;  %v4115_v41 = vsel %vm1860_vm5, %v4083_v55, %v9381_v21  ;;  %v9389_v38 = vld [vmem:[#allocation39_spill] sm:$0xff] }
 0x4e1   : > { %v3573_v37 = vpop.permute.xlu1 %3572  ;;  %v4178_v9 = vsel %vm1926_vm7, %v4146_v39, %v3571_v32  ;;  %v4147_v59 = vsel %vm1893_vm6, %v4115_v41, %v3381_v45  ;;  %v9383_v32 = vld [vmem:[#allocation15_spill] sm:$0xff]  ;;  %v9384_v45 = vld [vmem:[#allocation42_spill] sm:$0xff] }
 0x4e2   : > { %v3969_v10 = vpop.permute.xlu0 %3968  ;;  %v4179_v12 = vsel %vm1926_vm7, %v4147_v59, %v3573_v37  ;;  %v4052_v23 = vsel %vm171_vm3, %v9383_v32, %v9382_v49 }
 0x4e3   : > { %v4273_v63 = vsel %vm2025_vm10, %v4241_v31, %v3969_v10  ;;  %3306 = vrot.lane.b32.xlu1 %v2783_v47, %s5247_s20  ;;  %v4084_v33 = vsel %vm1827_vm4, %v4052_v23, %v9384_v45  ;;  %v2910_v31 = vsel %vm287_vm0, %v2750_v42, %v2909_v34  ;;  %v9393_v42 = vld [vmem:[#allocation50_spill] sm:$0xff] }
 0x4e4   : > { %3702 = vrot.lane.b32.xlu0 %v2783_v47, %s5250_s23  ;;  %5166 = vmatmul.mubr.msk.f32.gmra.mrb[14].mxu1 %vm2058_vm11, %v4273_v63  ;;  %v4116_v51 = vsel %vm1860_vm5, %v4084_v33, %v9385_v13 }
 0x4e5   : > { %v3685_v56 = vpop.permute.xlu1 %3684 }
 0x4e6   : > { %v3683_v20 = vpop.permute.xlu0 %3682  ;;  %v4211_v5 = vsel %vm1959_vm8, %v4179_v12, %v3685_v56  ;;  %v9391_v12 = vld [vmem:[#allocation27_spill] sm:$0xff] }
 0x4e7   : > { %3798 = vrot.lane.b32.xlu1 %v2667_v18, %s5251_s7  ;;  %v4210_v27 = vsel %vm1959_vm8, %v4178_v9, %v3683_v20  ;;  %v3928_v20 = vrot.slane %v2670_v36, 1 }
 0x4e8   : > { %3704 = vrot.lane.b32.xlu0 %v2907_v7, %s5250_s23 }
 0x4e9   : > { %v3383_v3 = vpop.permute.xlu1 %3382 }
 0x4ea   : > { %v3779_v35 = vpop.permute.xlu0 %3778 }
 0x4eb   : > { %3402 = vrot.lane.b32.xlu1 %v2667_v18, %s5248_s21  ;;  %v4242_v11 = vsel %vm1992_vm9, %v4210_v27, %v3779_v35  ;;  %v3930_v35 = vsel %vm818_vm1, %v3928_v20, %v3929_v44 }
 0x4ec   : > { %3308 = vrot.lane.b32.xlu0 %v2907_v7, %s5247_s20  ;;  %v4053_v7 = vsel %vm171_vm3, %v9387_v25, %v9386_v15 }
 0x4ed   : > { %v3971_v28 = vpop.permute.xlu1 %3970  ;;  %v4085_v58 = vsel %vm1827_vm4, %v4053_v7, %v9388_v1 }
 0x4ee   : > { %v4274_v29 = vsel %vm2025_vm10, %v4242_v11, %v3971_v28  ;;  %v3781_v19 = vpop.permute.xlu0 %3780  ;;  %v2831_v28 = vld [vmem:[#allocation2 + $0x198] sm:$0xff] }
 0x4ef   : > { %3990 = vrot.lane.b32.xlu1 %v3925_v48, %s5252_s8  ;;  %5168 = vmatprep.mubr.msk.f32.mxu1 %vm2058_vm11, %v4274_v29  ;;  %v4243_v4 = vsel %vm1992_vm9, %v4211_v5, %v3781_v19  ;;  %v2832_v29 = vld [vmem:[#allocation2 + $0x1a0] sm:$0xff]  ;;  %v2911_v6 = vrot.slane %v2831_v28, 7 }
 0x4f0   : > { %3800 = vrot.lane.b32.xlu0 %v2826_v0, %s5251_s7  ;;  %v2912_v62 = vrot.slane %v2832_v29, 7 }
 0x4f1   : > { %v3575_v22 = vpop.permute.xlu1 %3574 }
 0x4f2   : > { %v3385_v2 = vpop.permute.xlu0 %3384  ;;  %v2913_v21 = vsel %vm287_vm0, %v2911_v6, %v2912_v62 }
 0x4f3   : > { %3594 = vrot.lane.b32.xlu1 %v3925_v48, %s5249_s22 }
 0x4f4   : > { %3404 = vrot.lane.b32.xlu0 %v2826_v0, %s5248_s21  ;;  %v4148_v0 = vsel %vm1893_vm6, %v4116_v51, %v3383_v3  ;;  %v4117_v3 = vsel %vm1860_vm5, %v4085_v58, %v9389_v38 }
 0x4f5   : > { %v3577_v16 = vpop.permute.xlu1 %3576  ;;  %v4180_v37 = vsel %vm1926_vm7, %v4148_v0, %v3575_v22  ;;  %v4149_v8 = vsel %vm1893_vm6, %v4117_v3, %v3385_v2  ;;  %v3537_v22 = vsel %vm818_vm1, %v3929_v44, %v3536_v26  ;;  %v2945_v2 = vsel %vm287_vm0, 0.0, %v2911_v6  ;;  %v9395_v0 = vld [vmem:[#allocation149_spill] sm:$0xff] }
 0x4f6   : > { %v3973_v53 = vpop.permute.xlu0 %3972  ;;  %v4181_v9 = vsel %vm1926_vm7, %v4149_v8, %v3577_v16  ;;  %v9392_v16 = vld [vmem:[#allocation84_spill] sm:$0xff]  ;;  %v4968_v3 = vld [vmem:[%s5288_s17 + $0x20] sm:$0xff] }
 0x4f7   : > { %v4275_v18 = vsel %vm2025_vm10, %v4243_v4, %v3973_v53  ;;  %3596 = vrot.lane.b32.xlu1 %v3532_v14, %s5249_s22  ;;  %v3934_v53 = vrot.slane %v2832_v29, 1  ;;  %v4967_v8 = vld [vmem:[%s5288_s17 + $0x18] sm:$0xff] }
 0x4f8   : > { %3992 = vrot.lane.b32.xlu0 %v3532_v14, %s5252_s8  ;;  %5169 = vmatmul.mubr.msk.f32.gmra.mrb[16].mxu1 %vm2058_vm11, %v4275_v18  ;;  %v3936_v14 = vrot.slane %v2833_v57, 1 }
 0x4f9   : > { %v3689_v50 = vpop.permute.xlu1 %3688 }
 0x4fa   : > { %v3687_v24 = vpop.permute.xlu0 %3686  ;;  %v4213_v27 = vsel %vm1959_vm8, %v4181_v9, %v3689_v50  ;;  %v3933_v50 = vrot.slane %v2831_v28, 1  ;;  %v3937_v23 = vsel %vm818_vm1, %v3934_v53, %v3936_v14 }
 0x4fb   : > { %3310 = vrot.lane.b32.xlu1 %v2784_v17, %s5247_s20  ;;  %v4212_v10 = vsel %vm1959_vm8, %v4180_v37, %v3687_v24  ;;  %v9396_v37 = vld [vmem:[#allocation83_spill] sm:$0xff] }
 0x4fc   : > { %3706 = vrot.lane.b32.xlu0 %v2784_v17, %s5250_s23  ;;  %v3935_v33 = vsel %vm818_vm1, %v3933_v50, %v3934_v53 }
 0x4fd   : > { %v3387_v43 = vpop.permute.xlu1 %3386 }
 0x4fe   : > { %v3783_v30 = vpop.permute.xlu0 %3782 }
 0x4ff   : > { %3802 = vrot.lane.b32.xlu1 %v2670_v36, %s5251_s7  ;;  %v4244_v47 = vsel %vm1992_vm9, %v4212_v10, %v3783_v30 }
 0x500   : > { %3708 = vrot.lane.b32.xlu0 %v2910_v31, %s5250_s23 }
 0x501   : > { %v3975_v63 = vpop.permute.xlu1 %3974 }
 0x502   : > { %v4276_v46 = vsel %vm2025_vm10, %v4244_v47, %v3975_v63  ;;  %v3785_v56 = vpop.permute.xlu0 %3784  ;;  %v9397_v47 = vld [vmem:[#allocation40_spill] sm:$0xff] }
 0x503   : > { %5171 = vmatprep.mubr.msk.f32.mxu1 %vm2058_vm11, %v4276_v46  ;;  %3406 = vrot.lane.b32.xlu1 %v2670_v36, %s5248_s21  ;;  %v4245_v19 = vsel %vm1992_vm9, %v4213_v27, %v3785_v56  ;;  %v9390_v36 = vld [vmem:[#allocation34_spill] sm:$0xff] }
 0x504   : > { %3312 = vrot.lane.b32.xlu0 %v2910_v31, %s5247_s20  ;;  %v4054_v5 = vsel %vm171_vm3, %v9391_v12, %v9390_v36  ;;  %s5001_s20 = sshll.u32 %s9433_s13, 8  ;;  %v9401_v36 = vld [vmem:[#allocation80_spill] sm:$0xff] }
 0x505   : > { %v3579_v60 = vpop.permute.xlu1 %3578  ;;  %v4086_v4 = vsel %vm1827_vm4, %v4054_v5, %v9392_v16  ;;  %v9402_v12 = vld [vmem:[#allocation28_spill] sm:$0xff]  ;;  %v9403_v16 = vld [vmem:[#allocation109_spill] sm:$0xff] }
 0x506   : > { %v3389_v39 = vpop.permute.xlu0 %3388  ;;  %v4118_v18 = vsel %vm1860_vm5, %v4086_v4, %v9393_v42  ;;  %v4057_v5 = vsel %vm171_vm3, %v9402_v12, %v9401_v36 }
 0x507   : > { %3994 = vrot.lane.b32.xlu1 %v3930_v35, %s5252_s8  ;;  %v4150_v24 = vsel %vm1893_vm6, %v4118_v18, %v3387_v43  ;;  %v9394_v43 = vld [vmem:[#allocation33_spill] sm:$0xff]  ;;  %v4089_v4 = vsel %vm1827_vm4, %v4057_v5, %v9403_v16 }
 0x508   : > { %3804 = vrot.lane.b32.xlu0 %v2829_v52, %s5251_s7  ;;  %v4182_v49 = vsel %vm1926_vm7, %v4150_v24, %v3579_v60  ;;  %v4055_v30 = vsel %vm171_vm3, %v9395_v0, %v9394_v43 }
 0x509   : > { %v3581_v11 = vpop.permute.xlu1 %3580  ;;  %v4087_v31 = vsel %vm1827_vm4, %v4055_v30, %v9396_v37  ;;  %v9404_v37 = vld [vmem:[#allocation3_spill] sm:$0xff] }
 0x50a   : > { %v3977_v48 = vpop.permute.xlu0 %3976  ;;  %v4119_v63 = vsel %vm1860_vm5, %v4087_v31, %v9397_v47  ;;  %v9405_v31 = vrot.slane %v9404_v37, 7 }
 0x50b   : > { %v4277_v40 = vsel %vm2025_vm10, %v4245_v19, %v3977_v48  ;;  %3598 = vrot.lane.b32.xlu1 %v3930_v35, %s5249_s22  ;;  %v4151_v56 = vsel %vm1893_vm6, %v4119_v63, %v3389_v39  ;;  %v9398_v39 = vld [vmem:[#allocation106_spill] sm:$0xff] }
 0x50c   : > { %5172 = vmatmul.mubr.msk.f32.gmra.mrb[18].mxu1 %vm2058_vm11, %v4277_v40  ;;  %3408 = vrot.lane.b32.xlu0 %v2829_v52, %s5248_s21  ;;  %v4183_v20 = vsel %vm1926_vm7, %v4151_v56, %v3581_v11  ;;  %v4056_v9 = vsel %vm171_vm3, %v9399_v61, %v9398_v39  ;;  %v9400_v11 = vld [vmem:[#allocation110_spill] sm:$0xff] }
 0x50d   : > { %v3295_v54 = vpop.permute.xlu1 %3294 }
 0x50e   : > { %v3691_v55 = vpop.permute.xlu0 %3690 }
 0x50f   : > { %3600 = vrot.lane.b32.xlu1 %v3537_v22, %s5249_s22  ;;  %v4214_v32 = vsel %vm1959_vm8, %v4182_v49, %v3691_v55 }
 0x510   : > { %3996 = vrot.lane.b32.xlu0 %v3537_v22, %s5252_s8 }
 0x511   : > { %v3787_v41 = vpop.permute.xlu1 %3786 }
 0x512   : > { %v3693_v59 = vpop.permute.xlu0 %3692  ;;  %v4246_v34 = vsel %vm1992_vm9, %v4214_v32, %v3787_v41 }
 0x513   : > { %3712 = vrot.lane.b32.xlu1 %v2913_v21, %s5250_s23  ;;  %v4215_v44 = vsel %vm1959_vm8, %v4183_v20, %v3693_v59 }
 0x514   : > { %3710 = vrot.lane.b32.xlu0 %v2945_v2, %s5250_s23  ;;  %s8594_s23 = scalar_lea.vmem %s8818_s3, %s5001_s20 }
 0x515   : > { %v3391_v52 = vpop.permute.xlu1 %3390 }
 0x516   : > { %v3297_v17 = vpop.permute.xlu0 %3296 }
 0x517   : > { %3808 = vrot.lane.b32.xlu1 %v2832_v29, %s5251_s7  ;;  %v4121_v14 = vsel %vm1860_vm5, %v4089_v4, %v3297_v17 }
 0x518   : > { %3806 = vrot.lane.b32.xlu0 %v2831_v28, %s5251_s7  ;;  %v4088_v28 = vsel %vm1827_vm4, %v4056_v9, %v9400_v11  ;;  %v9409_v9 = vld [vmem:[#allocation14_spill] sm:$0xff]  ;;  %v9410_v11 = vld [vmem:[#allocation127_spill] sm:$0xff] }
 0x519   : > { %v3979_v45 = vpop.permute.xlu1 %3978  ;;  %v4120_v48 = vsel %vm1860_vm5, %v4088_v28, %v3295_v54 }
 0x51a   : > { %v4278_v13 = vsel %vm2025_vm10, %v4246_v34, %v3979_v45  ;;  %v3789_v51 = vpop.permute.xlu0 %3788  ;;  %v4152_v6 = vsel %vm1893_vm6, %v4120_v48, %v3391_v52  ;;  %v4970_v45 = vld [vmem:[%s5288_s17 + $0x38] sm:$0xff] }
 0x51b   : > { %5174 = vmatprep.mubr.msk.f32.mxu1 %vm2058_vm11, %v4278_v13  ;;  %4000 = vrot.lane.b32.xlu1 %v3937_v23, %s5252_s8  ;;  %v4247_v25 = vsel %vm1992_vm9, %v4215_v44, %v3789_v51  ;;  %v9407_v44 = vld [vmem:[#allocation128_spill] sm:$0xff] }
 0x51c   : > { %3998 = vrot.lane.b32.xlu0 %v3935_v33, %s5252_s8  ;;  %v4969_v33 = vld [vmem:[%s5288_s17 + $0x30] sm:$0xff] }
 0x51d   : > { %v3583_v10 = vpop.permute.xlu1 %3582 }
 0x51e   : > { %v3393_v46 = vpop.permute.xlu0 %3392  ;;  %v4184_v22 = vsel %vm1926_vm7, %v4152_v6, %v3583_v10  ;;  %v2621_v10 = vsel %vm287_vm0, 0.0, %v9405_v31  ;;  %v9415_v31 = vld [vmem:[#allocation37_spill] sm:$0xff] }
 0x51f   : > { %v4153_v18 = vsel %vm1893_vm6, %v4121_v14, %v3393_v46  ;;  %v9406_v46 = vld [vmem:[#allocation150_spill] sm:$0xff]  ;;  %v9411_v14 = vld [vmem:[#allocation4_spill] sm:$0xff] }
 0x520   : > { %v4058_v56 = vsel %vm171_vm3, %v2621_v10, %v9406_v46  ;;  %v9416_v10 = vld [vmem:[#allocation11_spill] sm:$0xff] }
 0x521   : > { %v3585_v15 = vpop.permute.xlu1 %3584 }
 0x522   : > { %v3981_v7 = vpop.permute.xlu0 %3980  ;;  %v4185_v52 = vsel %vm1926_vm7, %v4153_v18, %v3585_v15  ;;  %v4090_v15 = vsel %vm1827_vm4, %v4058_v56, %v9407_v44  ;;  %v4974_v56 = vld [vmem:[%s5288_s17 + $0x68] sm:$0xff] }
 0x523   : > { %v4279_v1 = vsel %vm2025_vm10, %v4247_v25, %v3981_v7 }
 0x524   : > { %5175 = vmatmul.mubr.msk.f32.gmra.mrb[20].mxu1 %vm2058_vm11, %v4279_v1 }
 0x525   : > { %v3299_v58 = vpop.permute.xlu1 %3298 }
 0x526   : > { %v3695_v60 = vpop.permute.xlu0 %3694  ;;  %v4122_v25 = vsel %vm1860_vm5, %v4090_v15, %v3299_v58  ;;  %v9408_v58 = vld [vmem:[#allocation16_spill] sm:$0xff]  ;;  %v4973_v15 = vld [vmem:[%s5288_s17 + $0x60] sm:$0xff] }
 0x527   : > { %v4216_v41 = vsel %vm1959_vm8, %v4184_v22, %v3695_v60  ;;  %v4972_v22 = vld [vmem:[%s5288_s17 + $0x50] sm:$0xff] }
 0x529   : > { %v3791_v38 = vpop.permute.xlu1 %3790 }
 0x52a   : > { %v3697_v35 = vpop.permute.xlu0 %3696  ;;  %v4248_v54 = vsel %vm1992_vm9, %v4216_v41, %v3791_v38 }
 0x52b   : > { %v5146_v27 = vpop.f32.mrb[0].mxu1  ;;  %v4217_v50 = vsel %vm1959_vm8, %v4185_v52, %v3697_v35 }
 0x52c   : > { %v4647_v29 = vadd.f32 %v5146_v27, %v4968_v3  ;;  %v4455_v19 = vpop.f32.mrb[1].mxu1  ;;  %v4059_v27 = vsel %vm171_vm3, %v9409_v9, %v9408_v58 }
 0x52d   : > { %v4646_v26 = vadd.f32 %v4967_v8, %v4455_v19  ;;  %v3395_v40 = vpop.permute.xlu1 %3394  ;;  %v4091_v28 = vsel %vm1827_vm4, %v4059_v27, %v9410_v11 }
 0x52e   : > { %v4679_v62 = vmax.f32 %v4647_v29, 0.0  ;;  %v3301_v55 = vpop.permute.xlu0 %3300  ;;  %v4154_v1 = vsel %vm1893_vm6, %v4122_v25, %v3395_v40 }
 0x52f   : > { %v4678_v21 = vmax.f32 %v4646_v26, 0.0  ;;  %v4123_v19 = vsel %vm1860_vm5, %v4091_v28, %v3301_v55 }
 0x530   : > { %4711 = vst.msk [vmem:[%s8594_s23 + $0x8] sm:$0xff] %vm171_vm3, %v4679_v62 }
 0x531   : > { %4710 = vst.msk [vmem:[%s8594_s23] sm:$0xff] %vm171_vm3, %v4678_v21  ;;  %v3983_v2 = vpop.permute.xlu1 %3982 }
 0x532   : > { %v4280_v57 = vsel %vm2025_vm10, %v4248_v54, %v3983_v2  ;;  %v3793_v59 = vpop.permute.xlu0 %3792  ;;  %v4971_v54 = vld [vmem:[%s5288_s17 + $0x48] sm:$0xff] }
 0x533   : > { %5177 = vmatprep.mubr.msk.f32.mxu1 %vm2058_vm11, %v4280_v57  ;;  %v4249_v49 = vsel %vm1992_vm9, %v4217_v50, %v3793_v59  ;;  %v9413_v50 = vld [vmem:[#allocation38_spill] sm:$0xff] }
 0x535   : > { %v3587_v53 = vpop.permute.xlu1 %3586 }
 0x536   : > { %v3397_v42 = vpop.permute.xlu0 %3396  ;;  %v4186_v38 = vsel %vm1926_vm7, %v4154_v1, %v3587_v53 }
 0x537   : > { %v4155_v26 = vsel %vm1893_vm6, %v4123_v19, %v3397_v42  ;;  %v9412_v42 = vrot.slane %v9411_v14, 7  ;;  %v9418_v19 = vld [vmem:[#allocation71_spill] sm:$0xff]  ;;  %v4975_v14 = vld [vmem:[%s5288_s17 + $0x78] sm:$0xff] }
 0x539   : > { %v3589_v24 = vpop.permute.xlu1 %3588  ;;  %v2622_v18 = vsel %vm287_vm0, 0.0, %v9412_v42 }
 0x53a   : > { %v3985_v32 = vpop.permute.xlu0 %3984  ;;  %v4187_v40 = vsel %vm1926_vm7, %v4155_v26, %v3589_v24  ;;  %v4060_v24 = vsel %vm171_vm3, %v2622_v18, %v9413_v50  ;;  %v9423_v18 = vld [vmem:[#allocation72_spill] sm:$0xff] }
 0x53b   : > { %v4281_v23 = vsel %vm2025_vm10, %v4249_v49, %v3985_v32  ;;  %v9414_v49 = vld [vmem:[#allocation35_spill] sm:$0xff] }
 0x53c   : > { %5178 = vmatmul.mubr.msk.f32.gmra.mrb[22].mxu1 %vm2058_vm11, %v4281_v23  ;;  %v4092_v32 = vsel %vm1827_vm4, %v4060_v24, %v9414_v49  ;;  %v9424_v49 = vld [vmem:[#allocation45_spill] sm:$0xff] }
 0x53d   : > { %v3303_v34 = vpop.permute.xlu1 %3302 }
 0x53e   : > { %v3699_v17 = vpop.permute.xlu0 %3698  ;;  %v4124_v23 = vsel %vm1860_vm5, %v4092_v32, %v3303_v34  ;;  %v4061_v34 = vsel %vm171_vm3, %v9416_v10, %v9415_v31 }
 0x53f   : > { %v5149_v13 = vpop.f32.mrb[2].mxu1  ;;  %v4218_v3 = vsel %vm1959_vm8, %v4186_v38, %v3699_v17 }
 0x540   : > { %v4649_v51 = vadd.f32 %v5149_v13, %v4970_v45  ;;  %v4465_v43 = vpop.f32.mrb[3].mxu1 }
 0x541   : > { %v4648_v0 = vadd.f32 %v4969_v33, %v4465_v43  ;;  %v3795_v30 = vpop.permute.xlu1 %3794 }
 0x542   : > { %v4681_v47 = vmax.f32 %v4649_v51, 0.0  ;;  %v3701_v63 = vpop.permute.xlu0 %3700  ;;  %v4250_v35 = vsel %vm1992_vm9, %v4218_v3, %v3795_v30 }
 0x543   : > { %v4680_v20 = vmax.f32 %v4648_v0, 0.0  ;;  %v4219_v6 = vsel %vm1959_vm8, %v4187_v40, %v3701_v63 }
 0x544   : > { %4713 = vst.msk [vmem:[%s8594_s23 + $0x18] sm:$0xff] %vm171_vm3, %v4681_v47  ;;  %v9417_v47 = vld [vmem:[#allocation153_spill] sm:$0xff] }
 0x545   : > { %4712 = vst.msk [vmem:[%s8594_s23 + $0x10] sm:$0xff] %vm171_vm3, %v4680_v20  ;;  %v3399_v7 = vpop.permute.xlu1 %3398  ;;  %v4093_v63 = vsel %vm1827_vm4, %v4061_v34, %v9417_v47 }
 0x546   : > { %v3305_v60 = vpop.permute.xlu0 %3304  ;;  %v4156_v17 = vsel %vm1893_vm6, %v4124_v23, %v3399_v7 }
 0x547   : > { %v4125_v20 = vsel %vm1860_vm5, %v4093_v63, %v3305_v60 }
 0x549   : > { %v3987_v8 = vpop.permute.xlu1 %3986 }
 0x54a   : > { %v4282_v39 = vsel %vm2025_vm10, %v4250_v35, %v3987_v8  ;;  %v3797_v61 = vpop.permute.xlu0 %3796 }
 0x54b   : > { %5180 = vmatprep.mubr.msk.f32.mxu1 %vm2058_vm11, %v4282_v39  ;;  %v4251_v21 = vsel %vm1992_vm9, %v4219_v6, %v3797_v61  ;;  %v9420_v6 = vld [vmem:[#allocation107_spill] sm:$0xff] }
 0x54d   : > { %v3591_v29 = vpop.permute.xlu1 %3590 }
 0x54e   : > { %v3401_v48 = vpop.permute.xlu0 %3400  ;;  %v4188_v13 = vsel %vm1926_vm7, %v4156_v17, %v3591_v29 }
 0x54f   : > { %v4157_v25 = vsel %vm1893_vm6, %v4125_v20, %v3401_v48  ;;  %v9419_v48 = vrot.slane %v9418_v19, 7 }
 0x551   : > { %v3593_v62 = vpop.permute.xlu1 %3592  ;;  %v2623_v26 = vsel %vm287_vm0, 0.0, %v9419_v48 }
 0x552   : > { %v3989_v41 = vpop.permute.xlu0 %3988  ;;  %v4189_v1 = vsel %vm1926_vm7, %v4157_v25, %v3593_v62  ;;  %v4062_v62 = vsel %vm171_vm3, %v2623_v26, %v9420_v6  ;;  %v9428_v25 = vld [vmem:[#allocation108_spill] sm:$0xff] }
 0x553   : > { %v4283_v2 = vsel %vm2025_vm10, %v4251_v21, %v3989_v41  ;;  %v5152_v57 = vpop.f32.mrb[4].mxu1  ;;  %v4978_v26 = vld [vmem:[%s5288_s17 + $0x98] sm:$0xff] }
 0x554   : > { %v4651_v59 = vadd.f32 %v5152_v57, %v4972_v22  ;;  %v4475_v55 = vpop.f32.mrb[5].mxu1  ;;  %5181 = vmatmul.mubr.msk.f32.gmra.mrb[24].mxu1 %vm2058_vm11, %v4283_v2  ;;  %v9421_v22 = vld [vmem:[#allocation36_spill] sm:$0xff] }
 0x555   : > { %v4650_v36 = vadd.f32 %v4971_v54, %v4475_v55  ;;  %v3307_v12 = vpop.permute.xlu1 %3306  ;;  %v4094_v21 = vsel %vm1827_vm4, %v4062_v62, %v9421_v22  ;;  %v4977_v62 = vld [vmem:[%s5288_s17 + $0x90] sm:$0xff] }
 0x556   : > { %v4683_v5 = vmax.f32 %v4651_v59, 0.0  ;;  %v3703_v16 = vpop.permute.xlu0 %3702  ;;  %v4126_v41 = vsel %vm1860_vm5, %v4094_v21, %v3307_v12  ;;  %v9422_v12 = vld [vmem:[#allocation82_spill] sm:$0xff] }
 0x557   : > { %v4682_v4 = vmax.f32 %v4650_v36, 0.0  ;;  %v4220_v51 = vsel %vm1959_vm8, %v4188_v13, %v3703_v16  ;;  %v4976_v16 = vld [vmem:[%s5288_s17 + $0x80] sm:$0xff] }
 0x558   : > { %4715 = vst.msk [vmem:[%s8594_s23 + $0x28] sm:$0xff] %vm171_vm3, %v4683_v5 }
 0x559   : > { %4714 = vst.msk [vmem:[%s8594_s23 + $0x20] sm:$0xff] %vm171_vm3, %v4682_v4  ;;  %v3799_v53 = vpop.permute.xlu1 %3798 }
 0x55a   : > { %v3705_v52 = vpop.permute.xlu0 %3704  ;;  %v4252_v43 = vsel %vm1992_vm9, %v4220_v51, %v3799_v53 }
 0x55b   : > { %v4221_v35 = vsel %vm1959_vm8, %v4189_v1, %v3705_v52  ;;  %v4063_v52 = vsel %vm171_vm3, %v9423_v18, %v9422_v12 }
 0x55c   : > { %v4095_v32 = vsel %vm1827_vm4, %v4063_v52, %v9424_v49  ;;  %v4982_v52 = vld [vmem:[%s5288_s17 + $0xc8] sm:$0xff] }
 0x55d   : > { %v3403_v45 = vpop.permute.xlu1 %3402 }
 0x55e   : > { %v3309_v33 = vpop.permute.xlu0 %3308  ;;  %v4158_v2 = vsel %vm1893_vm6, %v4126_v41, %v3403_v45 }
 0x55f   : > { %v4127_v17 = vsel %vm1860_vm5, %v4095_v32, %v3309_v33 }
 0x561   : > { %v3991_v0 = vpop.permute.xlu1 %3990 }
 0x562   : > { %v4284_v30 = vsel %vm2025_vm10, %v4252_v43, %v3991_v0  ;;  %v3801_v37 = vpop.permute.xlu0 %3800 }
 0x563   : > { %5183 = vmatprep.mubr.msk.f32.mxu1 %vm2058_vm11, %v4284_v30  ;;  %v4253_v61 = vsel %vm1992_vm9, %v4221_v35, %v3801_v37 }
 0x565   : > { %v3595_v46 = vpop.permute.xlu1 %3594 }
 0x566   : > { %v3405_v44 = vpop.permute.xlu0 %3404  ;;  %v4190_v59 = vsel %vm1926_vm7, %v4158_v2, %v3595_v46  ;;  %v9425_v46 = vld [vmem:[#allocation10_spill] sm:$0xff] }
 0x567   : > { %v5155_v7 = vpop.f32.mrb[6].mxu1  ;;  %v4159_v43 = vsel %vm1893_vm6, %v4127_v17, %v3405_v44  ;;  %v9427_v44 = vld [vmem:[#allocation125_spill] sm:$0xff] }
 0x568   : > { %v4653_v38 = vadd.f32 %v5155_v7, %v4974_v56  ;;  %v4485_v3 = vpop.f32.mrb[7].mxu1  ;;  %v9426_v56 = vrot.slane %v9425_v46, 7  ;;  %v9429_v7 = vld [vmem:[#allocation21_spill] sm:$0xff] }
 0x569   : > { %v4652_v8 = vadd.f32 %v4973_v15, %v4485_v3  ;;  %v3597_v39 = vpop.permute.xlu1 %3596  ;;  %v4065_v1 = vsel %vm171_vm3, %v9429_v7, %v9428_v25  ;;  %v4987_v25 = vld [vmem:[%s5288_s17 + $0x108] sm:$0xff] }
 0x56a   : > { %v4685_v58 = vmax.f32 %v4653_v38, 0.0  ;;  %v3993_v9 = vpop.permute.xlu0 %3992  ;;  %v4191_v30 = vsel %vm1926_vm7, %v4159_v43, %v3597_v39  ;;  %v2624_v20 = vsel %vm287_vm0, 0.0, %v9426_v56  ;;  %v9430_v38 = vld [vmem:[#allocation85_spill] sm:$0xff] }
 0x56b   : > { %v4684_v60 = vmax.f32 %v4652_v8, 0.0  ;;  %v4285_v27 = vsel %vm2025_vm10, %v4253_v61, %v3993_v9  ;;  %v4064_v15 = vsel %vm171_vm3, %v2624_v20, %v9427_v44  ;;  %v9431_v8 = vld [vmem:[#allocation46_spill] sm:$0xff] }
 0x56c   : > { %4717 = vst.msk [vmem:[%s8594_s23 + $0x38] sm:$0xff] %vm171_vm3, %v4685_v58  ;;  %5184 = vmatmul.mubr.msk.f32.gmra.mrb[26].mxu1 %vm2058_vm11, %v4285_v27  ;;  %v4096_v3 = vsel %vm1827_vm4, %v4064_v15, %v9430_v38  ;;  %v4097_v39 = vsel %vm1827_vm4, %v4065_v1, %v9431_v8  ;;  %v4988_v15 = vld [vmem:[%s5288_s17 + $0x110] sm:$0xff] }
 0x56d   : > { %4716 = vst.msk [vmem:[%s8594_s23 + $0x30] sm:$0xff] %vm171_vm3, %v4684_v60  ;;  %v3311_v11 = vpop.permute.xlu1 %3310 }
 0x56e   : > { %v3707_v28 = vpop.permute.xlu0 %3706  ;;  %v4128_v61 = vsel %vm1860_vm5, %v4096_v3, %v3311_v11 }
 0x56f   : > { %v4222_v55 = vsel %vm1959_vm8, %v4190_v59, %v3707_v28 }
 0x571   : > { %v3803_v29 = vpop.permute.xlu1 %3802 }
 0x572   : > { %v3709_v40 = vpop.permute.xlu0 %3708  ;;  %v4254_v36 = vsel %vm1992_vm9, %v4222_v55, %v3803_v29 }
 0x573   : > { %v4223_v37 = vsel %vm1959_vm8, %v4191_v30, %v3709_v40 }
 0x575   : > { %v3407_v54 = vpop.permute.xlu1 %3406 }
 0x576   : > { %v3313_v57 = vpop.permute.xlu0 %3312  ;;  %v4160_v9 = vsel %vm1893_vm6, %v4128_v61, %v3407_v54  ;;  %v4989_v61 = vld [vmem:[%s5288_s17 + $0x120] sm:$0xff] }
 0x577   : > { %v4129_v60 = vsel %vm1860_vm5, %v4097_v39, %v3313_v57  ;;  %v4990_v39 = vld [vmem:[%s5288_s17 + $0x128] sm:$0xff] }
 0x579   : > { %v3995_v5 = vpop.permute.xlu1 %3994 }
 0x57a   : > { %v4286_v4 = vsel %vm2025_vm10, %v4254_v36, %v3995_v5  ;;  %v3805_v53 = vpop.permute.xlu0 %3804  ;;  %v4980_v5 = vld [vmem:[%s5288_s17 + $0xb0] sm:$0xff] }
 0x57b   : > { %v5158_v42 = vpop.f32.mrb[8].mxu1  ;;  %5186 = vmatprep.mubr.msk.f32.mxu1 %vm2058_vm11, %v4286_v4  ;;  %v4255_v10 = vsel %vm1992_vm9, %v4223_v37, %v3805_v53 }
 0x57c   : > { %v4655_v50 = vadd.f32 %v5158_v42, %v4976_v16  ;;  %v4495_v24 = vpop.f32.mrb[9].mxu1  ;;  %v4979_v16 = vld [vmem:[%s5288_s17 + $0xa8] sm:$0xff] }
 0x57d   : > { %v4654_v23 = vadd.f32 %v4975_v14, %v4495_v24  ;;  %v3599_v45 = vpop.permute.xlu1 %3598 }
 0x57e   : > { %v4687_v13 = vmax.f32 %v4655_v50, 0.0  ;;  %v3409_v51 = vpop.permute.xlu0 %3408  ;;  %v4192_v27 = vsel %vm1926_vm7, %v4160_v9, %v3599_v45  ;;  %v4981_v50 = vld [vmem:[%s5288_s17 + $0xc0] sm:$0xff] }
 0x57f   : > { %v4686_v0 = vmax.f32 %v4654_v23, 0.0  ;;  %v4161_v28 = vsel %vm1893_vm6, %v4129_v60, %v3409_v51  ;;  %v4983_v51 = vld [vmem:[%s5288_s17 + $0xd8] sm:$0xff] }
 0x580   : > { %4719 = vst.msk [vmem:[%s8594_s23 + $0x48] sm:$0xff] %vm171_vm3, %v4687_v13  ;;  %v4984_v13 = vld [vmem:[%s5288_s17 + $0xe0] sm:$0xff] }
 0x581   : > { %4718 = vst.msk [vmem:[%s8594_s23 + $0x40] sm:$0xff] %vm171_vm3, %v4686_v0  ;;  %v3601_v31 = vpop.permute.xlu1 %3600 }
 0x582   : > { %v3997_v34 = vpop.permute.xlu0 %3996  ;;  %v4193_v29 = vsel %vm1926_vm7, %v4161_v28, %v3601_v31 }
 0x583   : > { %v4287_v47 = vsel %vm2025_vm10, %v4255_v10, %v3997_v34  ;;  %v4986_v34 = vld [vmem:[%s5288_s17 + $0xf8] sm:$0xff] }
 0x584   : > { %5187 = vmatmul.mubr.msk.f32.gmra.mrb[28].mxu1 %vm2058_vm11, %v4287_v47  ;;  %v4985_v47 = vld [vmem:[%s5288_s17 + $0xf0] sm:$0xff] }
 0x585   : > { %v3713_v33 = vpop.permute.xlu1 %3712 }
 0x586   : > { %v3711_v63 = vpop.permute.xlu0 %3710  ;;  %v4225_v40 = vsel %vm1959_vm8, %v4193_v29, %v3713_v33 }
 0x587   : > { %v4224_v19 = vsel %vm1959_vm8, %v4192_v27, %v3711_v63 }
 0x589   : > { %v3809_v35 = vpop.permute.xlu1 %3808 }
 0x58a   : > { %v3807_v58 = vpop.permute.xlu0 %3806  ;;  %v4257_v22 = vsel %vm1992_vm9, %v4225_v40, %v3809_v35 }
 0x58b   : > { %v4256_v11 = vsel %vm1992_vm9, %v4224_v19, %v3807_v58  ;;  %v4992_v19 = vld [vmem:[%s5288_s17 + $0x140] sm:$0xff] }
 0x58d   : > { %v4001_v48 = vpop.permute.xlu1 %4000 }
 0x58e   : > { %v3999_v6 = vpop.permute.xlu0 %3998  ;;  %v4289_v54 = vsel %vm2025_vm10, %v4257_v22, %v4001_v48  ;;  %v4991_v48 = vld [vmem:[%s5288_s17 + $0x138] sm:$0xff] }
 0x58f   : > { %v4288_v21 = vsel %vm2025_vm10, %v4256_v11, %v3999_v6  ;;  %v5161_v41 = vpop.f32.mrb[10].mxu1 }
 0x590   : > { %v4657_v2 = vadd.f32 %v5161_v41, %v4978_v26  ;;  %v4505_v57 = vpop.f32.mrb[11].mxu1  ;;  %5189 = vmatprep.mubr.msk.f32.mxu1 %vm2058_vm11, %v4288_v21  ;;  %v4994_v21 = vld [vmem:[%s5288_s17 + $0x158] sm:$0xff]  ;;  %v4993_v41 = vld [vmem:[%s5288_s17 + $0x150] sm:$0xff] }
 0x591   : > { %v4656_v59 = vadd.f32 %v4977_v62, %v4505_v57  ;;  %5190 = vmatmul.mubr.msk.f32.gmra.mrb[30].mxu1 %vm2058_vm11, %v4289_v54 }
 0x592   : > { %v4689_v55 = vmax.f32 %v4657_v2, 0.0 }
 0x593   : > { %v4688_v36 = vmax.f32 %v4656_v59, 0.0 }
 0x594   : > { %4721 = vst.msk [vmem:[%s8594_s23 + $0x58] sm:$0xff] %vm171_vm3, %v4689_v55 }
 0x595   : > { %4720 = vst.msk [vmem:[%s8594_s23 + $0x50] sm:$0xff] %vm171_vm3, %v4688_v36 }
 0x5a3   : > { %v5164_v4 = vpop.f32.mrb[12].mxu1 }
 0x5a4   : > { %v4659_v53 = vadd.f32 %v5164_v4, %v4980_v5  ;;  %v4515_v14 = vpop.f32.mrb[13].mxu1  ;;  %v4996_v5 = vld [vmem:[%s5288_s17 + $0x170] sm:$0xff] }
 0x5a5   : > { %v4658_v42 = vadd.f32 %v4979_v16, %v4515_v14  ;;  %v4995_v16 = vld [vmem:[%s5288_s17 + $0x168] sm:$0xff] }
 0x5a6   : > { %v4691_v12 = vmax.f32 %v4659_v53, 0.0 }
 0x5a7   : > { %v4690_v18 = vmax.f32 %v4658_v42, 0.0 }
 0x5a8   : > { %4723 = vst.msk [vmem:[%s8594_s23 + $0x68] sm:$0xff] %vm171_vm3, %v4691_v12 }
 0x5a9   : > { %4722 = vst.msk [vmem:[%s8594_s23 + $0x60] sm:$0xff] %vm171_vm3, %v4690_v18 }
 0x5b7   : > { %v5167_v24 = vpop.f32.mrb[14].mxu1 }
 0x5b8   : > { %v4661_v49 = vadd.f32 %v5167_v24, %v4982_v52  ;;  %v4525_v32 = vpop.f32.mrb[15].mxu1  ;;  %v4998_v52 = vld [vmem:[%s5288_s17 + $0x188] sm:$0xff] }
 0x5b9   : > { %v4660_v23 = vadd.f32 %v4981_v50, %v4525_v32  ;;  %v4997_v50 = vld [vmem:[%s5288_s17 + $0x180] sm:$0xff] }
 0x5ba   : > { %v4693_v45 = vmax.f32 %v4661_v49, 0.0 }
 0x5bb   : > { %v4692_v17 = vmax.f32 %v4660_v23, 0.0 }
 0x5bc   : > { %4725 = vst.msk [vmem:[%s8594_s23 + $0x78] sm:$0xff] %vm171_vm3, %v4693_v45 }
 0x5bd   : > { %4724 = vst.msk [vmem:[%s8594_s23 + $0x70] sm:$0xff] %vm171_vm3, %v4692_v17 }
 0x5cb   : > { %v5170_v43 = vpop.f32.mrb[16].mxu1 }
 0x5cc   : > { %v4663_v0 = vadd.f32 %v5170_v43, %v4984_v13  ;;  %v4535_v30 = vpop.f32.mrb[17].mxu1 }
 0x5cd   : > { %v4662_v37 = vadd.f32 %v4983_v51, %v4535_v30 }
 0x5ce   : > { %v4695_v31 = vmax.f32 %v4663_v0, 0.0 }
 0x5cf   : > { %v4694_v10 = vmax.f32 %v4662_v37, 0.0 }
 0x5d0   : > { %4727 = vst.msk [vmem:[%s8594_s23 + $0x88] sm:$0xff] %vm171_vm3, %v4695_v31 }
 0x5d1   : > { %4726 = vst.msk [vmem:[%s8594_s23 + $0x80] sm:$0xff] %vm171_vm3, %v4694_v10 }
 0x5df   : > { %v5173_v33 = vpop.f32.mrb[18].mxu1 }
 0x5e0   : > { %v4665_v63 = vadd.f32 %v5173_v33, %v4986_v34  ;;  %v4545_v46 = vpop.f32.mrb[19].mxu1 }
 0x5e1   : > { %v4664_v56 = vadd.f32 %v4985_v47, %v4545_v46 }
 0x5e2   : > { %v4697_v20 = vmax.f32 %v4665_v63, 0.0 }
 0x5e3   : > { %v4696_v44 = vmax.f32 %v4664_v56, 0.0 }
 0x5e4   : > { %4729 = vst.msk [vmem:[%s8594_s23 + $0x98] sm:$0xff] %vm171_vm3, %v4697_v20 }
 0x5e5   : > { %4728 = vst.msk [vmem:[%s8594_s23 + $0x90] sm:$0xff] %vm171_vm3, %v4696_v44 }
 0x5f7   : > { %v5176_v7 = vpop.f32.mrb[20].mxu1 }
 0x5f8   : > { %v4667_v1 = vadd.f32 %v5176_v7, %v4988_v15  ;;  %v4555_v38 = vpop.f32.mrb[21].mxu1 }
 0x5f9   : > { %v4666_v3 = vadd.f32 %v4987_v25, %v4555_v38 }
 0x5fa   : > { %v4699_v35 = vmax.f32 %v4667_v1, 0.0 }
 0x5fb   : > { %v4698_v8 = vmax.f32 %v4666_v3, 0.0 }
 0x5fc   : > { %4731 = vst.msk [vmem:[%s8594_s23 + $0xa8] sm:$0xff] %vm171_vm3, %v4699_v35 }
 0x5fd   : > { %4730 = vst.msk [vmem:[%s8594_s23 + $0xa0] sm:$0xff] %vm171_vm3, %v4698_v8 }
 0x60f   : > { %v5179_v58 = vpop.f32.mrb[22].mxu1 }
 0x610   : > { %v4669_v9 = vadd.f32 %v5179_v58, %v4990_v39  ;;  %v4565_v60 = vpop.f32.mrb[23].mxu1 }
 0x611   : > { %v4668_v27 = vadd.f32 %v4989_v61, %v4565_v60 }
 0x612   : > { %v4701_v28 = vmax.f32 %v4669_v9, 0.0 }
 0x613   : > { %v4700_v29 = vmax.f32 %v4668_v27, 0.0 }
 0x614   : > { %4733 = vst.msk [vmem:[%s8594_s23 + $0xb8] sm:$0xff] %vm171_vm3, %v4701_v28 }
 0x615   : > { %4732 = vst.msk [vmem:[%s8594_s23 + $0xb0] sm:$0xff] %vm171_vm3, %v4700_v29 }
 0x627   : > { %v5182_v26 = vpop.f32.mrb[24].mxu1 }
 0x628   : > { %v4671_v40 = vadd.f32 %v5182_v26, %v4992_v19  ;;  %v4575_v11 = vpop.f32.mrb[25].mxu1 }
 0x629   : > { %v4670_v6 = vadd.f32 %v4991_v48, %v4575_v11 }
 0x62a   : > { %v4703_v62 = vmax.f32 %v4671_v40, 0.0 }
 0x62b   : > { %v4702_v22 = vmax.f32 %v4670_v6, 0.0 }
 0x62c   : > { %4735 = vst.msk [vmem:[%s8594_s23 + $0xc8] sm:$0xff] %vm171_vm3, %v4703_v62 }
 0x62d   : > { %4734 = vst.msk [vmem:[%s8594_s23 + $0xc0] sm:$0xff] %vm171_vm3, %v4702_v22 }
 0x63f   : > { %v5185_v54 = vpop.f32.mrb[26].mxu1 }
 0x640   : > { %v4673_v2 = vadd.f32 %v5185_v54, %v4994_v21  ;;  %v4585_v57 = vpop.f32.mrb[27].mxu1 }
 0x641   : > { %v4672_v59 = vadd.f32 %v4993_v41, %v4585_v57 }
 0x642   : > { %v4705_v55 = vmax.f32 %v4673_v2, 0.0 }
 0x643   : > { %v4704_v36 = vmax.f32 %v4672_v59, 0.0 }
 0x644   : > { %4737 = vst.msk [vmem:[%s8594_s23 + $0xd8] sm:$0xff] %vm171_vm3, %v4705_v55 }
 0x645   : > { %4736 = vst.msk [vmem:[%s8594_s23 + $0xd0] sm:$0xff] %vm171_vm3, %v4704_v36 }
 0x657   : > { %v5188_v4 = vpop.f32.mrb[28].mxu1 }
 0x658   : > { %v4675_v53 = vadd.f32 %v5188_v4, %v4996_v5  ;;  %v4595_v14 = vpop.f32.mrb[29].mxu1 }
 0x659   : > { %v4674_v42 = vadd.f32 %v4995_v16, %v4595_v14 }
 0x65a   : > { %v4707_v12 = vmax.f32 %v4675_v53, 0.0 }
 0x65b   : > { %v4706_v18 = vmax.f32 %v4674_v42, 0.0 }
 0x65c   : > { %4739 = vst.msk [vmem:[%s8594_s23 + $0xe8] sm:$0xff] %vm171_vm3, %v4707_v12 }
 0x65d   : > { %4738 = vst.msk [vmem:[%s8594_s23 + $0xe0] sm:$0xff] %vm171_vm3, %v4706_v18 }
 0x664   : > { %v5191_v24 = vpop.f32.mrb[30].mxu1 }
 0x665   : > { %v4677_v49 = vadd.f32 %v5191_v24, %v4998_v52  ;;  %v4605_v32 = vpop.f32.mrb[31].mxu1 }
 0x666   : > { %v4676_v23 = vadd.f32 %v4997_v50, %v4605_v32 }
 0x667   : > { %v4709_v45 = vmax.f32 %v4677_v49, 0.0 }
 0x668   : > { %v4708_v17 = vmax.f32 %v4676_v23, 0.0 }
 0x669   : > { %4741 = vst.msk [vmem:[%s8594_s23 + $0xf8] sm:$0xff] %vm171_vm3, %v4709_v45 }
 0x66a   : > { %4740 = vst.msk [vmem:[%s8594_s23 + $0xf0] sm:$0xff] %vm171_vm3, %v4708_v17 }
 0x66b PF: > { %s13_s12 = sadd.s32 1, %s5243_s12  }
 0x66c   : > { %p10_p4 = scmp.ge.s32.totalorder %s13_s12, 4  }
 0x66e   :  { %12 = sbr.rel (!%p10_p4) target bundleno = 1 (0x1), region = 67 }

</bundles_post_ra>
